<compile_context>
chip_gen: v6e
topology: v6e:2x2x1
jax: 0.10.0
libtpu: 0.0.40
codegen_flags: <defaults>
</compile_context>

<pallas_src>
import functools

import jax
import jax.numpy as jnp
from jax.experimental import pallas as pl
from jax.experimental.pallas import tpu as pltpu

_VMEM_LIMIT = 48 * 1024 * 1024  # > scoped default on v5e/v6e, < v7x physical


def _round_up(x, m):
    return (x + m - 1) // m * m


def _lead_pad(W):
    # Leading zero rows so the valid-output store offset (W+3) is 16-aligned
    # (bf16 packs 16 rows per sublane group) -> unmasked, lane/sublane-dense
    # stores.
    return (-(W + 3)) % 16


# --------------------------- padded-flat layout -----------------------------
# Activations between layers are kept as (N, R, C) bf16 with
#   R = p0 + (H+2)*(W+2) + 2,   row  p0 + hh*(W+2) + ww  <->  padded pixel
# (hh, ww); borders / lead / slack rows are zero.  The direct-conv kernel both
# consumes and produces this layout, so layers chain without XLA copies.


def to_padded_flat(y_nhwc):
    N, H, W, C = y_nhwc.shape
    p0 = _lead_pad(W)
    yp = jnp.pad(y_nhwc, ((0, 0), (1, 1), (1, 1), (0, 0)))
    yf = yp.reshape(N, (H + 2) * (W + 2), C)
    return jnp.pad(yf, ((0, 0), (p0, 2), (0, 0)))


def from_padded_flat(y_pf, H, W):
    N, _, C = y_pf.shape
    p0 = _lead_pad(W)
    Hp, Wp = H + 2, W + 2
    y = y_pf[:, p0:p0 + Hp * Wp, :].reshape(N, Hp, Wp, C)
    return y[:, 1:H + 1, 1:W + 1, :]


def make_border_mask(H, W):
    # 1.0 at interior pixels, 0.0 at padding borders / lead / slack rows.
    p0 = _lead_pad(W)
    Hp, Wp = H + 2, W + 2
    m = jnp.zeros((Hp, Wp), jnp.float32).at[1:H + 1, 1:W + 1].set(1.0)
    return jnp.pad(m.reshape(Hp * Wp, 1), ((p0, 2), (0, 0)))


# ----------------------------- Pallas kernels ------------------------------


def _dconv3x3_kernel(*refs, H, W, p0, has_bn1, has_bn2, has_res):
    """Direct 3x3 stride-1 conv for one image (padded-flat layout).

    Optional fusions: BN1+ReLU prologue (with border re-zeroing), BN2+ReLU
    epilogue, residual add.  bf16 MXU operands, f32 accumulation.
    """
    it = iter(refs)
    x_ref = next(it)
    mask_ref = next(it)
    s1_ref = next(it) if has_bn1 else None
    b1_ref = next(it) if has_bn1 else None
    w_ref = next(it)                      # (9, Cin, Ct) bf16
    s2_ref = next(it) if has_bn2 else None
    b2_ref = next(it) if has_bn2 else None
    res_ref = next(it) if has_res else None
    o_ref = next(it)
    act_ref = next(it)                    # VMEM scratch (R, Cin) f32

    Wp = W + 2
    HW = H * Wp                           # accumulator rows (incl. 2 wrap cols)

    x32 = x_ref[...].astype(jnp.float32)
    if has_bn1:
        act = jnp.maximum(x32 * s1_ref[...] + b1_ref[...], 0.0)
        act = jnp.where(mask_ref[...] > 0.5, act, 0.0)   # keep zero padding
    else:
        act = x32                                        # already post-ReLU
    act_ref[...] = act

    def tap(t):
        ky, kx = divmod(t, 3)
        a_t = act_ref[pl.ds(p0 + ky * Wp + kx, HW), :].astype(jnp.bfloat16)
        return jnp.dot(a_t, w_ref[t], preferred_element_type=jnp.float32)

    acc = tap(0)
    for t in range(1, 9):
        acc = acc + tap(t)

    if has_bn2:
        acc = jnp.maximum(acc * s2_ref[...] + b2_ref[...], 0.0)
    if has_res:
        acc = acc + res_ref[pl.ds(p0 + Wp + 1, HW), :].astype(jnp.float32)

    # zero the wrap-around columns so the stored tensor is a clean padded-flat
    # activation for the next layer.
    omask = mask_ref[pl.ds(p0 + Wp + 1, HW), :]
    acc = jnp.where(omask > 0.5, acc, 0.0)

    o_ref[...] = jnp.zeros_like(o_ref)
    o_ref[pl.ds(p0 + Wp + 1, HW), :] = acc.astype(o_ref.dtype)


def _gemm_fused_kernel(*refs, has_bn_in, has_bn_out):
    """Flat GEMM (full K per block) with optional BN+ReLU prologue/epilogue."""
    it = iter(refs)
    a_ref = next(it)
    s1_ref = next(it) if has_bn_in else None
    b1_ref = next(it) if has_bn_in else None
    b_ref = next(it)
    s2_ref = next(it) if has_bn_out else None
    b2_ref = next(it) if has_bn_out else None
    o_ref = next(it)

    a = a_ref[...]
    if has_bn_in:
        a = jnp.maximum(a.astype(jnp.float32) * s1_ref[...] + b1_ref[...], 0.0)
    out = jnp.dot(a.astype(jnp.bfloat16), b_ref[...],
                  preferred_element_type=jnp.float32)
    if has_bn_out:
        out = jnp.maximum(out * s2_ref[...] + b2_ref[...], 0.0)
    o_ref[...] = out.astype(o_ref.dtype)


# ----------------------------- kernel wrappers ------------------------------


def dconv3x3(x_pf, w9, mask, *, bn1=None, bn2=None, res_pf=None, H, W,
             out_dtype=jnp.bfloat16):
    """Direct 3x3 stride-1 conv on padded-flat activations.

    x_pf: (N, R, Cin) bf16; w9: (9, Cin, Cout) bf16; mask: (R, 1) f32.
    Returns (N, R, Cout) in the same padded-flat layout.
    """
    N, R, Cin = x_pf.shape
    Cout = w9.shape[-1]
    p0 = _lead_pad(W)
    assert R == p0 + (H + 2) * (W + 2) + 2, (R, H, W)

    if Cout <= 256:
        Ct = Cout
    elif Cout % 256 == 0:
        Ct = 256
    elif Cout % 128 == 0:
        Ct = 128
    else:
        Ct = Cout
    grid = (N, Cout // Ct)

    in_specs = [pl.BlockSpec((None, R, Cin), lambda n, j: (n, 0, 0)),
                pl.BlockSpec((R, 1), lambda n, j: (0, 0))]
    args = [x_pf, mask]
    if bn1 is not None:
        s1, b1 = bn1
        in_specs += [pl.BlockSpec((1, Cin), lambda n, j: (0, 0))] * 2
        args += [s1.reshape(1, Cin).astype(jnp.float32),
                 b1.reshape(1, Cin).astype(jnp.float32)]
    in_specs += [pl.BlockSpec((9, Cin, Ct), lambda n, j: (0, 0, j))]
    args += [w9]
    if bn2 is not None:
        s2, b2 = bn2
        in_specs += [pl.BlockSpec((1, Ct), lambda n, j: (0, j))] * 2
        args += [s2.reshape(1, Cout).astype(jnp.float32),
                 b2.reshape(1, Cout).astype(jnp.float32)]
    if res_pf is not None:
        in_specs += [pl.BlockSpec((None, R, Ct), lambda n, j: (n, 0, j))]
        args += [res_pf]

    kernel = functools.partial(
        _dconv3x3_kernel, H=H, W=W, p0=p0,
        has_bn1=bn1 is not None, has_bn2=bn2 is not None,
        has_res=res_pf is not None)

    cost = pl.CostEstimate(
        flops=int(2 * N * H * W * 9 * Cin * Cout),
        transcendentals=0,
        bytes_accessed=int(2 * (N * R * Cin + 9 * Cin * Cout
                                + N * R * Cout * (2 if res_pf is not None else 1))),
    )
    return pl.pallas_call(
        kernel,
        out_shape=jax.ShapeDtypeStruct((N, R, Cout), out_dtype),
        grid=grid,
        in_specs=in_specs,
        out_specs=pl.BlockSpec((None, R, Ct), lambda n, j: (n, 0, j)),
        scratch_shapes=[pltpu.VMEM((R, Cin), jnp.float32)],
        compiler_params=pltpu.CompilerParams(
            dimension_semantics=("parallel", "parallel"),
            vmem_limit_bytes=_VMEM_LIMIT),
        cost_estimate=cost,
    )(*args)


def fused_gemm(a, b, *, bn_in=None, bn_out=None, out_dtype=jnp.bfloat16,
               tm_max=512):
    """(M, K) @ (K, Nc) with full-K blocks and optional fused BN+ReLU."""
    M, K = a.shape
    Kb, Nc = b.shape
    assert K == Kb, (K, Kb)

    Mp = _round_up(M, 8)
    if Mp != M:
        a = jnp.pad(a, ((0, Mp - M), (0, 0)))
    tm = Mp
    for cand in (tm_max, 256, 128, 64, 32, 16, 8):
        if Mp % cand == 0:
            tm = cand
            break
    if Nc <= 256:
        tn = Nc
    elif Nc % 256 == 0:
        tn = 256
    elif Nc % 128 == 0:
        tn = 128
    else:
        tn = Nc
    grid = (Mp // tm, Nc // tn)

    in_specs = [pl.BlockSpec((tm, K), lambda i, j: (i, 0))]
    args = [a]
    if bn_in is not None:
        s1, b1 = bn_in
        in_specs += [pl.BlockSpec((1, K), lambda i, j: (0, 0))] * 2
        args += [s1.reshape(1, K).astype(jnp.float32),
                 b1.reshape(1, K).astype(jnp.float32)]
    in_specs += [pl.BlockSpec((K, tn), lambda i, j: (0, j))]
    args += [b]
    if bn_out is not None:
        s2, b2 = bn_out
        in_specs += [pl.BlockSpec((1, tn), lambda i, j: (0, j))] * 2
        args += [s2.reshape(1, Nc).astype(jnp.float32),
                 b2.reshape(1, Nc).astype(jnp.float32)]

    kernel = functools.partial(_gemm_fused_kernel,
                               has_bn_in=bn_in is not None,
                               has_bn_out=bn_out is not None)
    cost = pl.CostEstimate(
        flops=int(2 * M * K * Nc), transcendentals=0,
        bytes_accessed=int(2 * (M * K + K * Nc + M * Nc)))
    out = pl.pallas_call(
        kernel,
        out_shape=jax.ShapeDtypeStruct((Mp, Nc), out_dtype),
        grid=grid,
        in_specs=in_specs,
        out_specs=pl.BlockSpec((tm, tn), lambda i, j: (i, j)),
        compiler_params=pltpu.CompilerParams(
            dimension_semantics=("parallel", "parallel"),
            vmem_limit_bytes=_VMEM_LIMIT),
        cost_estimate=cost,
    )(*args)
    return out[:M]


# --------------------- layer-0 fallbacks (stride / shortcut) ----------------


def conv3x3_patches(x_nhwc, w9, bn1, bn2, stride):
    """Stride-2 3x3 conv: XLA-side bn1+relu + tap extraction, Pallas GEMM."""
    N, H, W, Cin = x_nhwc.shape
    Cout = w9.shape[-1]
    s1, b1 = bn1
    act = jnp.maximum(x_nhwc.astype(jnp.float32) * s1 + b1, 0.0)
    actp = jnp.pad(act, ((0, 0), (1, 1), (1, 1), (0, 0)))
    Ho, Wo = H // stride, W // stride
    taps = []
    for ky in range(3):
        for kx in range(3):
            taps.append(actp[:, ky:ky + (Ho - 1) * stride + 1:stride,
                             kx:kx + (Wo - 1) * stride + 1:stride, :])
    patches = jnp.stack(taps, axis=3)                     # (N, Ho, Wo, 9, Cin)
    a = patches.reshape(N * Ho * Wo, 9 * Cin).astype(jnp.bfloat16)
    b = w9.reshape(9 * Cin, Cout)
    out = fused_gemm(a, b, bn_out=bn2)                    # fused relu(bn2(.))
    return out.reshape(N, Ho, Wo, Cout)


def conv1x1_shortcut(x_nhwc, w_io, bn1, stride):
    """Shortcut conv1x1(relu(bn1(x)), stride) with the BN+ReLU fused in."""
    xs = x_nhwc[:, ::stride, ::stride, :]
    N, Ho, Wo, Cin = xs.shape
    a = xs.reshape(N * Ho * Wo, Cin)
    out = fused_gemm(a, w_io, bn_in=bn1)
    return out.reshape(N, Ho, Wo, w_io.shape[-1])


# ------------------------------ model forward -------------------------------


def basic_block_forward(x_pf, x_nhwc, p, stride, H, W):
    """x_pf: padded-flat bf16 input of this block; x_nhwc only needed for
    layer-0 special paths (stride>1 or channel change)."""
    Cin, Cout = p["conv1_w9"].shape[1], p["conv1_w9"].shape[2]
    equal = p["sc_w"] is None            # static pytree-structure decision
    Ho, Wo = H // stride, W // stride
    bn1 = (p["bn1_scale"], p["bn1_shift"])
    bn2 = (p["bn2_scale"], p["bn2_shift"])

    if stride == 1:
        mask_in = make_border_mask(H, W)
        out1_pf = dconv3x3(x_pf, p["conv1_w9"], mask_in,
                           bn1=bn1, bn2=bn2, H=H, W=W)
    else:
        out1 = conv3x3_patches(x_nhwc, p["conv1_w9"], bn1, bn2, stride)
        out1_pf = to_padded_flat(out1)

    if equal:                            # identity shortcut (Cin==Cout, s==1)
        res_pf = x_pf
    else:
        sc = conv1x1_shortcut(x_nhwc, p["sc_w"], bn1, stride)
        res_pf = to_padded_flat(sc)

    mask_out = make_border_mask(Ho, Wo)
    y_pf = dconv3x3(out1_pf, p["conv2_w9"], mask_out,
                    res_pf=res_pf, H=Ho, W=Wo)
    return y_pf, Ho, Wo


@functools.partial(jax.jit, static_argnums=(2,))
def network_block_forward(x_nchw, layer_params, strides):
    x_nhwc = jnp.transpose(x_nchw, (0, 2, 3, 1)).astype(jnp.bfloat16)
    N, H, W, _ = x_nhwc.shape
    x_pf = to_padded_flat(x_nhwc)
    for i, (p, s) in enumerate(zip(layer_params, strides)):
        x_pf, H, W = basic_block_forward(
            x_pf, x_nhwc if i == 0 else None, p, s, H, W)
    y = from_padded_flat(x_pf, H, W).astype(jnp.float32)
    return jnp.transpose(y, (0, 3, 1, 2))


# ------------------------------ param creation ------------------------------


def init_network_block_params(key, nb_layers, in_ch, out_ch, stride):
    eps = 1e-5
    params, strides = [], []
    for i in range(nb_layers):
        cin = in_ch if i == 0 else out_ch
        s = stride if i == 0 else 1
        key, *ks = jax.random.split(key, 13)

        def bn(kg, kb, km, kv, c):
            gamma = jax.random.uniform(kg, (c,), minval=0.5, maxval=1.5)
            beta = 0.1 * jax.random.normal(kb, (c,))
            mean = 0.1 * jax.random.normal(km, (c,))
            var = jax.random.uniform(kv, (c,), minval=0.5, maxval=1.5)
            scale = gamma / jnp.sqrt(var + eps)
            shift = beta - mean * scale
            return scale.astype(jnp.float32), shift.astype(jnp.float32)

        bn1_scale, bn1_shift = bn(ks[0], ks[1], ks[2], ks[3], cin)
        bn2_scale, bn2_shift = bn(ks[4], ks[5], ks[6], ks[7], out_ch)
        conv1_w = (jax.random.normal(ks[8], (3, 3, cin, out_ch))
                   * (2.0 / (9 * out_ch)) ** 0.5)
        conv2_w = (jax.random.normal(ks[9], (3, 3, out_ch, out_ch))
                   * (2.0 / (9 * out_ch)) ** 0.5)
        sc_w = (None if cin == out_ch else
                (jax.random.normal(ks[10], (cin, out_ch))
                 * (2.0 / out_ch) ** 0.5).astype(jnp.bfloat16))
        params.append(dict(
            bn1_scale=bn1_scale, bn1_shift=bn1_shift,
            bn2_scale=bn2_scale, bn2_shift=bn2_shift,
            conv1_w9=conv1_w.reshape(9, cin, out_ch).astype(jnp.bfloat16),
            conv2_w9=conv2_w.reshape(9, out_ch, out_ch).astype(jnp.bfloat16),
            sc_w=sc_w))  # None <=> identity shortcut (static structure)
        strides.append(s)
    return params, tuple(strides)


# ----------------------------------- main ------------------------------------

if __name__ == "__main__":
    key = jax.random.PRNGKey(0)
    k_x, k_p = jax.random.split(key)

    # NetworkBlock(nb_layers=2, in_channels=4, out_channels=8, block=BasicBlock,
    #              stride=2, drop_rate=0.0)
    nb_layers, in_ch, out_ch, stride = 2, 4, 8, 2
    x = jax.random.normal(k_x, (2, 4, 16, 16), dtype=jnp.float32)  # NCHW

    layer_params, strides = init_network_block_params(
        k_p, nb_layers, in_ch, out_ch, stride)

    y = network_block_forward(x, layer_params, strides)
    y = jax.block_until_ready(y)
    assert y.shape == (2, out_ch, 16 // stride, 16 // stride), y.shape
    assert bool(jnp.all(jnp.isfinite(y)))
    print("KERNEL_OK")
</pallas_src>

<mosaic_0001>
module attributes {stable_mosaic.version = 11 : i64} {
  func.func @_gemm_fused_kernel(%arg0: i32, %arg1: i32, %arg2: memref<128x36xbf16, #tpu.memory_space<vmem>>, %arg3: memref<36x8xbf16, #tpu.memory_space<vmem>>, %arg4: memref<1x8xf32, #tpu.memory_space<vmem>>, %arg5: memref<1x8xf32, #tpu.memory_space<vmem>>, %arg6: memref<128x8xbf16, #tpu.memory_space<vmem>>) attributes {dimension_semantics = [#tpu.dimension_semantics<parallel>, #tpu.dimension_semantics<parallel>], iteration_bounds = array<i64: 1, 1>, scalar_prefetch = 0 : i64, scratch_operands = 0 : i64, tpu.core_type = #tpu.core_type<tc>, window_params = [{transform_indices = @transform_0, window_bounds = array<i64: 128, 36>}, {transform_indices = @transform_1, window_bounds = array<i64: 36, 8>}, {transform_indices = @transform_2, window_bounds = array<i64: 1, 8>}, {transform_indices = @transform_3, window_bounds = array<i64: 1, 8>}, {transform_indices = @transform_4, window_bounds = array<i64: 128, 8>}]} {
    %c0 = arith.constant 0 : index
    %c0_0 = arith.constant 0 : index
    %0 = vector.load %arg2[%c0, %c0_0] : memref<128x36xbf16, #tpu.memory_space<vmem>>, vector<128x36xbf16>
    %c0_1 = arith.constant 0 : index
    %c0_2 = arith.constant 0 : index
    %1 = vector.load %arg3[%c0_1, %c0_2] : memref<36x8xbf16, #tpu.memory_space<vmem>>, vector<36x8xbf16>
    %cst = arith.constant dense<0.000000e+00> : vector<128x8xf32>
    %2 = tpu.matmul %0, %1, %cst {dimension_numbers = #tpu.dot_dimension_numbers<[1], [0], [0], [1], [0, 0, 1, 1], [], []>} : vector<128x36xbf16>, vector<36x8xbf16>, vector<128x8xf32> -> vector<128x8xf32>
    %c0_3 = arith.constant 0 : index
    %c0_4 = arith.constant 0 : index
    %3 = vector.load %arg4[%c0_3, %c0_4] : memref<1x8xf32, #tpu.memory_space<vmem>>, vector<1x8xf32>
    %4 = vector.broadcast %3 : vector<1x8xf32> to vector<128x8xf32>
    %5 = arith.mulf %2, %4 : vector<128x8xf32>
    %c0_5 = arith.constant 0 : index
    %c0_6 = arith.constant 0 : index
    %6 = vector.load %arg5[%c0_5, %c0_6] : memref<1x8xf32, #tpu.memory_space<vmem>>, vector<1x8xf32>
    %7 = vector.broadcast %6 : vector<1x8xf32> to vector<128x8xf32>
    %8 = arith.addf %5, %7 : vector<128x8xf32>
    %cst_7 = arith.constant 0.000000e+00 : f32
    %9 = vector.broadcast %cst_7 : f32 to vector<128x8xf32>
    %10 = arith.maximumf %8, %9 : vector<128x8xf32>
    %11 = arith.truncf %10 : vector<128x8xf32> to vector<128x8xbf16>
    %c0_8 = arith.constant 0 : index
    %c0_9 = arith.constant 0 : index
    %12 = vector.load %arg6[%c0_8, %c0_9] : memref<128x8xbf16, #tpu.memory_space<vmem>>, vector<128x8xbf16>
    tpu.vector_store %arg6[%c0_8, %c0_9], %11 {strides = array<i32>} : memref<128x8xbf16, #tpu.memory_space<vmem>>, vector<128x8xbf16>,
    return
  }
  func.func @transform_0(%arg0: i32, %arg1: i32) -> (i32, i32) {
    %c0_i32 = arith.constant 0 : i32
    %c0_i32_0 = arith.constant 0 : i32
    return %arg0, %c0_i32 : i32, i32
  }
  func.func @transform_1(%arg0: i32, %arg1: i32) -> (i32, i32) {
    %c0_i32 = arith.constant 0 : i32
    %c0_i32_0 = arith.constant 0 : i32
    return %c0_i32, %arg1 : i32, i32
  }
  func.func @transform_2(%arg0: i32, %arg1: i32) -> (i32, i32) {
    %c0_i32 = arith.constant 0 : i32
    %c0_i32_0 = arith.constant 0 : i32
    return %c0_i32, %arg1 : i32, i32
  }
  func.func @transform_3(%arg0: i32, %arg1: i32) -> (i32, i32) {
    %c0_i32 = arith.constant 0 : i32
    %c0_i32_0 = arith.constant 0 : i32
    return %c0_i32, %arg1 : i32, i32
  }
  func.func @transform_4(%arg0: i32, %arg1: i32) -> (i32, i32) {
    %c0_i32 = arith.constant 0 : i32
    return %arg0, %arg1 : i32, i32
  }
}

module attributes {stable_mosaic.version = 11 : i64} {
  func.func @_gemm_fused_kernel(%arg0: i32, %arg1: i32, %arg2: memref<128x4xbf16, #tpu.memory_space<vmem>>, %arg3: memref<1x4xf32, #tpu.memory_space<vmem>>, %arg4: memref<1x4xf32, #tpu.memory_space<vmem>>, %arg5: memref<4x8xbf16, #tpu.memory_space<vmem>>, %arg6: memref<128x8xbf16, #tpu.memory_space<vmem>>) attributes {dimension_semantics = [#tpu.dimension_semantics<parallel>, #tpu.dimension_semantics<parallel>], iteration_bounds = array<i64: 1, 1>, scalar_prefetch = 0 : i64, scratch_operands = 0 : i64, tpu.core_type = #tpu.core_type<tc>, window_params = [{transform_indices = @transform_0, window_bounds = array<i64: 128, 4>}, {pipeline_mode = #tpu.pipeline_mode<synchronous>, transform_indices = @transform_1, window_bounds = array<i64: 1, 4>}, {pipeline_mode = #tpu.pipeline_mode<synchronous>, transform_indices = @transform_2, window_bounds = array<i64: 1, 4>}, {transform_indices = @transform_3, window_bounds = array<i64: 4, 8>}, {transform_indices = @transform_4, window_bounds = array<i64: 128, 8>}]} {
    %c0 = arith.constant 0 : index
    %c0_0 = arith.constant 0 : index
    %0 = vector.load %arg2[%c0, %c0_0] : memref<128x4xbf16, #tpu.memory_space<vmem>>, vector<128x4xbf16>
    %1 = arith.extf %0 : vector<128x4xbf16> to vector<128x4xf32>
    %c0_1 = arith.constant 0 : index
    %c0_2 = arith.constant 0 : index
    %2 = vector.load %arg3[%c0_1, %c0_2] : memref<1x4xf32, #tpu.memory_space<vmem>>, vector<1x4xf32>
    %3 = vector.broadcast %2 : vector<1x4xf32> to vector<128x4xf32>
    %4 = arith.mulf %1, %3 : vector<128x4xf32>
    %c0_3 = arith.constant 0 : index
    %c0_4 = arith.constant 0 : index
    %5 = vector.load %arg4[%c0_3, %c0_4] : memref<1x4xf32, #tpu.memory_space<vmem>>, vector<1x4xf32>
    %6 = vector.broadcast %5 : vector<1x4xf32> to vector<128x4xf32>
    %7 = arith.addf %4, %6 : vector<128x4xf32>
    %cst = arith.constant 0.000000e+00 : f32
    %8 = vector.broadcast %cst : f32 to vector<128x4xf32>
    %9 = arith.maximumf %7, %8 : vector<128x4xf32>
    %10 = arith.truncf %9 : vector<128x4xf32> to vector<128x4xbf16>
    %c0_5 = arith.constant 0 : index
    %c0_6 = arith.constant 0 : index
    %11 = vector.load %arg5[%c0_5, %c0_6] : memref<4x8xbf16, #tpu.memory_space<vmem>>, vector<4x8xbf16>
    %cst_7 = arith.constant dense<0.000000e+00> : vector<128x8xf32>
    %12 = tpu.matmul %10, %11, %cst_7 {dimension_numbers = #tpu.dot_dimension_numbers<[1], [0], [0], [1], [0, 0, 1, 1], [], []>} : vector<128x4xbf16>, vector<4x8xbf16>, vector<128x8xf32> -> vector<128x8xf32>
    %13 = arith.truncf %12 : vector<128x8xf32> to vector<128x8xbf16>
    %c0_8 = arith.constant 0 : index
    %c0_9 = arith.constant 0 : index
    %14 = vector.load %arg6[%c0_8, %c0_9] : memref<128x8xbf16, #tpu.memory_space<vmem>>, vector<128x8xbf16>
    tpu.vector_store %arg6[%c0_8, %c0_9], %13 {strides = array<i32>} : memref<128x8xbf16, #tpu.memory_space<vmem>>, vector<128x8xbf16>,
    return
  }
  func.func @transform_0(%arg0: i32, %arg1: i32) -> (i32, i32) {
    %c0_i32 = arith.constant 0 : i32
    %c0_i32_0 = arith.constant 0 : i32
    return %arg0, %c0_i32 : i32, i32
  }
  func.func @transform_1(%arg0: i32, %arg1: i32) -> (i32, i32) {
    %c0_i32 = arith.constant 0 : i32
    %c0_i32_0 = arith.constant 0 : i32
    %c0_i32_1 = arith.constant 0 : i32
    return %c0_i32, %c0_i32_0 : i32, i32
  }
  func.func @transform_2(%arg0: i32, %arg1: i32) -> (i32, i32) {
    %c0_i32 = arith.constant 0 : i32
    %c0_i32_0 = arith.constant 0 : i32
    %c0_i32_1 = arith.constant 0 : i32
    return %c0_i32, %c0_i32_0 : i32, i32
  }
  func.func @transform_3(%arg0: i32, %arg1: i32) -> (i32, i32) {
    %c0_i32 = arith.constant 0 : i32
    %c0_i32_0 = arith.constant 0 : i32
    return %c0_i32, %arg1 : i32, i32
  }
  func.func @transform_4(%arg0: i32, %arg1: i32) -> (i32, i32) {
    %c0_i32 = arith.constant 0 : i32
    return %arg0, %arg1 : i32, i32
  }
}

module attributes {stable_mosaic.version = 11 : i64} {
  func.func @_dconv3x3_kernel(%arg0: i32, %arg1: i32, %arg2: memref<1x107x8xbf16, #tpu.memory_space<vmem>>, %arg3: memref<107x1xf32, #tpu.memory_space<vmem>>, %arg4: memref<9x8x8xbf16, #tpu.memory_space<vmem>>, %arg5: memref<1x107x8xbf16, #tpu.memory_space<vmem>>, %arg6: memref<1x107x8xbf16, #tpu.memory_space<vmem>>, %arg7: memref<107x8xf32, #tpu.memory_space<vmem>>) attributes {dimension_semantics = [#tpu.dimension_semantics<parallel>, #tpu.dimension_semantics<parallel>], iteration_bounds = array<i64: 2, 1>, scalar_prefetch = 0 : i64, scratch_operands = 1 : i64, tpu.core_type = #tpu.core_type<tc>, window_params = [{transform_indices = @transform_0, window_bounds = array<i64: 1, 107, 8>}, {pipeline_mode = #tpu.pipeline_mode<synchronous>, transform_indices = @transform_1, window_bounds = array<i64: 107, 1>}, {transform_indices = @transform_2, window_bounds = array<i64: 9, 8, 8>}, {transform_indices = @transform_3, window_bounds = array<i64: 1, 107, 8>}, {transform_indices = @transform_4, window_bounds = array<i64: 1, 107, 8>}]} {
    %c0 = arith.constant 0 : index
    %c0_0 = arith.constant 0 : index
    %c0_1 = arith.constant 0 : index
    %0 = vector.load %arg2[%c0, %c0_0, %c0_1] : memref<1x107x8xbf16, #tpu.memory_space<vmem>>, vector<1x107x8xbf16>
    %1 = vector.shape_cast %0 : vector<1x107x8xbf16> to vector<107x8xbf16>
    %2 = arith.extf %1 : vector<107x8xbf16> to vector<107x8xf32>
    %c0_2 = arith.constant 0 : index
    %c0_3 = arith.constant 0 : index
    %3 = vector.load %arg7[%c0_2, %c0_3] : memref<107x8xf32, #tpu.memory_space<vmem>>, vector<107x8xf32>
    tpu.vector_store %arg7[%c0_2, %c0_3], %2 {strides = array<i32>} : memref<107x8xf32, #tpu.memory_space<vmem>>, vector<107x8xf32>,
    %c5 = arith.constant 5 : index
    %c0_4 = arith.constant 0 : index
    %4 = vector.load %arg7[%c5, %c0_4] : memref<107x8xf32, #tpu.memory_space<vmem>>, vector<80x8xf32>
    %5 = arith.truncf %4 : vector<80x8xf32> to vector<80x8xbf16>
    %c0_5 = arith.constant 0 : index
    %c0_6 = arith.constant 0 : index
    %c0_7 = arith.constant 0 : index
    %6 = vector.load %arg4[%c0_5, %c0_6, %c0_7] : memref<9x8x8xbf16, #tpu.memory_space<vmem>>, vector<1x8x8xbf16>
    %7 = vector.shape_cast %6 : vector<1x8x8xbf16> to vector<8x8xbf16>
    %cst = arith.constant dense<0.000000e+00> : vector<80x8xf32>
    %8 = tpu.matmul %5, %7, %cst {dimension_numbers = #tpu.dot_dimension_numbers<[1], [0], [0], [1], [0, 0, 1, 1], [], []>} : vector<80x8xbf16>, vector<8x8xbf16>, vector<80x8xf32> -> vector<80x8xf32>
    %c6 = arith.constant 6 : index
    %c0_8 = arith.constant 0 : index
    %9 = vector.load %arg7[%c6, %c0_8] : memref<107x8xf32, #tpu.memory_space<vmem>>, vector<80x8xf32>
    %10 = arith.truncf %9 : vector<80x8xf32> to vector<80x8xbf16>
    %c1 = arith.constant 1 : index
    %c0_9 = arith.constant 0 : index
    %c0_10 = arith.constant 0 : index
    %11 = vector.load %arg4[%c1, %c0_9, %c0_10] : memref<9x8x8xbf16, #tpu.memory_space<vmem>>, vector<1x8x8xbf16>
    %12 = vector.shape_cast %11 : vector<1x8x8xbf16> to vector<8x8xbf16>
    %cst_11 = arith.constant dense<0.000000e+00> : vector<80x8xf32>
    %13 = tpu.matmul %10, %12, %cst_11 {dimension_numbers = #tpu.dot_dimension_numbers<[1], [0], [0], [1], [0, 0, 1, 1], [], []>} : vector<80x8xbf16>, vector<8x8xbf16>, vector<80x8xf32> -> vector<80x8xf32>
    %14 = arith.addf %8, %13 : vector<80x8xf32>
    %c7 = arith.constant 7 : index
    %c0_12 = arith.constant 0 : index
    %15 = vector.load %arg7[%c7, %c0_12] : memref<107x8xf32, #tpu.memory_space<vmem>>, vector<80x8xf32>
    %16 = arith.truncf %15 : vector<80x8xf32> to vector<80x8xbf16>
    %c2 = arith.constant 2 : index
    %c0_13 = arith.constant 0 : index
    %c0_14 = arith.constant 0 : index
    %17 = vector.load %arg4[%c2, %c0_13, %c0_14] : memref<9x8x8xbf16, #tpu.memory_space<vmem>>, vector<1x8x8xbf16>
    %18 = vector.shape_cast %17 : vector<1x8x8xbf16> to vector<8x8xbf16>
    %cst_15 = arith.constant dense<0.000000e+00> : vector<80x8xf32>
    %19 = tpu.matmul %16, %18, %cst_15 {dimension_numbers = #tpu.dot_dimension_numbers<[1], [0], [0], [1], [0, 0, 1, 1], [], []>} : vector<80x8xbf16>, vector<8x8xbf16>, vector<80x8xf32> -> vector<80x8xf32>
    %20 = arith.addf %14, %19 : vector<80x8xf32>
    %c15 = arith.constant 15 : index
    %c0_16 = arith.constant 0 : index
    %21 = vector.load %arg7[%c15, %c0_16] : memref<107x8xf32, #tpu.memory_space<vmem>>, vector<80x8xf32>
    %22 = arith.truncf %21 : vector<80x8xf32> to vector<80x8xbf16>
    %c3 = arith.constant 3 : index
    %c0_17 = arith.constant 0 : index
    %c0_18 = arith.constant 0 : index
    %23 = vector.load %arg4[%c3, %c0_17, %c0_18] : memref<9x8x8xbf16, #tpu.memory_space<vmem>>, vector<1x8x8xbf16>
    %24 = vector.shape_cast %23 : vector<1x8x8xbf16> to vector<8x8xbf16>
    %cst_19 = arith.constant dense<0.000000e+00> : vector<80x8xf32>
    %25 = tpu.matmul %22, %24, %cst_19 {dimension_numbers = #tpu.dot_dimension_numbers<[1], [0], [0], [1], [0, 0, 1, 1], [], []>} : vector<80x8xbf16>, vector<8x8xbf16>, vector<80x8xf32> -> vector<80x8xf32>
    %26 = arith.addf %20, %25 : vector<80x8xf32>
    %c16 = arith.constant 16 : index
    %c0_20 = arith.constant 0 : index
    %27 = vector.load %arg7[%c16, %c0_20] : memref<107x8xf32, #tpu.memory_space<vmem>>, vector<80x8xf32>
    %28 = arith.truncf %27 : vector<80x8xf32> to vector<80x8xbf16>
    %c4 = arith.constant 4 : index
    %c0_21 = arith.constant 0 : index
    %c0_22 = arith.constant 0 : index
    %29 = vector.load %arg4[%c4, %c0_21, %c0_22] : memref<9x8x8xbf16, #tpu.memory_space<vmem>>, vector<1x8x8xbf16>
    %30 = vector.shape_cast %29 : vector<1x8x8xbf16> to vector<8x8xbf16>
    %cst_23 = arith.constant dense<0.000000e+00> : vector<80x8xf32>
    %31 = tpu.matmul %28, %30, %cst_23 {dimension_numbers = #tpu.dot_dimension_numbers<[1], [0], [0], [1], [0, 0, 1, 1], [], []>} : vector<80x8xbf16>, vector<8x8xbf16>, vector<80x8xf32> -> vector<80x8xf32>
    %32 = arith.addf %26, %31 : vector<80x8xf32>
    %c17 = arith.constant 17 : index
    %c0_24 = arith.constant 0 : index
    %33 = vector.load %arg7[%c17, %c0_24] : memref<107x8xf32, #tpu.memory_space<vmem>>, vector<80x8xf32>
    %34 = arith.truncf %33 : vector<80x8xf32> to vector<80x8xbf16>
    %c5_25 = arith.constant 5 : index
    %c0_26 = arith.constant 0 : index
    %c0_27 = arith.constant 0 : index
    %35 = vector.load %arg4[%c5_25, %c0_26, %c0_27] : memref<9x8x8xbf16, #tpu.memory_space<vmem>>, vector<1x8x8xbf16>
    %36 = vector.shape_cast %35 : vector<1x8x8xbf16> to vector<8x8xbf16>
    %cst_28 = arith.constant dense<0.000000e+00> : vector<80x8xf32>
    %37 = tpu.matmul %34, %36, %cst_28 {dimension_numbers = #tpu.dot_dimension_numbers<[1], [0], [0], [1], [0, 0, 1, 1], [], []>} : vector<80x8xbf16>, vector<8x8xbf16>, vector<80x8xf32> -> vector<80x8xf32>
    %38 = arith.addf %32, %37 : vector<80x8xf32>
    %c25 = arith.constant 25 : index
    %c0_29 = arith.constant 0 : index
    %39 = vector.load %arg7[%c25, %c0_29] : memref<107x8xf32, #tpu.memory_space<vmem>>, vector<80x8xf32>
    %40 = arith.truncf %39 : vector<80x8xf32> to vector<80x8xbf16>
    %c6_30 = arith.constant 6 : index
    %c0_31 = arith.constant 0 : index
    %c0_32 = arith.constant 0 : index
    %41 = vector.load %arg4[%c6_30, %c0_31, %c0_32] : memref<9x8x8xbf16, #tpu.memory_space<vmem>>, vector<1x8x8xbf16>
    %42 = vector.shape_cast %41 : vector<1x8x8xbf16> to vector<8x8xbf16>
    %cst_33 = arith.constant dense<0.000000e+00> : vector<80x8xf32>
    %43 = tpu.matmul %40, %42, %cst_33 {dimension_numbers = #tpu.dot_dimension_numbers<[1], [0], [0], [1], [0, 0, 1, 1], [], []>} : vector<80x8xbf16>, vector<8x8xbf16>, vector<80x8xf32> -> vector<80x8xf32>
    %44 = arith.addf %38, %43 : vector<80x8xf32>
    %c26 = arith.constant 26 : index
    %c0_34 = arith.constant 0 : index
    %45 = vector.load %arg7[%c26, %c0_34] : memref<107x8xf32, #tpu.memory_space<vmem>>, vector<80x8xf32>
    %46 = arith.truncf %45 : vector<80x8xf32> to vector<80x8xbf16>
    %c7_35 = arith.constant 7 : index
    %c0_36 = arith.constant 0 : index
    %c0_37 = arith.constant 0 : index
    %47 = vector.load %arg4[%c7_35, %c0_36, %c0_37] : memref<9x8x8xbf16, #tpu.memory_space<vmem>>, vector<1x8x8xbf16>
    %48 = vector.shape_cast %47 : vector<1x8x8xbf16> to vector<8x8xbf16>
    %cst_38 = arith.constant dense<0.000000e+00> : vector<80x8xf32>
    %49 = tpu.matmul %46, %48, %cst_38 {dimension_numbers = #tpu.dot_dimension_numbers<[1], [0], [0], [1], [0, 0, 1, 1], [], []>} : vector<80x8xbf16>, vector<8x8xbf16>, vector<80x8xf32> -> vector<80x8xf32>
    %50 = arith.addf %44, %49 : vector<80x8xf32>
    %c27 = arith.constant 27 : index
    %c0_39 = arith.constant 0 : index
    %51 = vector.load %arg7[%c27, %c0_39] : memref<107x8xf32, #tpu.memory_space<vmem>>, vector<80x8xf32>
    %52 = arith.truncf %51 : vector<80x8xf32> to vector<80x8xbf16>
    %c8 = arith.constant 8 : index
    %c0_40 = arith.constant 0 : index
    %c0_41 = arith.constant 0 : index
    %53 = vector.load %arg4[%c8, %c0_40, %c0_41] : memref<9x8x8xbf16, #tpu.memory_space<vmem>>, vector<1x8x8xbf16>
    %54 = vector.shape_cast %53 : vector<1x8x8xbf16> to vector<8x8xbf16>
    %cst_42 = arith.constant dense<0.000000e+00> : vector<80x8xf32>
    %55 = tpu.matmul %52, %54, %cst_42 {dimension_numbers = #tpu.dot_dimension_numbers<[1], [0], [0], [1], [0, 0, 1, 1], [], []>} : vector<80x8xbf16>, vector<8x8xbf16>, vector<80x8xf32> -> vector<80x8xf32>
    %56 = arith.addf %50, %55 : vector<80x8xf32>
    %c0_43 = arith.constant 0 : index
    %c16_44 = arith.constant 16 : index
    %c0_45 = arith.constant 0 : index
    %57 = vector.load %arg5[%c0_43, %c16_44, %c0_45] : memref<1x107x8xbf16, #tpu.memory_space<vmem>>, vector<1x80x8xbf16>
    %58 = vector.shape_cast %57 : vector<1x80x8xbf16> to vector<80x8xbf16>
    %59 = arith.extf %58 : vector<80x8xbf16> to vector<80x8xf32>
    %60 = arith.addf %56, %59 : vector<80x8xf32>
    %c16_46 = arith.constant 16 : index
    %c0_47 = arith.constant 0 : index
    %61 = vector.load %arg3[%c16_46, %c0_47] : memref<107x1xf32, #tpu.memory_space<vmem>>, vector<80x1xf32>
    %cst_48 = arith.constant 5.000000e-01 : f32
    %62 = vector.broadcast %cst_48 : f32 to vector<80x1xf32>
    %63 = arith.cmpf ogt, %61, %62 : vector<80x1xf32>
    %cst_49 = arith.constant 0.000000e+00 : f32
    %64 = vector.shape_cast %63 : vector<80x1xi1> to vector<80x1xi1>
    %65 = vector.broadcast %64 : vector<80x1xi1> to vector<80x8xi1>
    %66 = vector.broadcast %cst_49 : f32 to vector<80x8xf32>
    %67 = arith.select %65, %60, %66 : vector<80x8xi1>, vector<80x8xf32>
    %cst_50 = arith.constant 0.000000e+00 : bf16
    %68 = vector.broadcast %cst_50 : bf16 to vector<107x8xbf16>
    %c0_51 = arith.constant 0 : index
    %c0_52 = arith.constant 0 : index
    %c0_53 = arith.constant 0 : index
    %69 = vector.load %arg6[%c0_51, %c0_52, %c0_53] : memref<1x107x8xbf16, #tpu.memory_space<vmem>>, vector<1x107x8xbf16>
    %70 = vector.shape_cast %69 : vector<1x107x8xbf16> to vector<107x8xbf16>
    %71 = vector.shape_cast %68 : vector<107x8xbf16> to vector<1x107x8xbf16>
    tpu.vector_store %arg6[%c0_51, %c0_52, %c0_53], %71 {strides = array<i32>} : memref<1x107x8xbf16, #tpu.memory_space<vmem>>, vector<1x107x8xbf16>,
    %72 = arith.truncf %67 : vector<80x8xf32> to vector<80x8xbf16>
    %c0_54 = arith.constant 0 : index
    %c16_55 = arith.constant 16 : index
    %c0_56 = arith.constant 0 : index
    %73 = vector.load %arg6[%c0_54, %c16_55, %c0_56] : memref<1x107x8xbf16, #tpu.memory_space<vmem>>, vector<1x80x8xbf16>
    %74 = vector.shape_cast %73 : vector<1x80x8xbf16> to vector<80x8xbf16>
    %75 = vector.shape_cast %72 : vector<80x8xbf16> to vector<1x80x8xbf16>
    tpu.vector_store %arg6[%c0_54, %c16_55, %c0_56], %75 {strides = array<i32>} : memref<1x107x8xbf16, #tpu.memory_space<vmem>>, vector<1x80x8xbf16>,
    return
  }
  func.func @transform_0(%arg0: i32, %arg1: i32) -> (i32, i32, i32) {
    %c0_i32 = arith.constant 0 : i32
    %c0_i32_0 = arith.constant 0 : i32
    %c0_i32_1 = arith.constant 0 : i32
    return %arg0, %c0_i32, %c0_i32_0 : i32, i32, i32
  }
  func.func @transform_1(%arg0: i32, %arg1: i32) -> (i32, i32) {
    %c0_i32 = arith.constant 0 : i32
    %c0_i32_0 = arith.constant 0 : i32
    %c0_i32_1 = arith.constant 0 : i32
    return %c0_i32, %c0_i32_0 : i32, i32
  }
  func.func @transform_2(%arg0: i32, %arg1: i32) -> (i32, i32, i32) {
    %c0_i32 = arith.constant 0 : i32
    %c0_i32_0 = arith.constant 0 : i32
    %c0_i32_1 = arith.constant 0 : i32
    return %c0_i32, %c0_i32_0, %arg1 : i32, i32, i32
  }
  func.func @transform_3(%arg0: i32, %arg1: i32) -> (i32, i32, i32) {
    %c0_i32 = arith.constant 0 : i32
    %c0_i32_0 = arith.constant 0 : i32
    return %arg0, %c0_i32, %arg1 : i32, i32, i32
  }
  func.func @transform_4(%arg0: i32, %arg1: i32) -> (i32, i32, i32) {
    %c0_i32 = arith.constant 0 : i32
    %c0_i32_0 = arith.constant 0 : i32
    return %arg0, %c0_i32, %arg1 : i32, i32, i32
  }
}

module attributes {stable_mosaic.version = 11 : i64} {
  func.func @_dconv3x3_kernel(%arg0: i32, %arg1: i32, %arg2: memref<1x107x8xbf16, #tpu.memory_space<vmem>>, %arg3: memref<107x1xf32, #tpu.memory_space<vmem>>, %arg4: memref<1x8xf32, #tpu.memory_space<vmem>>, %arg5: memref<1x8xf32, #tpu.memory_space<vmem>>, %arg6: memref<9x8x8xbf16, #tpu.memory_space<vmem>>, %arg7: memref<1x8xf32, #tpu.memory_space<vmem>>, %arg8: memref<1x8xf32, #tpu.memory_space<vmem>>, %arg9: memref<1x107x8xbf16, #tpu.memory_space<vmem>>, %arg10: memref<107x8xf32, #tpu.memory_space<vmem>>) attributes {dimension_semantics = [#tpu.dimension_semantics<parallel>, #tpu.dimension_semantics<parallel>], iteration_bounds = array<i64: 2, 1>, scalar_prefetch = 0 : i64, scratch_operands = 1 : i64, tpu.core_type = #tpu.core_type<tc>, window_params = [{transform_indices = @transform_0, window_bounds = array<i64: 1, 107, 8>}, {pipeline_mode = #tpu.pipeline_mode<synchronous>, transform_indices = @transform_1, window_bounds = array<i64: 107, 1>}, {pipeline_mode = #tpu.pipeline_mode<synchronous>, transform_indices = @transform_2, window_bounds = array<i64: 1, 8>}, {pipeline_mode = #tpu.pipeline_mode<synchronous>, transform_indices = @transform_3, window_bounds = array<i64: 1, 8>}, {transform_indices = @transform_4, window_bounds = array<i64: 9, 8, 8>}, {transform_indices = @transform_5, window_bounds = array<i64: 1, 8>}, {transform_indices = @transform_6, window_bounds = array<i64: 1, 8>}, {transform_indices = @transform_7, window_bounds = array<i64: 1, 107, 8>}]} {
    %c0 = arith.constant 0 : index
    %c0_0 = arith.constant 0 : index
    %c0_1 = arith.constant 0 : index
    %0 = vector.load %arg2[%c0, %c0_0, %c0_1] : memref<1x107x8xbf16, #tpu.memory_space<vmem>>, vector<1x107x8xbf16>
    %1 = vector.shape_cast %0 : vector<1x107x8xbf16> to vector<107x8xbf16>
    %2 = arith.extf %1 : vector<107x8xbf16> to vector<107x8xf32>
    %c0_2 = arith.constant 0 : index
    %c0_3 = arith.constant 0 : index
    %3 = vector.load %arg4[%c0_2, %c0_3] : memref<1x8xf32, #tpu.memory_space<vmem>>, vector<1x8xf32>
    %4 = vector.broadcast %3 : vector<1x8xf32> to vector<107x8xf32>
    %5 = arith.mulf %2, %4 : vector<107x8xf32>
    %c0_4 = arith.constant 0 : index
    %c0_5 = arith.constant 0 : index
    %6 = vector.load %arg5[%c0_4, %c0_5] : memref<1x8xf32, #tpu.memory_space<vmem>>, vector<1x8xf32>
    %7 = vector.broadcast %6 : vector<1x8xf32> to vector<107x8xf32>
    %8 = arith.addf %5, %7 : vector<107x8xf32>
    %cst = arith.constant 0.000000e+00 : f32
    %9 = vector.broadcast %cst : f32 to vector<107x8xf32>
    %10 = arith.maximumf %8, %9 : vector<107x8xf32>
    %c0_6 = arith.constant 0 : index
    %c0_7 = arith.constant 0 : index
    %11 = vector.load %arg3[%c0_6, %c0_7] : memref<107x1xf32, #tpu.memory_space<vmem>>, vector<107x1xf32>
    %cst_8 = arith.constant 5.000000e-01 : f32
    %12 = vector.broadcast %cst_8 : f32 to vector<107x1xf32>
    %13 = arith.cmpf ogt, %11, %12 : vector<107x1xf32>
    %cst_9 = arith.constant 0.000000e+00 : f32
    %14 = vector.shape_cast %13 : vector<107x1xi1> to vector<107x1xi1>
    %15 = vector.broadcast %14 : vector<107x1xi1> to vector<107x8xi1>
    %16 = vector.broadcast %cst_9 : f32 to vector<107x8xf32>
    %17 = arith.select %15, %10, %16 : vector<107x8xi1>, vector<107x8xf32>
    %c0_10 = arith.constant 0 : index
    %c0_11 = arith.constant 0 : index
    %18 = vector.load %arg10[%c0_10, %c0_11] : memref<107x8xf32, #tpu.memory_space<vmem>>, vector<107x8xf32>
    tpu.vector_store %arg10[%c0_10, %c0_11], %17 {strides = array<i32>} : memref<107x8xf32, #tpu.memory_space<vmem>>, vector<107x8xf32>,
    %c5 = arith.constant 5 : index
    %c0_12 = arith.constant 0 : index
    %19 = vector.load %arg10[%c5, %c0_12] : memref<107x8xf32, #tpu.memory_space<vmem>>, vector<80x8xf32>
    %20 = arith.truncf %19 : vector<80x8xf32> to vector<80x8xbf16>
    %c0_13 = arith.constant 0 : index
    %c0_14 = arith.constant 0 : index
    %c0_15 = arith.constant 0 : index
    %21 = vector.load %arg6[%c0_13, %c0_14, %c0_15] : memref<9x8x8xbf16, #tpu.memory_space<vmem>>, vector<1x8x8xbf16>
    %22 = vector.shape_cast %21 : vector<1x8x8xbf16> to vector<8x8xbf16>
    %cst_16 = arith.constant dense<0.000000e+00> : vector<80x8xf32>
    %23 = tpu.matmul %20, %22, %cst_16 {dimension_numbers = #tpu.dot_dimension_numbers<[1], [0], [0], [1], [0, 0, 1, 1], [], []>} : vector<80x8xbf16>, vector<8x8xbf16>, vector<80x8xf32> -> vector<80x8xf32>
    %c6 = arith.constant 6 : index
    %c0_17 = arith.constant 0 : index
    %24 = vector.load %arg10[%c6, %c0_17] : memref<107x8xf32, #tpu.memory_space<vmem>>, vector<80x8xf32>
    %25 = arith.truncf %24 : vector<80x8xf32> to vector<80x8xbf16>
    %c1 = arith.constant 1 : index
    %c0_18 = arith.constant 0 : index
    %c0_19 = arith.constant 0 : index
    %26 = vector.load %arg6[%c1, %c0_18, %c0_19] : memref<9x8x8xbf16, #tpu.memory_space<vmem>>, vector<1x8x8xbf16>
    %27 = vector.shape_cast %26 : vector<1x8x8xbf16> to vector<8x8xbf16>
    %cst_20 = arith.constant dense<0.000000e+00> : vector<80x8xf32>
    %28 = tpu.matmul %25, %27, %cst_20 {dimension_numbers = #tpu.dot_dimension_numbers<[1], [0], [0], [1], [0, 0, 1, 1], [], []>} : vector<80x8xbf16>, vector<8x8xbf16>, vector<80x8xf32> -> vector<80x8xf32>
    %29 = arith.addf %23, %28 : vector<80x8xf32>
    %c7 = arith.constant 7 : index
    %c0_21 = arith.constant 0 : index
    %30 = vector.load %arg10[%c7, %c0_21] : memref<107x8xf32, #tpu.memory_space<vmem>>, vector<80x8xf32>
    %31 = arith.truncf %30 : vector<80x8xf32> to vector<80x8xbf16>
    %c2 = arith.constant 2 : index
    %c0_22 = arith.constant 0 : index
    %c0_23 = arith.constant 0 : index
    %32 = vector.load %arg6[%c2, %c0_22, %c0_23] : memref<9x8x8xbf16, #tpu.memory_space<vmem>>, vector<1x8x8xbf16>
    %33 = vector.shape_cast %32 : vector<1x8x8xbf16> to vector<8x8xbf16>
    %cst_24 = arith.constant dense<0.000000e+00> : vector<80x8xf32>
    %34 = tpu.matmul %31, %33, %cst_24 {dimension_numbers = #tpu.dot_dimension_numbers<[1], [0], [0], [1], [0, 0, 1, 1], [], []>} : vector<80x8xbf16>, vector<8x8xbf16>, vector<80x8xf32> -> vector<80x8xf32>
    %35 = arith.addf %29, %34 : vector<80x8xf32>
    %c15 = arith.constant 15 : index
    %c0_25 = arith.constant 0 : index
    %36 = vector.load %arg10[%c15, %c0_25] : memref<107x8xf32, #tpu.memory_space<vmem>>, vector<80x8xf32>
    %37 = arith.truncf %36 : vector<80x8xf32> to vector<80x8xbf16>
    %c3 = arith.constant 3 : index
    %c0_26 = arith.constant 0 : index
    %c0_27 = arith.constant 0 : index
    %38 = vector.load %arg6[%c3, %c0_26, %c0_27] : memref<9x8x8xbf16, #tpu.memory_space<vmem>>, vector<1x8x8xbf16>
    %39 = vector.shape_cast %38 : vector<1x8x8xbf16> to vector<8x8xbf16>
    %cst_28 = arith.constant dense<0.000000e+00> : vector<80x8xf32>
    %40 = tpu.matmul %37, %39, %cst_28 {dimension_numbers = #tpu.dot_dimension_numbers<[1], [0], [0], [1], [0, 0, 1, 1], [], []>} : vector<80x8xbf16>, vector<8x8xbf16>, vector<80x8xf32> -> vector<80x8xf32>
    %41 = arith.addf %35, %40 : vector<80x8xf32>
    %c16 = arith.constant 16 : index
    %c0_29 = arith.constant 0 : index
    %42 = vector.load %arg10[%c16, %c0_29] : memref<107x8xf32, #tpu.memory_space<vmem>>, vector<80x8xf32>
    %43 = arith.truncf %42 : vector<80x8xf32> to vector<80x8xbf16>
    %c4 = arith.constant 4 : index
    %c0_30 = arith.constant 0 : index
    %c0_31 = arith.constant 0 : index
    %44 = vector.load %arg6[%c4, %c0_30, %c0_31] : memref<9x8x8xbf16, #tpu.memory_space<vmem>>, vector<1x8x8xbf16>
    %45 = vector.shape_cast %44 : vector<1x8x8xbf16> to vector<8x8xbf16>
    %cst_32 = arith.constant dense<0.000000e+00> : vector<80x8xf32>
    %46 = tpu.matmul %43, %45, %cst_32 {dimension_numbers = #tpu.dot_dimension_numbers<[1], [0], [0], [1], [0, 0, 1, 1], [], []>} : vector<80x8xbf16>, vector<8x8xbf16>, vector<80x8xf32> -> vector<80x8xf32>
    %47 = arith.addf %41, %46 : vector<80x8xf32>
    %c17 = arith.constant 17 : index
    %c0_33 = arith.constant 0 : index
    %48 = vector.load %arg10[%c17, %c0_33] : memref<107x8xf32, #tpu.memory_space<vmem>>, vector<80x8xf32>
    %49 = arith.truncf %48 : vector<80x8xf32> to vector<80x8xbf16>
    %c5_34 = arith.constant 5 : index
    %c0_35 = arith.constant 0 : index
    %c0_36 = arith.constant 0 : index
    %50 = vector.load %arg6[%c5_34, %c0_35, %c0_36] : memref<9x8x8xbf16, #tpu.memory_space<vmem>>, vector<1x8x8xbf16>
    %51 = vector.shape_cast %50 : vector<1x8x8xbf16> to vector<8x8xbf16>
    %cst_37 = arith.constant dense<0.000000e+00> : vector<80x8xf32>
    %52 = tpu.matmul %49, %51, %cst_37 {dimension_numbers = #tpu.dot_dimension_numbers<[1], [0], [0], [1], [0, 0, 1, 1], [], []>} : vector<80x8xbf16>, vector<8x8xbf16>, vector<80x8xf32> -> vector<80x8xf32>
    %53 = arith.addf %47, %52 : vector<80x8xf32>
    %c25 = arith.constant 25 : index
    %c0_38 = arith.constant 0 : index
    %54 = vector.load %arg10[%c25, %c0_38] : memref<107x8xf32, #tpu.memory_space<vmem>>, vector<80x8xf32>
    %55 = arith.truncf %54 : vector<80x8xf32> to vector<80x8xbf16>
    %c6_39 = arith.constant 6 : index
    %c0_40 = arith.constant 0 : index
    %c0_41 = arith.constant 0 : index
    %56 = vector.load %arg6[%c6_39, %c0_40, %c0_41] : memref<9x8x8xbf16, #tpu.memory_space<vmem>>, vector<1x8x8xbf16>
    %57 = vector.shape_cast %56 : vector<1x8x8xbf16> to vector<8x8xbf16>
    %cst_42 = arith.constant dense<0.000000e+00> : vector<80x8xf32>
    %58 = tpu.matmul %55, %57, %cst_42 {dimension_numbers = #tpu.dot_dimension_numbers<[1], [0], [0], [1], [0, 0, 1, 1], [], []>} : vector<80x8xbf16>, vector<8x8xbf16>, vector<80x8xf32> -> vector<80x8xf32>
    %59 = arith.addf %53, %58 : vector<80x8xf32>
    %c26 = arith.constant 26 : index
    %c0_43 = arith.constant 0 : index
    %60 = vector.load %arg10[%c26, %c0_43] : memref<107x8xf32, #tpu.memory_space<vmem>>, vector<80x8xf32>
    %61 = arith.truncf %60 : vector<80x8xf32> to vector<80x8xbf16>
    %c7_44 = arith.constant 7 : index
    %c0_45 = arith.constant 0 : index
    %c0_46 = arith.constant 0 : index
    %62 = vector.load %arg6[%c7_44, %c0_45, %c0_46] : memref<9x8x8xbf16, #tpu.memory_space<vmem>>, vector<1x8x8xbf16>
    %63 = vector.shape_cast %62 : vector<1x8x8xbf16> to vector<8x8xbf16>
    %cst_47 = arith.constant dense<0.000000e+00> : vector<80x8xf32>
    %64 = tpu.matmul %61, %63, %cst_47 {dimension_numbers = #tpu.dot_dimension_numbers<[1], [0], [0], [1], [0, 0, 1, 1], [], []>} : vector<80x8xbf16>, vector<8x8xbf16>, vector<80x8xf32> -> vector<80x8xf32>
    %65 = arith.addf %59, %64 : vector<80x8xf32>
    %c27 = arith.constant 27 : index
    %c0_48 = arith.constant 0 : index
    %66 = vector.load %arg10[%c27, %c0_48] : memref<107x8xf32, #tpu.memory_space<vmem>>, vector<80x8xf32>
    %67 = arith.truncf %66 : vector<80x8xf32> to vector<80x8xbf16>
    %c8 = arith.constant 8 : index
    %c0_49 = arith.constant 0 : index
    %c0_50 = arith.constant 0 : index
    %68 = vector.load %arg6[%c8, %c0_49, %c0_50] : memref<9x8x8xbf16, #tpu.memory_space<vmem>>, vector<1x8x8xbf16>
    %69 = vector.shape_cast %68 : vector<1x8x8xbf16> to vector<8x8xbf16>
    %cst_51 = arith.constant dense<0.000000e+00> : vector<80x8xf32>
    %70 = tpu.matmul %67, %69, %cst_51 {dimension_numbers = #tpu.dot_dimension_numbers<[1], [0], [0], [1], [0, 0, 1, 1], [], []>} : vector<80x8xbf16>, vector<8x8xbf16>, vector<80x8xf32> -> vector<80x8xf32>
    %71 = arith.addf %65, %70 : vector<80x8xf32>
    %c0_52 = arith.constant 0 : index
    %c0_53 = arith.constant 0 : index
    %72 = vector.load %arg7[%c0_52, %c0_53] : memref<1x8xf32, #tpu.memory_space<vmem>>, vector<1x8xf32>
    %73 = vector.broadcast %72 : vector<1x8xf32> to vector<80x8xf32>
    %74 = arith.mulf %71, %73 : vector<80x8xf32>
    %c0_54 = arith.constant 0 : index
    %c0_55 = arith.constant 0 : index
    %75 = vector.load %arg8[%c0_54, %c0_55] : memref<1x8xf32, #tpu.memory_space<vmem>>, vector<1x8xf32>
    %76 = vector.broadcast %75 : vector<1x8xf32> to vector<80x8xf32>
    %77 = arith.addf %74, %76 : vector<80x8xf32>
    %cst_56 = arith.constant 0.000000e+00 : f32
    %78 = vector.broadcast %cst_56 : f32 to vector<80x8xf32>
    %79 = arith.maximumf %77, %78 : vector<80x8xf32>
    %c16_57 = arith.constant 16 : index
    %c0_58 = arith.constant 0 : index
    %80 = vector.load %arg3[%c16_57, %c0_58] : memref<107x1xf32, #tpu.memory_space<vmem>>, vector<80x1xf32>
    %cst_59 = arith.constant 5.000000e-01 : f32
    %81 = vector.broadcast %cst_59 : f32 to vector<80x1xf32>
    %82 = arith.cmpf ogt, %80, %81 : vector<80x1xf32>
    %cst_60 = arith.constant 0.000000e+00 : f32
    %83 = vector.shape_cast %82 : vector<80x1xi1> to vector<80x1xi1>
    %84 = vector.broadcast %83 : vector<80x1xi1> to vector<80x8xi1>
    %85 = vector.broadcast %cst_60 : f32 to vector<80x8xf32>
    %86 = arith.select %84, %79, %85 : vector<80x8xi1>, vector<80x8xf32>
    %cst_61 = arith.constant 0.000000e+00 : bf16
    %87 = vector.broadcast %cst_61 : bf16 to vector<107x8xbf16>
    %c0_62 = arith.constant 0 : index
    %c0_63 = arith.constant 0 : index
    %c0_64 = arith.constant 0 : index
    %88 = vector.load %arg9[%c0_62, %c0_63, %c0_64] : memref<1x107x8xbf16, #tpu.memory_space<vmem>>, vector<1x107x8xbf16>
    %89 = vector.shape_cast %88 : vector<1x107x8xbf16> to vector<107x8xbf16>
    %90 = vector.shape_cast %87 : vector<107x8xbf16> to vector<1x107x8xbf16>
    tpu.vector_store %arg9[%c0_62, %c0_63, %c0_64], %90 {strides = array<i32>} : memref<1x107x8xbf16, #tpu.memory_space<vmem>>, vector<1x107x8xbf16>,
    %91 = arith.truncf %86 : vector<80x8xf32> to vector<80x8xbf16>
    %c0_65 = arith.constant 0 : index
    %c16_66 = arith.constant 16 : index
    %c0_67 = arith.constant 0 : index
    %92 = vector.load %arg9[%c0_65, %c16_66, %c0_67] : memref<1x107x8xbf16, #tpu.memory_space<vmem>>, vector<1x80x8xbf16>
    %93 = vector.shape_cast %92 : vector<1x80x8xbf16> to vector<80x8xbf16>
    %94 = vector.shape_cast %91 : vector<80x8xbf16> to vector<1x80x8xbf16>
    tpu.vector_store %arg9[%c0_65, %c16_66, %c0_67], %94 {strides = array<i32>} : memref<1x107x8xbf16, #tpu.memory_space<vmem>>, vector<1x80x8xbf16>,
    return
  }
  func.func @transform_0(%arg0: i32, %arg1: i32) -> (i32, i32, i32) {
    %c0_i32 = arith.constant 0 : i32
    %c0_i32_0 = arith.constant 0 : i32
    %c0_i32_1 = arith.constant 0 : i32
    return %arg0, %c0_i32, %c0_i32_0 : i32, i32, i32
  }
  func.func @transform_1(%arg0: i32, %arg1: i32) -> (i32, i32) {
    %c0_i32 = arith.constant 0 : i32
    %c0_i32_0 = arith.constant 0 : i32
    %c0_i32_1 = arith.constant 0 : i32
    return %c0_i32, %c0_i32_0 : i32, i32
  }
  func.func @transform_2(%arg0: i32, %arg1: i32) -> (i32, i32) {
    %c0_i32 = arith.constant 0 : i32
    %c0_i32_0 = arith.constant 0 : i32
    %c0_i32_1 = arith.constant 0 : i32
    return %c0_i32, %c0_i32_0 : i32, i32
  }
  func.func @transform_3(%arg0: i32, %arg1: i32) -> (i32, i32) {
    %c0_i32 = arith.constant 0 : i32
    %c0_i32_0 = arith.constant 0 : i32
    %c0_i32_1 = arith.constant 0 : i32
    return %c0_i32, %c0_i32_0 : i32, i32
  }
  func.func @transform_4(%arg0: i32, %arg1: i32) -> (i32, i32, i32) {
    %c0_i32 = arith.constant 0 : i32
    %c0_i32_0 = arith.constant 0 : i32
    %c0_i32_1 = arith.constant 0 : i32
    return %c0_i32, %c0_i32_0, %arg1 : i32, i32, i32
  }
  func.func @transform_5(%arg0: i32, %arg1: i32) -> (i32, i32) {
    %c0_i32 = arith.constant 0 : i32
    %c0_i32_0 = arith.constant 0 : i32
    return %c0_i32, %arg1 : i32, i32
  }
  func.func @transform_6(%arg0: i32, %arg1: i32) -> (i32, i32) {
    %c0_i32 = arith.constant 0 : i32
    %c0_i32_0 = arith.constant 0 : i32
    return %c0_i32, %arg1 : i32, i32
  }
  func.func @transform_7(%arg0: i32, %arg1: i32) -> (i32, i32, i32) {
    %c0_i32 = arith.constant 0 : i32
    %c0_i32_0 = arith.constant 0 : i32
    return %arg0, %c0_i32, %arg1 : i32, i32, i32
  }
}

</mosaic_0001>

<bundles_post_ra>
// kernel: network_block_forward.5
= control target key start
LH: loop header
LB: loop body
LE: loop exit
PB: predicated region body
PF: predicated region fallthrough
CT: control target
= control target key end

     0   :  { %vm119_vm0 = vcmask 1041408   ;;  %vm94_vm1 = vcmask 293888   ;;  %vm346_vm2 = vcmask 60416   ;;  %s644_s1 = inlined_call_operand.vmem [shape: bf16[36,8], index: 1, kind: input, shape index: {}]   ;;  %s645_s0 = inlined_call_operand.vmem [shape: bf16[128,36], index: 0, kind: input, shape index: {}]   ;;  %s646_s2 = inlined_call_operand.vmem [shape: f32[1,8], index: 2, kind: input, shape index: {}]   ;;  %s647_s3 = inlined_call_operand.vmem [shape: f32[1,8], index: 3, kind: input, shape index: {}]   ;;  %s648_s4 = inlined_call_operand.vmem [shape: bf16[128,8], index: 4, kind: output, shape index: {}]  }
   0x1   :  { %v461_v0 = vld [vmem:[%s644_s1 + $0x10] ss:$0 sps:$4 sm:$0x33]   ;;  %v462_v1 = vld [vmem:[%s644_s1 + $0x8] sm:$0xff]   ;;  %v463_v3 = vld [vmem:[%s644_s1] sm:$0xff]  }
   0x2   :  { %459 = vmatprep.subr.msk.bf16.mxu0 %vm119_vm0, %v461_v0  ;;  %460 = vmatprep.subr.msk.bf16.mxu1 %vm119_vm0, %v461_v0  ;;  %v121_v2 = vsel %vm119_vm0, %v461_v0, 0  ;;  %v464_v4 = vld [vmem:[%s645_s0] sm:$0xff]   ;;  %v466_v6 = vld [vmem:[%s645_s0 + $0x8] sm:$0xff]   ;;  %v468_v8 = vld [vmem:[%s645_s0 + $0x10] sm:$0xff]  }
   0x3   :  { %432 = vmatpush3.bf16.msra.mxu0 %v121_v2  ;;  %456 = vmatpush3.bf16.msra.mxu1 %v121_v2  ;;  %v465_v5 = vld [vmem:[%s645_s0 + $0x20] sm:$0xff]   ;;  %v467_v7 = vld [vmem:[%s645_s0 + $0x28] sm:$0xff]   ;;  %v469_v9 = vld [vmem:[%s645_s0 + $0x30] sm:$0xff]  }
   0x4   :  { %433 = vmatprep.subr.bf16.mxu0 %v462_v1  ;;  %454 = vmatprep.subr.bf16.mxu1 %v462_v1  ;;  %v470_v10 = vld [vmem:[%s645_s0 + $0x18] sm:$0xff]   ;;  %v541_v12 = vld [vmem:[%s646_s2] ss:$0 sm:$0xff] }
   0x5   :  { %437 = vmatprep.mubr.msk.bf16.mxu0 %vm94_vm1, %v464_v4  ;;  %445 = vmatprep.mubr.msk.bf16.mxu1 %vm94_vm1, %v465_v5  ;;  %v471_v11 = vld [vmem:[%s645_s0 + $0x38] sm:$0xff]   ;;  %v546_v14 = vld [vmem:[%s647_s3] ss:$0 sm:$0xff] }
   0x7   :  { %434 = vmatpush3.bf16.msra.mxu0 %v462_v1  ;;  %457 = vmatpush3.bf16.msra.mxu1 %v462_v1 }
   0x8   :  { %435 = vmatprep.subr.bf16.mxu0 %v463_v3  ;;  %455 = vmatprep.subr.bf16.mxu1 %v463_v3 }
   0xb   :  { %436 = vmatpush3.bf16.msra.mxu0 %v463_v3  ;;  %458 = vmatpush3.bf16.msra.mxu1 %v463_v3 }
   0xe   :  { %438 = vmatmul.mubr.msk.bf16.vlgmr.msra.gmra.mxu0 %vm94_vm1, %v466_v6  ;;  %446 = vmatmul.mubr.msk.bf16.vlgmr.msra.gmra.mxu1 %vm94_vm1, %v467_v7 }
   0xf   :  { %441 = vmatprep.mubr.msk.bf16.mxu0 %vm94_vm1, %v468_v8  ;;  %449 = vmatprep.mubr.msk.bf16.mxu1 %vm94_vm1, %v469_v9 }
  0x16   :  { %442 = vmatmul.mubr.msk.bf16.gmra.mxu0 %vm94_vm1, %v470_v10  ;;  %450 = vmatmul.mubr.msk.bf16.gmra.mxu1 %vm94_vm1, %v471_v11 }
  0xce   :  { %v439_v13 = vpop.f32.mrf.mxu0  ;;  %v447_v15 = vpop.f32.mrf.mxu1 }
  0xcf   :  { %v229_v16 = vmul.f32 %v439_v13, %v541_v12  ;;  %v237_v17 = vmul.f32 %v447_v15, %v541_v12 }
  0xd0   :  { %v157_v18 = vpop.f32.mrf.mxu0  ;;  %v189_v19 = vpop.f32.mrf.mxu1 }
  0xd1   :  { %v252_v20 = vadd.f32 %v546_v14, %v229_v16  ;;  %v260_v21 = vadd.f32 %v546_v14, %v237_v17  ;;  %v227_v22 = vmul.f32 %v541_v12, %v157_v18  ;;  %v235_v23 = vmul.f32 %v541_v12, %v189_v19 }
  0xd2   :  { %v440_v24 = vpop.f32.mrf.mxu0  ;;  %v448_v25 = vpop.f32.mrf.mxu1 }
  0xd3   :  { %v268_v26 = vmax.f32 %v252_v20, 0.0  ;;  %v276_v27 = vmax.f32 %v260_v21, 0.0  ;;  %v250_v28 = vadd.f32 %v546_v14, %v227_v22  ;;  %v258_v29 = vadd.f32 %v546_v14, %v235_v23 }
  0xd4   :  { %v230_v30 = vmul.f32 %v440_v24, %v541_v12  ;;  %v238_v31 = vmul.f32 %v448_v25, %v541_v12  ;;  %v160_v32 = vpop.f32.mrf.mxu0  ;;  %v192_v33 = vpop.f32.mrf.mxu1 }
  0xd5   :  { %v406_v34 = vpack.c.bf16 %v268_v26, %v268_v26  ;;  %v414_v35 = vpack.c.bf16 %v276_v27, %v276_v27  ;;  %v266_v36 = vmax.f32 %v250_v28, 0.0  ;;  %v274_v37 = vmax.f32 %v258_v29, 0.0 }
  0xd6   :  { %v253_v38 = vadd.f32 %v546_v14, %v230_v30  ;;  %v261_v39 = vadd.f32 %v546_v14, %v238_v31  ;;  %v228_v40 = vmul.f32 %v541_v12, %v160_v32  ;;  %v236_v41 = vmul.f32 %v541_v12, %v192_v33  ;;  %v443_v42 = vpop.f32.mrf.mxu0  ;;  %v451_v43 = vpop.f32.mrf.mxu1 }
  0xd7   :  { %349 = vst.msk [vmem:[%s648_s4 + $0x8] sm:$0xf] %vm346_vm2, %v406_v34  ;;  %357 = vst.msk [vmem:[%s648_s4 + $0x28] sm:$0xf] %vm346_vm2, %v414_v35  ;;  %v404_v44 = vpack.c.bf16 %v266_v36, %v266_v36  ;;  %v412_v45 = vpack.c.bf16 %v274_v37, %v274_v37  ;;  %v233_v46 = vmul.f32 %v443_v42, %v541_v12 }
  0xd8   :  { %v241_v47 = vmul.f32 %v451_v43, %v541_v12  ;;  %v269_v48 = vmax.f32 %v253_v38, 0.0  ;;  %v277_v49 = vmax.f32 %v261_v39, 0.0  ;;  %v251_v50 = vadd.f32 %v546_v14, %v228_v40  ;;  %v173_v52 = vpop.f32.mrf.mxu0  ;;  %v205_v53 = vpop.f32.mrf.mxu1 }
  0xd9   :  { %v259_v51 = vadd.f32 %v546_v14, %v236_v41  ;;  %347 = vst.msk [vmem:[%s648_s4] sm:$0xf] %vm346_vm2, %v404_v44  ;;  %355 = vst.msk [vmem:[%s648_s4 + $0x20] sm:$0xf] %vm346_vm2, %v412_v45  ;;  %v256_v54 = vadd.f32 %v546_v14, %v233_v46  ;;  %v231_v56 = vmul.f32 %v541_v12, %v173_v52 }
  0xda   :  { %v264_v55 = vadd.f32 %v546_v14, %v241_v47  ;;  %v239_v57 = vmul.f32 %v541_v12, %v205_v53  ;;  %v407_v58 = vpack.c.bf16 %v269_v48, %v269_v48  ;;  %v415_v59 = vpack.c.bf16 %v277_v49, %v277_v49  ;;  %v444_v62 = vpop.f32.mrf.mxu0  ;;  %v452_v63 = vpop.f32.mrf.mxu1 }
  0xdb   :  { %v267_v60 = vmax.f32 %v251_v50, 0.0  ;;  %v275_v61 = vmax.f32 %v259_v51, 0.0  ;;  %v272_v0 = vmax.f32 %v256_v54, 0.0  ;;  %v254_v2 = vadd.f32 %v546_v14, %v231_v56 }
  0xdc   :  { %v280_v1 = vmax.f32 %v264_v55, 0.0  ;;  %v262_v3 = vadd.f32 %v546_v14, %v239_v57  ;;  %350 = vst.msk [vmem:[%s648_s4 + $0xc] sm:$0xf] %vm346_vm2, %v407_v58  ;;  %358 = vst.msk [vmem:[%s648_s4 + $0x2c] sm:$0xf] %vm346_vm2, %v415_v59  ;;  %v234_v6 = vmul.f32 %v444_v62, %v541_v12  ;;  %v242_v7 = vmul.f32 %v452_v63, %v541_v12  ;;  %v176_v8 = vpop.f32.mrf.mxu0  ;;  %v208_v9 = vpop.f32.mrf.mxu1 }
  0xdd   :  { %v405_v4 = vpack.c.bf16 %v267_v60, %v267_v60  ;;  %v413_v5 = vpack.c.bf16 %v275_v61, %v275_v61  ;;  %v410_v10 = vpack.c.bf16 %v272_v0, %v272_v0  ;;  %v270_v13 = vmax.f32 %v254_v2, 0.0 }
  0xde   :  { %v418_v11 = vpack.c.bf16 %v280_v1, %v280_v1  ;;  %v278_v15 = vmax.f32 %v262_v3, 0.0  ;;  %v257_v16 = vadd.f32 %v546_v14, %v234_v6  ;;  %v265_v17 = vadd.f32 %v546_v14, %v242_v7 }
  0xdf   :  { %348 = vst.msk [vmem:[%s648_s4 + $0x4] sm:$0xf] %vm346_vm2, %v405_v4  ;;  %356 = vst.msk [vmem:[%s648_s4 + $0x24] sm:$0xf] %vm346_vm2, %v413_v5  ;;  %v232_v18 = vmul.f32 %v541_v12, %v176_v8  ;;  %v240_v19 = vmul.f32 %v541_v12, %v208_v9  ;;  %v408_v20 = vpack.c.bf16 %v270_v13, %v270_v13 }
  0xe0   :  { %353 = vst.msk [vmem:[%s648_s4 + $0x18] sm:$0xf] %vm346_vm2, %v410_v10  ;;  %361 = vst.msk [vmem:[%s648_s4 + $0x38] sm:$0xf] %vm346_vm2, %v418_v11  ;;  %v416_v21 = vpack.c.bf16 %v278_v15, %v278_v15  ;;  %v273_v22 = vmax.f32 %v257_v16, 0.0  ;;  %v281_v23 = vmax.f32 %v265_v17, 0.0 }
  0xe1   :  { %v255_v24 = vadd.f32 %v546_v14, %v232_v18  ;;  %v263_v25 = vadd.f32 %v546_v14, %v240_v19  ;;  %351 = vst.msk [vmem:[%s648_s4 + $0x10] sm:$0xf] %vm346_vm2, %v408_v20 }
  0xe2   :  { %359 = vst.msk [vmem:[%s648_s4 + $0x30] sm:$0xf] %vm346_vm2, %v416_v21  ;;  %v411_v12 = vpack.c.bf16 %v273_v22, %v273_v22  ;;  %v419_v26 = vpack.c.bf16 %v281_v23, %v281_v23 }
  0xe3   :  { %v271_v27 = vmax.f32 %v255_v24, 0.0  ;;  %v279_v28 = vmax.f32 %v263_v25, 0.0 }
  0xe4   :  { %354 = vst.msk [vmem:[%s648_s4 + $0x1c] sm:$0xf] %vm346_vm2, %v411_v12  ;;  %362 = vst.msk [vmem:[%s648_s4 + $0x3c] sm:$0xf] %vm346_vm2, %v419_v26 }
  0xe5   :  { %v409_v14 = vpack.c.bf16 %v271_v27, %v271_v27  ;;  %v417_v29 = vpack.c.bf16 %v279_v28, %v279_v28 }
  0xe7   :  { %352 = vst.msk [vmem:[%s648_s4 + $0x14] sm:$0xf] %vm346_vm2, %v409_v14  ;;  %360 = vst.msk [vmem:[%s648_s4 + $0x34] sm:$0xf] %vm346_vm2, %v417_v29 }

// kernel: network_block_forward.6
= control target key start
LH: loop header
LB: loop body
LE: loop exit
PB: predicated region body
PF: predicated region fallthrough
CT: control target
= control target key end

     0   :  { %vm146_vm0 = vcmask 1041408   ;;  %vm121_vm1 = vcmask 31744   ;;  %vm311_vm2 = vcmask 60416   ;;  %s610_s3 = inlined_call_operand.vmem [shape: bf16[4,8], index: 3, kind: input, shape index: {}]   ;;  %s611_s0 = inlined_call_operand.vmem [shape: bf16[128,4], index: 0, kind: input, shape index: {}]   ;;  %s612_s1 = inlined_call_operand.vmem [shape: f32[1,4], index: 1, kind: input, shape index: {}]   ;;  %s613_s2 = inlined_call_operand.vmem [shape: f32[1,4], index: 2, kind: input, shape index: {}]   ;;  %s614_s4 = inlined_call_operand.vmem [shape: bf16[128,8], index: 4, kind: output, shape index: {}]  }
   0x1   :  { %v120_v0 = vld [vmem:[%s610_s3] sm:$0x3]  ;;  %v406_v7 = vld [vmem:[%s611_s0 + $0x8] sm:$0xff]   ;;  %v407_v30 = vld [vmem:[%s611_s0 + $0x10] sm:$0xff]  }
   0x2   :  { %v375_v1 = vld [vmem:[%s611_s0] sm:$0xff]   ;;  %442 = vmatprep.subr.msk.bf16.mxu0 %vm146_vm0, %v120_v0  ;;  %443 = vmatprep.subr.msk.bf16.mxu1 %vm146_vm0, %v120_v0  ;;  %v148_v3 = vsel %vm146_vm0, %v120_v0, 0  ;;  %v380_v11 = vunpack.c.l.bf16 %v406_v7  ;;  %v381_v12 = vunpack.c.h.bf16 %v406_v7  ;;  %v410_v13 = vld [vmem:[%s611_s0 + $0x28] sm:$0xff]   ;;  %v411_v35 = vld [vmem:[%s611_s0 + $0x30] sm:$0xff]   ;;  %v384_v44 = vunpack.c.l.bf16 %v407_v30 }
   0x3   :  { %v478_v2 = vld [vmem:[%s612_s1] ss:$0 sm:$0xff]  ;;  %v376_v4 = vunpack.c.l.bf16 %v375_v1  ;;  %v377_v5 = vunpack.c.h.bf16 %v375_v1  ;;  %423 = vmatpush3.bf16.msra.mxu0 %v148_v3  ;;  %441 = vmatpush3.bf16.msra.mxu1 %v148_v3  ;;  %v396_v16 = vunpack.c.l.bf16 %v410_v13  ;;  %v397_v17 = vunpack.c.h.bf16 %v410_v13  ;;  %v408_v40 = vld [vmem:[%s611_s0 + $0x18] sm:$0xff]  }
   0x4   :  { %v409_v6 = vld [vmem:[%s611_s0 + $0x20] sm:$0xff]   ;;  %v59_v20 = vmul.f32 %v380_v11, %v478_v2  ;;  %v60_v21 = vmul.f32 %v381_v12, %v478_v2  ;;  %v412_v45 = vld [vmem:[%s611_s0 + $0x38] sm:$0xff]   ;;  %v385_v48 = vunpack.c.h.bf16 %v407_v30  ;;  %v400_v49 = vunpack.c.l.bf16 %v411_v35 }
   0x5   :  { %v489_v8 = vld [vmem:[%s613_s2] ss:$0 sm:$0xff]  ;;  %v392_v9 = vunpack.c.l.bf16 %v409_v6  ;;  %v393_v10 = vunpack.c.h.bf16 %v409_v6  ;;  %v57_v14 = vmul.f32 %v376_v4, %v478_v2  ;;  %v58_v15 = vmul.f32 %v377_v5, %v478_v2 }
   0x6   :  { %v67_v24 = vmul.f32 %v396_v16, %v478_v2  ;;  %v68_v25 = vmul.f32 %v397_v17, %v478_v2  ;;  %v82_v28 = vadd.f32 %v489_v8, %v59_v20  ;;  %v83_v29 = vadd.f32 %v489_v8, %v60_v21 }
   0x7   :  { %v65_v18 = vmul.f32 %v392_v9, %v478_v2  ;;  %v66_v19 = vmul.f32 %v393_v10, %v478_v2  ;;  %v80_v22 = vadd.f32 %v489_v8, %v57_v14  ;;  %v81_v23 = vadd.f32 %v489_v8, %v58_v15 }
   0x8   :  { %v90_v33 = vadd.f32 %v489_v8, %v67_v24  ;;  %v91_v34 = vadd.f32 %v489_v8, %v68_v25  ;;  %v98_v38 = vmax.f32 %v82_v28, 0.0  ;;  %v99_v39 = vmax.f32 %v83_v29, 0.0 }
   0x9   :  { %v88_v26 = vadd.f32 %v489_v8, %v65_v18  ;;  %v89_v27 = vadd.f32 %v489_v8, %v66_v19  ;;  %v96_v31 = vmax.f32 %v80_v22, 0.0  ;;  %v97_v32 = vmax.f32 %v81_v23, 0.0 }
   0xa   :  { %v106_v42 = vmax.f32 %v90_v33, 0.0  ;;  %v107_v43 = vmax.f32 %v91_v34, 0.0  ;;  %v113_v47 = vpack.c.bf16 %v99_v39, %v98_v38  ;;  %v61_v51 = vmul.f32 %v384_v44, %v478_v2 }
   0xb   :  { %v104_v36 = vmax.f32 %v88_v26, 0.0  ;;  %v105_v37 = vmax.f32 %v89_v27, 0.0  ;;  %v112_v41 = vpack.c.bf16 %v97_v32, %v96_v31  ;;  %v401_v52 = vunpack.c.h.bf16 %v411_v35 }
   0xc   :  { %v117_v50 = vpack.c.bf16 %v107_v43, %v106_v42  ;;  %v388_v53 = vunpack.c.l.bf16 %v408_v40  ;;  %v62_v54 = vmul.f32 %v385_v48, %v478_v2  ;;  %v69_v55 = vmul.f32 %v400_v49, %v478_v2 }
   0xd   :  { %v116_v46 = vpack.c.bf16 %v105_v37, %v104_v36  ;;  %424 = vmatprep.mubr.msk.bf16.mxu0 %vm121_vm1, %v112_v41  ;;  %v389_v56 = vunpack.c.h.bf16 %v408_v40  ;;  %v404_v57 = vunpack.c.l.bf16 %v412_v45  ;;  %v84_v58 = vadd.f32 %v489_v8, %v61_v51 }
   0xe   :  { %425 = vmatmul.mubr.msk.bf16.vlgmr.msra.gmra.mxu0 %vm121_vm1, %v113_v47  ;;  %v70_v59 = vmul.f32 %v401_v52, %v478_v2  ;;  %v63_v60 = vmul.f32 %v388_v53, %v478_v2  ;;  %v405_v61 = vunpack.c.h.bf16 %v412_v45  ;;  %v85_v62 = vadd.f32 %v489_v8, %v62_v54 }
   0xf   :  { %432 = vmatprep.mubr.msk.bf16.mxu1 %vm121_vm1, %v116_v46  ;;  %v92_v63 = vadd.f32 %v489_v8, %v69_v55  ;;  %v64_v0 = vmul.f32 %v389_v56, %v478_v2  ;;  %v71_v1 = vmul.f32 %v404_v57, %v478_v2  ;;  %v100_v3 = vmax.f32 %v84_v58, 0.0 }
  0x10   :  { %433 = vmatmul.mubr.msk.bf16.vlgmr.msra.gmra.mxu1 %vm121_vm1, %v117_v50  ;;  %v93_v4 = vadd.f32 %v489_v8, %v70_v59  ;;  %v86_v5 = vadd.f32 %v489_v8, %v63_v60  ;;  %v72_v6 = vmul.f32 %v405_v61, %v478_v2  ;;  %v101_v7 = vmax.f32 %v85_v62, 0.0 }
  0x11   :  { %v108_v9 = vmax.f32 %v92_v63, 0.0  ;;  %v87_v10 = vadd.f32 %v489_v8, %v64_v0  ;;  %v94_v11 = vadd.f32 %v489_v8, %v71_v1 }
  0x12   :  { %v109_v12 = vmax.f32 %v93_v4, 0.0  ;;  %v102_v13 = vmax.f32 %v86_v5, 0.0  ;;  %v95_v14 = vadd.f32 %v489_v8, %v72_v6  ;;  %v114_v15 = vpack.c.bf16 %v101_v7, %v100_v3 }
  0x13   :  { %v103_v16 = vmax.f32 %v87_v10, 0.0  ;;  %v110_v17 = vmax.f32 %v94_v11, 0.0 }
  0x14   :  { %v118_v18 = vpack.c.bf16 %v109_v12, %v108_v9  ;;  %v111_v19 = vmax.f32 %v95_v14, 0.0  ;;  %428 = vmatprep.mubr.msk.bf16.mxu0 %vm121_vm1, %v114_v15 }
  0x15   :  { %v115_v20 = vpack.c.bf16 %v103_v16, %v102_v13 }
  0x16   :  { %436 = vmatprep.mubr.msk.bf16.mxu1 %vm121_vm1, %v118_v18  ;;  %v119_v2 = vpack.c.bf16 %v111_v19, %v110_v17 }
  0x17   :  { %429 = vmatmul.mubr.msk.bf16.gmra.mxu0 %vm121_vm1, %v115_v20 }
  0x18   :  { %437 = vmatmul.mubr.msk.bf16.gmra.mxu1 %vm121_vm1, %v119_v2 }
  0xce   :  { %v426_v21 = vpop.f32.mrf.mxu0 }
  0xcf   :  { %v360_v22 = vpack.c.bf16 %v426_v21, %v426_v21 }
  0xd0   :  { %v434_v23 = vpop.f32.mrf.mxu1  ;;  %v184_v24 = vpop.f32.mrf.mxu0 }
  0xd1   :  { %v368_v8 = vpack.c.bf16 %v434_v23, %v434_v23  ;;  %314 = vst.msk [vmem:[%s614_s4 + $0x8] sm:$0xf] %vm311_vm2, %v360_v22  ;;  %v358_v25 = vpack.c.bf16 %v184_v24, %v184_v24 }
  0xd2   :  { %v216_v26 = vpop.f32.mrf.mxu1  ;;  %v427_v28 = vpop.f32.mrf.mxu0 }
  0xd3   :  { %322 = vst.msk [vmem:[%s614_s4 + $0x28] sm:$0xf] %vm311_vm2, %v368_v8  ;;  %v366_v27 = vpack.c.bf16 %v216_v26, %v216_v26  ;;  %312 = vst.msk [vmem:[%s614_s4] sm:$0xf] %vm311_vm2, %v358_v25  ;;  %v361_v29 = vpack.c.bf16 %v427_v28, %v427_v28 }
  0xd4   :  { %v435_v30 = vpop.f32.mrf.mxu1  ;;  %v187_v32 = vpop.f32.mrf.mxu0 }
  0xd5   :  { %320 = vst.msk [vmem:[%s614_s4 + $0x20] sm:$0xf] %vm311_vm2, %v366_v27  ;;  %v369_v31 = vpack.c.bf16 %v435_v30, %v435_v30  ;;  %315 = vst.msk [vmem:[%s614_s4 + $0xc] sm:$0xf] %vm311_vm2, %v361_v29  ;;  %v359_v33 = vpack.c.bf16 %v187_v32, %v187_v32 }
  0xd6   :  { %v219_v34 = vpop.f32.mrf.mxu1 }
  0xd7   :  { %323 = vst.msk [vmem:[%s614_s4 + $0x2c] sm:$0xf] %vm311_vm2, %v369_v31  ;;  %v367_v35 = vpack.c.bf16 %v219_v34, %v219_v34  ;;  %313 = vst.msk [vmem:[%s614_s4 + $0x4] sm:$0xf] %vm311_vm2, %v359_v33  ;;  %v430_v36 = vpop.f32.mrf.mxu0 }
  0xd8   :  { %v364_v37 = vpack.c.bf16 %v430_v36, %v430_v36  ;;  %v438_v38 = vpop.f32.mrf.mxu1 }
  0xd9   :  { %321 = vst.msk [vmem:[%s614_s4 + $0x24] sm:$0xf] %vm311_vm2, %v367_v35  ;;  %v372_v39 = vpack.c.bf16 %v438_v38, %v438_v38  ;;  %v200_v40 = vpop.f32.mrf.mxu0 }
  0xda   :  { %318 = vst.msk [vmem:[%s614_s4 + $0x18] sm:$0xf] %vm311_vm2, %v364_v37  ;;  %v362_v41 = vpack.c.bf16 %v200_v40, %v200_v40  ;;  %v232_v42 = vpop.f32.mrf.mxu1 }
  0xdb   :  { %326 = vst.msk [vmem:[%s614_s4 + $0x38] sm:$0xf] %vm311_vm2, %v372_v39  ;;  %v370_v43 = vpack.c.bf16 %v232_v42, %v232_v42  ;;  %v431_v44 = vpop.f32.mrf.mxu0 }
  0xdc   :  { %316 = vst.msk [vmem:[%s614_s4 + $0x10] sm:$0xf] %vm311_vm2, %v362_v41  ;;  %v365_v45 = vpack.c.bf16 %v431_v44, %v431_v44  ;;  %v439_v46 = vpop.f32.mrf.mxu1 }
  0xdd   :  { %324 = vst.msk [vmem:[%s614_s4 + $0x30] sm:$0xf] %vm311_vm2, %v370_v43  ;;  %v373_v47 = vpack.c.bf16 %v439_v46, %v439_v46  ;;  %v203_v48 = vpop.f32.mrf.mxu0 }
  0xde   :  { %319 = vst.msk [vmem:[%s614_s4 + $0x1c] sm:$0xf] %vm311_vm2, %v365_v45  ;;  %v363_v49 = vpack.c.bf16 %v203_v48, %v203_v48  ;;  %v235_v50 = vpop.f32.mrf.mxu1 }
  0xdf   :  { %327 = vst.msk [vmem:[%s614_s4 + $0x3c] sm:$0xf] %vm311_vm2, %v373_v47  ;;  %v371_v51 = vpack.c.bf16 %v235_v50, %v235_v50 }
  0xe0   :  { %317 = vst.msk [vmem:[%s614_s4 + $0x14] sm:$0xf] %vm311_vm2, %v363_v49 }
  0xe1   :  { %325 = vst.msk [vmem:[%s614_s4 + $0x34] sm:$0xf] %vm311_vm2, %v371_v51 }

// kernel: network_block_forward.7
= control target key start
LH: loop header
LB: loop body
LE: loop exit
PB: predicated region body
PF: predicated region fallthrough
CT: control target
= control target key end

     0   :  { %s2118_s15 = smov 0   ;;  %s2120_s16 = smov 0   ;;  %s2559_s0 = inlined_call_operand.vmem [shape: bf16[2,107,8], index: 0, kind: input, shape index: {}]   ;;  %s2560_s1 = inlined_call_operand.vmem [shape: f32[107,1], index: 1, kind: input, shape index: {}]   ;;  %s2561_s2 = inlined_call_operand.vmem [shape: bf16[9,8,8], index: 2, kind: input, shape index: {}]   ;;  %s2562_s3 = inlined_call_operand.vmem [shape: bf16[2,107,8], index: 3, kind: input, shape index: {}]   ;;  %s2563_s4 = inlined_call_operand.vmem [shape: bf16[2,107,8], index: 4, kind: output, shape index: {}]  }
   0x1   :  { %s2122_s17 = smov 0  }
   0x2 LB: > { %s26_s18 = sadd.s32 1, %s2084_s16  ;;  %p1649_p0 = scmp.ge.s32.totalorder %s2088_s17, 1  ;;  %s2088_s17 = sphi %s2122_s17, %s14_s17   ;;  %s2084_s16 = sphi %s2120_s16, %s2565_s16   ;;  %s2080_s15 = sphi %s2118_s15, %s2564_s15  }
   0x3   : > { %p28_p1 = scmp.ge.s32.totalorder %s26_s18, 2  ;;  %p200_p2 = scmp.lt.s32.totalorder %s2088_s17, 3 }
   0x5   : > { %s2567_s18 = smov (%p28_p1, %s26_s18), 0  ;;  %p201_p3 = pnand %p1649_p0, %p200_p2 }
   0x6   : > { %p241_p4 = scmp.lt.s32.totalorder (!%p201_p3), %s2080_s15, 1 }
   0x7   : > { %204 = sbr.rel (%p201_p3) target bundleno = 411 (0x19b), region = 36 }
   0xc   : > { %v1653_v0 = vld [vmem:[%s2561_s2 + $0x4] sm:$0xf]  ;;  %vm359_vm0 = vcmask 1043456   ;;  %v2090_v1 = vmov 0.0   ;;  %s2569_s15 = smov (!%p241_p4, %s2080_s15), 1  ;;  %vm1477_vm1 = vcmask 58368  }
   0xd   : > { %1836 = vmatprep.subr.bf16.mxu0 %v2090_v1  ;;  %2034 = vmatprep.subr.bf16.mxu1 %v2090_v1  ;;  %v361_v2 = vsel %vm359_vm0, %v1653_v0, 0  ;;  %vm1478_vm2 = vsmask.f32 1280  ;;  %vm2091_vm3 = vmmov 0   ;;  %s2147_s21 = smul.u32 56, %s2569_s15  ;;  %vm295_vm5 = vcmask 64512  }
   0xe   : > { %1837 = vmatpush3.bf16.msra.mxu0 %v361_v2  ;;  %2035 = vmatpush3.bf16.msra.mxu1 %v361_v2  ;;  %vm1479_vm4 = vmand %vm1477_vm1, %vm1478_vm2  ;;  %v1664_v25 = vld [vmem:[%s2561_s2 + $0x8] sm:$0xf]  ;;  %v326_v26 = vld [vmem:[%s2561_s2] sm:$0xf]  ;;  %vm309_vm6 = vcmask 59392   ;;  %vm1463_vm1 = vcmask 60416  }
   0xf   : > { %1838 = vmatprep.mubr.msk.bf16.mxu0 %vm2091_vm3, %v2090_v1  ;;  %1850 = vmatprep.mubr.msk.bf16.mxu1 %vm2091_vm3, %v2090_v1  ;;  %s2154_s24 = scalar_lea.vmem %s2559_s0, %s2147_s21  ;;  %s2160_s27 = scalar_lea.vmem %s2563_s4, %s2147_s21  ;;  %v560_v34 = vsel %vm359_vm0, %v1664_v25, 0  ;;  %v452_v36 = vsel %vm359_vm0, %v326_v26, 0  ;;  %v1670_v48 = vld [vmem:[%s2561_s2 + $0xc] sm:$0xf]  ;;  %v1676_v55 = vld [vmem:[%s2561_s2 + $0x10] sm:$0xf] }
  0x10   : > { %1880 = vmatprep.subr.bf16.mxu0 %v2090_v1  ;;  %1858 = vmatprep.subr.bf16.mxu1 %v2090_v1  ;;  %v1729_v3 = vld [vmem:[%s2154_s24] sm:$0xff]   ;;  %v1772_v4 = vld [vmem:[%s2154_s24 + $0x8] sm:$0xff]   ;;  %v1480_v5 = vld [vmem:[%s2160_s27 + $0x34] sm:$0x3]  ;;  %v678_v50 = vsel %vm359_vm0, %v1670_v48, 0  ;;  %v796_v58 = vsel %vm359_vm0, %v1676_v55, 0  ;;  %s2497_s23 = scalar_lea.vmem %s2562_s3, %s2147_s21 }
  0x11   : > { %v1730_v6 = vunpack.c.l.bf16 %v1729_v3  ;;  %v1731_v7 = vunpack.c.h.bf16 %v1729_v3  ;;  %v1734_v8 = vunpack.c.l.bf16 %v1772_v4  ;;  %v1481_v9 = vsel %vm1479_vm4, 0, %v1480_v5  ;;  %v1774_v10 = vld [vmem:[%s2154_s24 + $0x18] sm:$0xff]   ;;  %v1775_v11 = vld [vmem:[%s2154_s24 + $0x20] sm:$0xff]   ;;  %v1773_v12 = vld [vmem:[%s2154_s24 + $0x10] sm:$0xff]  }
  0x12   : > { %1482 = vst [vmem:[%s2160_s27 + $0x34] sm:$0x3] %v1481_v9  ;;  %v1742_v13 = vunpack.c.l.bf16 %v1774_v10  ;;  %v1743_v14 = vunpack.c.h.bf16 %v1774_v10  ;;  %v1746_v15 = vunpack.c.l.bf16 %v1775_v11  ;;  %v1735_v16 = vunpack.c.h.bf16 %v1772_v4  ;;  %v1776_v17 = vld [vmem:[%s2154_s24 + $0x28] sm:$0xff]   ;;  %v279_v18 = vld [vmem:[%s2154_s24 + $0x30] sm:$0xf] }
  0x13   : > { %296 = vst.msk [vmem:[#allocation2] sm:$0xff] %vm295_vm5, %v1730_v6  ;;  %297 = vst.msk [vmem:[#allocation2 + $0x8] sm:$0xff] %vm295_vm5, %v1731_v7  ;;  %v1738_v19 = vunpack.c.l.bf16 %v1773_v12  ;;  %v1747_v20 = vunpack.c.h.bf16 %v1775_v11  ;;  %v1750_v21 = vunpack.c.l.bf16 %v1776_v17  ;;  %v1739_v22 = vunpack.c.h.bf16 %v1773_v12  ;;  %v280_v27 = vld [vmem:[%s2154_s24 + $0x34] sm:$0x3] }
  0x14   : > { %298 = vst.msk [vmem:[#allocation2 + $0x10] sm:$0xff] %vm295_vm5, %v1734_v8  ;;  %302 = vst.msk [vmem:[#allocation2 + $0x30] sm:$0xff] %vm295_vm5, %v1742_v13  ;;  %v1751_v23 = vunpack.c.h.bf16 %v1776_v17  ;;  %v293_v24 = vunpack.c.l.bf16 %v279_v18  ;;  %v294_v30 = vunpack.c.l.bf16 %v280_v27  ;;  %v1682_v17 = vld [vmem:[%s2561_s2 + $0x14] sm:$0xf] }
  0x15   : > { %303 = vst.msk [vmem:[#allocation2 + $0x38] sm:$0xff] %vm295_vm5, %v1743_v14  ;;  %304 = vst.msk [vmem:[#allocation2 + $0x40] sm:$0xff] %vm295_vm5, %v1746_v15 }
  0x16   : > { %299 = vst.msk [vmem:[#allocation2 + $0x18] sm:$0xff] %vm295_vm5, %v1735_v16  ;;  %300 = vst.msk [vmem:[#allocation2 + $0x20] sm:$0xff] %vm295_vm5, %v1738_v19  ;;  %v914_v19 = vsel %vm359_vm0, %v1682_v17, 0 }
  0x17   : > { %305 = vst.msk [vmem:[#allocation2 + $0x48] sm:$0xff] %vm295_vm5, %v1747_v20  ;;  %306 = vst.msk [vmem:[#allocation2 + $0x50] sm:$0xff] %vm295_vm5, %v1750_v21 }
  0x18   : > { %301 = vst.msk [vmem:[#allocation2 + $0x28] sm:$0xff] %vm295_vm5, %v1739_v22  ;;  %307 = vst.msk [vmem:[#allocation2 + $0x58] sm:$0xff] %vm295_vm5, %v1751_v23  ;;  %v1688_v22 = vld [vmem:[%s2561_s2 + $0x18] sm:$0xf] }
  0x19   : > { %308 = vst.msk [vmem:[#allocation2 + $0x60] sm:$0xff] %vm295_vm5, %v293_v24  ;;  %v1032_v25 = vsel %vm359_vm0, %v1688_v22, 0 }
  0x1a   : > { %v327_v28 = vld [vmem:[#allocation2 + $0x6] sm:$0xff]  ;;  %310 = vst.msk [vmem:[#allocation2 + $0x68] sm:$0x7] %vm309_vm6, %v294_v30 }
  0x1b   : > { %v328_v29 = vld [vmem:[#allocation2 + $0xe] sm:$0xff]  ;;  %v311_v45 = vld [vmem:[#allocation2 + $0x5] sm:$0xff] }
  0x1c   : > { %v337_v31 = vpack.c.bf16 %v328_v29, %v327_v28  ;;  %v333_v32 = vld [vmem:[#allocation2 + $0x36] sm:$0xff]  ;;  %v334_v33 = vld [vmem:[#allocation2 + $0x3e] sm:$0xff]  ;;  %v312_v46 = vld [vmem:[#allocation2 + $0xd] sm:$0xff] }
  0x1d   : > { %v340_v35 = vpack.c.bf16 %v334_v33, %v333_v32  ;;  %v329_v37 = vld [vmem:[#allocation2 + $0x16] sm:$0xff]  ;;  %v330_v38 = vld [vmem:[#allocation2 + $0x1e] sm:$0xff]  ;;  %v321_v49 = vpack.c.bf16 %v312_v46, %v311_v45  ;;  %v527_v51 = vld [vmem:[#allocation2 + $0x7] sm:$0xff] }
  0x1e   : > { %1839 = vmatmul.mubr.msk.bf16.vlgmr.msra.gmra.mxu0 %vm295_vm5, %v337_v31  ;;  %v335_v39 = vld [vmem:[#allocation2 + $0x46] sm:$0xff]  ;;  %v336_v40 = vld [vmem:[#allocation2 + $0x4e] sm:$0xff]  ;;  %v338_v41 = vpack.c.bf16 %v330_v38, %v329_v37  ;;  %v314_v54 = vld [vmem:[#allocation2 + $0x1d] sm:$0xff] }
  0x1f   : > { %1851 = vmatmul.mubr.msk.bf16.vlgmr.msra.gmra.mxu1 %vm295_vm5, %v340_v35  ;;  %1881 = vmatpush3.bf16.msra.mxu0 %v560_v34  ;;  %v341_v42 = vpack.c.bf16 %v336_v40, %v335_v39  ;;  %v331_v43 = vld [vmem:[#allocation2 + $0x26] sm:$0xff]  ;;  %v332_v44 = vld [vmem:[#allocation2 + $0x2e] sm:$0xff]  ;;  %v529_v59 = vld [vmem:[#allocation2 + $0x17] sm:$0xff]  ;;  %v2092_v40 = vmov 0  }
  0x20   : > { %1859 = vmatpush3.bf16.msra.mxu1 %v452_v36  ;;  %1842 = vmatprep.mubr.msk.bf16.mxu0 %vm2091_vm3, %v2090_v1  ;;  %v339_v47 = vpack.c.bf16 %v332_v44, %v331_v43  ;;  %v528_v52 = vld [vmem:[#allocation2 + $0xf] sm:$0xff]  ;;  %v530_v60 = vld [vmem:[#allocation2 + $0x1f] sm:$0xff]  ;;  %v531_v2 = vld [vmem:[#allocation2 + $0x27] sm:$0xff]  ;;  %1464 = vst.msk [vmem:[%s2160_s27] sm:$0xf] %vm1463_vm1, %v2092_v40 }
  0x21   : > { %1854 = vmatprep.mubr.msk.bf16.mxu1 %vm2091_vm3, %v2090_v1  ;;  %1902 = vmatprep.subr.bf16.mxu1 %v2090_v1  ;;  %v313_v53 = vld [vmem:[#allocation2 + $0x15] sm:$0xff]  ;;  %v537_v56 = vpack.c.bf16 %v528_v52, %v527_v51  ;;  %v315_v61 = vld [vmem:[#allocation2 + $0x25] sm:$0xff]  ;;  %v316_v62 = vld [vmem:[#allocation2 + $0x2d] sm:$0xff]  ;;  %v538_v63 = vpack.c.bf16 %v530_v60, %v529_v59  ;;  %v655_v18 = vpack.c.bf16 %v529_v59, %v528_v52 }
  0x22   : > { %1924 = vmatprep.subr.bf16.mxu0 %v2090_v1  ;;  %v322_v57 = vpack.c.bf16 %v314_v54, %v313_v53  ;;  %v323_v0 = vpack.c.bf16 %v316_v62, %v315_v61  ;;  %v532_v3 = vld [vmem:[#allocation2 + $0x2f] sm:$0xff]  ;;  %v318_v5 = vld [vmem:[#allocation2 + $0x3d] sm:$0xff]  ;;  %v319_v10 = vld [vmem:[#allocation2 + $0x45] sm:$0xff]  ;;  %v656_v24 = vpack.c.bf16 %v531_v2, %v530_v60  ;;  %2064 = vset.pattern.permute.xlu0 %v2092_v40 }
  0x23   : > { %v317_v4 = vld [vmem:[#allocation2 + $0x35] sm:$0xff]  ;;  %v539_v6 = vpack.c.bf16 %v532_v3, %v531_v2  ;;  %v534_v9 = vld [vmem:[#allocation2 + $0x3f] sm:$0xff]  ;;  %v320_v11 = vld [vmem:[#allocation2 + $0x4d] sm:$0xff]  ;;  %2065 = vset.pattern.permute.xlu1 %v2092_v40  ;;  %1465 = vst.msk [vmem:[%s2160_s27 + $0x4] sm:$0xf] %vm1463_vm1, %v2092_v40 }
  0x24   : > { %v324_v7 = vpack.c.bf16 %v318_v5, %v317_v4  ;;  %v533_v8 = vld [vmem:[#allocation2 + $0x37] sm:$0xff]  ;;  %v325_v13 = vpack.c.bf16 %v320_v11, %v319_v10  ;;  %v535_v14 = vld [vmem:[#allocation2 + $0x47] sm:$0xff]  ;;  %v536_v15 = vld [vmem:[#allocation2 + $0x4f] sm:$0xff]  ;;  %1466 = vst.msk [vmem:[%s2160_s27 + $0x8] sm:$0xf] %vm1463_vm1, %v2092_v40 }
  0x25   : > { %v540_v12 = vpack.c.bf16 %v534_v9, %v533_v8  ;;  %v541_v16 = vpack.c.bf16 %v536_v15, %v535_v14  ;;  %v763_v20 = vld [vmem:[#allocation2 + $0x10] sm:$0xff]  ;;  %v764_v21 = vld [vmem:[#allocation2 + $0x18] sm:$0xff]  ;;  %v765_v26 = vld [vmem:[#allocation2 + $0x20] sm:$0xff]  ;;  %v657_v29 = vpack.c.bf16 %v533_v8, %v532_v3  ;;  %v658_v33 = vpack.c.bf16 %v535_v14, %v534_v9  ;;  %1476 = vst.msk [vmem:[%s2160_s27 + $0x30] sm:$0xf] %vm1463_vm1, %v2092_v40 }
  0x26   : > { %1843 = vmatmul.mubr.msk.bf16.gmra.mxu0 %vm295_vm5, %v338_v41  ;;  %v773_v23 = vpack.c.bf16 %v764_v21, %v763_v20  ;;  %v766_v27 = vld [vmem:[#allocation2 + $0x28] sm:$0xff]  ;;  %v767_v30 = vld [vmem:[#allocation2 + $0x30] sm:$0xff]  ;;  %v768_v31 = vld [vmem:[#allocation2 + $0x38] sm:$0xff]  ;;  %1467 = vst.msk [vmem:[%s2160_s27 + $0xc] sm:$0xf] %vm1463_vm1, %v2092_v40 }
  0x27   : > { %1855 = vmatmul.mubr.msk.bf16.gmra.mxu1 %vm295_vm5, %v341_v42  ;;  %1846 = vmatprep.mubr.msk.bf16.mxu0 %vm2091_vm3, %v2090_v1  ;;  %v774_v28 = vpack.c.bf16 %v766_v27, %v765_v26  ;;  %v775_v32 = vpack.c.bf16 %v768_v31, %v767_v30  ;;  %v769_v34 = vld [vmem:[#allocation2 + $0x40] sm:$0xff]  ;;  %v770_v35 = vld [vmem:[#allocation2 + $0x48] sm:$0xff]  ;;  %v654_v36 = vld [vmem:[#allocation2 + $0x57] sm:$0xff]  ;;  %1468 = vst.msk [vmem:[%s2160_s27 + $0x10] sm:$0xf] %vm1463_vm1, %v2092_v40 }
  0x28   : > { %1860 = vmatprep.mubr.msk.bf16.mxu1 %vm2091_vm3, %v2090_v1  ;;  %v776_v37 = vpack.c.bf16 %v770_v35, %v769_v34  ;;  %v659_v38 = vpack.c.bf16 %v654_v36, %v536_v15  ;;  %v1383_v39 = vld [vmem:[%s2560_s1 + $0x10] sm:$0xff]  ;;  %v772_v43 = vld [vmem:[#allocation2 + $0x58] sm:$0xff]  ;;  %v1385_v46 = vld [vmem:[%s2560_s1 + $0x20] sm:$0xff]  ;;  %1469 = vst.msk [vmem:[%s2160_s27 + $0x14] sm:$0xf] %vm1463_vm1, %v2092_v40 }
  0x29   : > { %vm1393_vm7 = vcmp.gt.f32.partialorder %v1383_v39, 0.5  ;;  %v771_v42 = vld [vmem:[#allocation2 + $0x50] sm:$0xff]  ;;  %v882_v45 = vld [vmem:[#allocation2 + $0x19] sm:$0xff]  ;;  %vm1395_vm8 = vcmp.gt.f32.partialorder %v1385_v46, 0.5  ;;  %v1386_v53 = vld [vmem:[%s2560_s1 + $0x28] sm:$0xff] }
  0x2a   : > { %v1403_v41 = vsel %vm1393_vm7, 1, %v2092_v40  ;;  %v881_v44 = vld [vmem:[#allocation2 + $0x11] sm:$0xff]  ;;  %v777_v48 = vpack.c.bf16 %v772_v43, %v771_v42  ;;  %vm1396_vm10 = vcmp.gt.f32.partialorder %v1386_v53, 0.5  ;;  %v1700_v60 = vld [vmem:[%s2561_s2 + $0x20] sm:$0xf]  ;;  %v1390_v3 = vld [vmem:[%s2560_s1 + $0x48] sm:$0xff] }
  0x2b   : > { %1414 = vperm.xlu0 %2064, %v1403_v41   ;;  %v891_v52 = vpack.c.bf16 %v882_v45, %v881_v44  ;;  %v1406_v55 = vsel %vm1396_vm10, 1, %v2092_v40  ;;  %v1387_v59 = vld [vmem:[%s2560_s1 + $0x30] sm:$0xff]  ;;  %v1268_v2 = vsel %vm359_vm0, %v1700_v60, 0  ;;  %v1389_v4 = vld [vmem:[%s2560_s1 + $0x40] sm:$0xff]  ;;  %vm1400_vm13 = vcmp.gt.f32.partialorder %v1390_v3, 0.5  ;;  %v1392_v9 = vld [vmem:[%s2560_s1 + $0x58] sm:$0xff] }
  0x2c   : > { %vm1397_vm12 = vcmp.gt.f32.partialorder %v1387_v59, 0.5  ;;  %vm1399_vm14 = vcmp.gt.f32.partialorder %v1389_v4, 0.5  ;;  %v1410_v5 = vsel %vm1400_vm13, 1, %v2092_v40  ;;  %v886_v8 = vld [vmem:[#allocation2 + $0x39] sm:$0xff]  ;;  %v1391_v10 = vld [vmem:[%s2560_s1 + $0x50] sm:$0xff]  ;;  %vm1402_vm15 = vcmp.gt.f32.partialorder %v1392_v9, 0.5 }
  0x2d   : > { %v887_v15 = vld [vmem:[#allocation2 + $0x41] sm:$0xff]  ;;  %v890_v20 = vld [vmem:[#allocation2 + $0x59] sm:$0xff]  ;;  %v1119_v30 = vld [vmem:[#allocation2 + $0x2a] sm:$0xff]  ;;  %1470 = vst.msk [vmem:[%s2160_s27 + $0x18] sm:$0xf] %vm1463_vm1, %v2092_v40 }
  0x2e   : > { %1847 = vmatmul.mubr.msk.bf16.gmra.mxu0 %vm295_vm5, %v339_v47  ;;  %v1384_v47 = vld [vmem:[%s2560_s1 + $0x18] sm:$0xff]  ;;  %v1011_v17 = vpack.c.bf16 %v887_v15, %v886_v8  ;;  %v1237_v34 = vld [vmem:[#allocation2 + $0x2b] sm:$0xff]  ;;  %v1240_v42 = vld [vmem:[#allocation2 + $0x43] sm:$0xff]  ;;  %1471 = vst.msk [vmem:[%s2160_s27 + $0x1c] sm:$0xf] %vm1463_vm1, %v2092_v40 }
  0x2f   : > { %1861 = vmatmul.mubr.msk.bf16.vlgmr.msra.gmra.mxu1 %vm295_vm5, %v321_v49  ;;  %1882 = vmatprep.mubr.msk.bf16.mxu0 %vm2091_vm3, %v2090_v1  ;;  %vm1394_vm9 = vcmp.gt.f32.partialorder %v1384_v47, 0.5  ;;  %v1694_v49 = vld [vmem:[%s2561_s2 + $0x1c] sm:$0xf]  ;;  %v1120_v31 = vld [vmem:[#allocation2 + $0x32] sm:$0xff]  ;;  %v1123_v43 = vld [vmem:[#allocation2 + $0x4a] sm:$0xff] }
  0x30   : > { %1903 = vmatpush3.bf16.msra.mxu1 %v678_v50  ;;  %1864 = vmatprep.mubr.msk.bf16.mxu1 %vm2091_vm3, %v2090_v1  ;;  %v1405_v50 = vsel %vm1395_vm8, 1, %v2092_v40  ;;  %v1404_v51 = vsel %vm1394_vm9, 1, %v2092_v40  ;;  %v1150_v54 = vsel %vm359_vm0, %v1694_v49, 0  ;;  %vm1401_vm0 = vcmp.gt.f32.partialorder %v1391_v10, 0.5  ;;  %v1238_v35 = vld [vmem:[#allocation2 + $0x33] sm:$0xff]  ;;  %v1239_v41 = vld [vmem:[#allocation2 + $0x3b] sm:$0xff] }
  0x31   : > { %1946 = vmatprep.subr.bf16.mxu1 %v2090_v1  ;;  %1420 = vperm.xlu1 %2065, %v1405_v50   ;;  %v1121_v36 = vld [vmem:[#allocation2 + $0x3a] sm:$0xff]  ;;  %v1124_v44 = vld [vmem:[#allocation2 + $0x52] sm:$0xff]  ;;  %v1126_v50 = vld [vmem:[#allocation2 + $0x62] sm:$0xff]  ;;  %1472 = vst.msk [vmem:[%s2160_s27 + $0x20] sm:$0xf] %vm1463_vm1, %v2092_v40 }
  0x32   : > { %1417 = vperm.xlu0 %2064, %v1404_v51   ;;  %v1130_v46 = vpack.c.bf16 %v1124_v44, %v1123_v43  ;;  %v1241_v47 = vld [vmem:[#allocation2 + $0x4b] sm:$0xff]  ;;  %v1125_v49 = vld [vmem:[#allocation2 + $0x5a] sm:$0xff]  ;;  %1473 = vst.msk [vmem:[%s2160_s27 + $0x24] sm:$0xf] %vm1463_vm1, %v2092_v40  ;;  %1474 = vst.msk [vmem:[%s2160_s27 + $0x28] sm:$0xf] %vm1463_vm1, %v2092_v40 }
  0x33   : > { %v1243_v53 = vld [vmem:[#allocation2 + $0x5b] sm:$0xff]  ;;  %1475 = vst.msk [vmem:[%s2160_s27 + $0x2c] sm:$0xf] %vm1463_vm1, %v2092_v40 }
  0x35   : > { %1423 = vperm.xlu1 %2065, %v1406_v55  }
  0x36   : > { %1883 = vmatmul.mubr.msk.bf16.vlgmr.msra.gmra.mxu0 %vm295_vm5, %v537_v56  ;;  %v883_v56 = vld [vmem:[#allocation2 + $0x21] sm:$0xff] }
  0x37   : > { %1865 = vmatmul.mubr.msk.bf16.gmra.mxu1 %vm295_vm5, %v322_v57  ;;  %1925 = vmatpush3.bf16.msra.mxu0 %v796_v58  ;;  %v884_v57 = vld [vmem:[#allocation2 + $0x29] sm:$0xff]  ;;  %v1388_v58 = vld [vmem:[%s2560_s1 + $0x38] sm:$0xff]  ;;  %v1009_v61 = vpack.c.bf16 %v883_v56, %v882_v45  ;;  %v1247_v45 = vpack.c.bf16 %v1240_v42, %v1239_v41 }
  0x38   : > { %1868 = vmatprep.mubr.msk.bf16.mxu1 %vm2091_vm3, %v2090_v1  ;;  %1886 = vmatprep.mubr.msk.bf16.mxu0 %vm2091_vm3, %v2090_v1  ;;  %vm1398_vm11 = vcmp.gt.f32.partialorder %v1388_v58, 0.5 }
  0x39   : > { %1968 = vmatprep.subr.bf16.mxu0 %v2090_v1  ;;  %v1408_v62 = vsel %vm1398_vm11, 1, %v2092_v40 }
  0x3a   : > { %1429 = vperm.xlu1 %2065, %v1408_v62  }
  0x3e   : > { %1887 = vmatmul.mubr.msk.bf16.gmra.mxu0 %vm295_vm5, %v538_v63  ;;  %v1407_v63 = vsel %vm1397_vm12, 1, %v2092_v40  ;;  %1435 = vperm.xlu1 %2065, %v1410_v5  }
  0x3f   : > { %1869 = vmatmul.mubr.msk.bf16.gmra.mxu1 %vm295_vm5, %v323_v0  ;;  %1890 = vmatprep.mubr.msk.bf16.mxu0 %vm2091_vm3, %v2090_v1  ;;  %v892_v0 = vpack.c.bf16 %v884_v57, %v883_v56 }
  0x40   : > { %1872 = vmatprep.mubr.msk.bf16.mxu1 %vm2091_vm3, %v2090_v1  ;;  %1426 = vperm.xlu0 %2064, %v1407_v63  }
  0x46   : > { %1891 = vmatmul.mubr.msk.bf16.gmra.mxu0 %vm295_vm5, %v539_v6  ;;  %v1409_v6 = vsel %vm1399_vm14, 1, %v2092_v40 }
  0x47   : > { %1873 = vmatmul.mubr.msk.bf16.gmra.mxu1 %vm295_vm5, %v324_v7  ;;  %1894 = vmatprep.mubr.msk.bf16.mxu0 %vm2091_vm3, %v2090_v1  ;;  %v885_v7 = vld [vmem:[#allocation2 + $0x31] sm:$0xff] }
  0x48   : > { %1876 = vmatprep.mubr.msk.bf16.mxu1 %vm2091_vm3, %v2090_v1  ;;  %1432 = vperm.xlu0 %2064, %v1409_v6   ;;  %v1010_v11 = vpack.c.bf16 %v885_v7, %v884_v57  ;;  %v893_v14 = vpack.c.bf16 %v886_v8, %v885_v7 }
  0x4e   : > { %1895 = vmatmul.mubr.msk.bf16.gmra.mxu0 %vm295_vm5, %v540_v12  ;;  %v1412_v12 = vsel %vm1402_vm15, 1, %v2092_v40 }
  0x4f   : > { %1877 = vmatmul.mubr.msk.bf16.gmra.mxu1 %vm295_vm5, %v325_v13  ;;  %1898 = vmatprep.mubr.msk.bf16.mxu0 %vm2091_vm3, %v2090_v1  ;;  %v1411_v13 = vsel %vm1401_vm0, 1, %v2092_v40 }
  0x50   : > { %1904 = vmatprep.mubr.msk.bf16.mxu1 %vm2091_vm3, %v2090_v1  ;;  %1441 = vperm.xlu1 %2065, %v1412_v12  }
  0x51   : > { %1438 = vperm.xlu0 %2064, %v1411_v13  }
  0x56   : > { %1899 = vmatmul.mubr.msk.bf16.gmra.mxu0 %vm295_vm5, %v541_v16  ;;  %v888_v16 = vld [vmem:[#allocation2 + $0x49] sm:$0xff] }
  0x57   : > { %1905 = vmatmul.mubr.msk.bf16.vlgmr.msra.gmra.mxu1 %vm295_vm5, %v655_v18  ;;  %1926 = vmatprep.mubr.msk.bf16.mxu0 %vm2091_vm3, %v2090_v1  ;;  %v894_v18 = vpack.c.bf16 %v888_v16, %v887_v15 }
  0x58   : > { %1947 = vmatpush3.bf16.msra.mxu1 %v914_v19  ;;  %1908 = vmatprep.mubr.msk.bf16.mxu1 %vm2091_vm3, %v2090_v1  ;;  %v889_v19 = vld [vmem:[#allocation2 + $0x51] sm:$0xff] }
  0x59   : > { %1990 = vmatprep.subr.bf16.mxu1 %v2090_v1  ;;  %v1012_v21 = vpack.c.bf16 %v889_v19, %v888_v16  ;;  %v895_v22 = vpack.c.bf16 %v890_v20, %v889_v19 }
  0x5e   : > { %1927 = vmatmul.mubr.msk.bf16.vlgmr.msra.gmra.mxu0 %vm295_vm5, %v773_v23  ;;  %v1008_v23 = vld [vmem:[#allocation2 + $0x61] sm:$0xff] }
  0x5f   : > { %1909 = vmatmul.mubr.msk.bf16.gmra.mxu1 %vm295_vm5, %v656_v24  ;;  %1969 = vmatpush3.bf16.msra.mxu0 %v1032_v25  ;;  %v1117_v24 = vld [vmem:[#allocation2 + $0x1a] sm:$0xff]  ;;  %v1118_v25 = vld [vmem:[#allocation2 + $0x22] sm:$0xff]  ;;  %v1013_v26 = vpack.c.bf16 %v1008_v23, %v890_v20 }
  0x60   : > { %1912 = vmatprep.mubr.msk.bf16.mxu1 %vm2091_vm3, %v2090_v1  ;;  %1930 = vmatprep.mubr.msk.bf16.mxu0 %vm2091_vm3, %v2090_v1  ;;  %v1127_v27 = vpack.c.bf16 %v1118_v25, %v1117_v24 }
  0x61   : > { %2012 = vmatprep.subr.bf16.mxu0 %v2090_v1 }
  0x66   : > { %1931 = vmatmul.mubr.msk.bf16.gmra.mxu0 %vm295_vm5, %v774_v28  ;;  %v1235_v28 = vld [vmem:[#allocation2 + $0x1b] sm:$0xff] }
  0x67   : > { %1913 = vmatmul.mubr.msk.bf16.gmra.mxu1 %vm295_vm5, %v657_v29  ;;  %1934 = vmatprep.mubr.msk.bf16.mxu0 %vm2091_vm3, %v2090_v1  ;;  %v1236_v29 = vld [vmem:[#allocation2 + $0x23] sm:$0xff] }
  0x68   : > { %1916 = vmatprep.mubr.msk.bf16.mxu1 %vm2091_vm3, %v2090_v1 }
  0x6e   : > { %1935 = vmatmul.mubr.msk.bf16.gmra.mxu0 %vm295_vm5, %v775_v32  ;;  %v1245_v32 = vpack.c.bf16 %v1236_v29, %v1235_v28 }
  0x6f   : > { %1917 = vmatmul.mubr.msk.bf16.gmra.mxu1 %vm295_vm5, %v658_v33  ;;  %1938 = vmatprep.mubr.msk.bf16.mxu0 %vm2091_vm3, %v2090_v1  ;;  %v1128_v33 = vpack.c.bf16 %v1120_v31, %v1119_v30 }
  0x70   : > { %1920 = vmatprep.mubr.msk.bf16.mxu1 %vm2091_vm3, %v2090_v1 }
  0x76   : > { %1939 = vmatmul.mubr.msk.bf16.gmra.mxu0 %vm295_vm5, %v776_v37  ;;  %v1122_v37 = vld [vmem:[#allocation2 + $0x42] sm:$0xff] }
  0x77   : > { %1921 = vmatmul.mubr.msk.bf16.gmra.mxu1 %vm295_vm5, %v659_v38  ;;  %1942 = vmatprep.mubr.msk.bf16.mxu0 %vm2091_vm3, %v2090_v1  ;;  %v1246_v38 = vpack.c.bf16 %v1238_v35, %v1237_v34  ;;  %v1129_v39 = vpack.c.bf16 %v1122_v37, %v1121_v36 }
  0x78   : > { %1948 = vmatprep.mubr.msk.bf16.mxu1 %vm2091_vm3, %v2090_v1 }
  0x7e   : > { %1943 = vmatmul.mubr.msk.bf16.gmra.mxu0 %vm295_vm5, %v777_v48  ;;  %v1242_v48 = vld [vmem:[#allocation2 + $0x53] sm:$0xff] }
  0x7f   : > { %1949 = vmatmul.mubr.msk.bf16.vlgmr.msra.gmra.mxu1 %vm295_vm5, %v891_v52  ;;  %1970 = vmatprep.mubr.msk.bf16.mxu0 %vm2091_vm3, %v2090_v1  ;;  %v1248_v51 = vpack.c.bf16 %v1242_v48, %v1241_v47  ;;  %v1131_v52 = vpack.c.bf16 %v1126_v50, %v1125_v49 }
  0x80   : > { %1991 = vmatpush3.bf16.msra.mxu1 %v1150_v54  ;;  %1952 = vmatprep.mubr.msk.bf16.mxu1 %vm2091_vm3, %v2090_v1  ;;  %v1244_v54 = vld [vmem:[#allocation2 + $0x63] sm:$0xff] }
  0x81   : > { %v1249_v55 = vpack.c.bf16 %v1244_v54, %v1243_v53 }
  0x86   : > { %1971 = vmatmul.mubr.msk.bf16.vlgmr.msra.gmra.mxu0 %vm295_vm5, %v1009_v61 }
  0x87   : > { %1953 = vmatmul.mubr.msk.bf16.gmra.mxu1 %vm295_vm5, %v892_v0  ;;  %2013 = vmatpush3.bf16.msra.mxu0 %v1268_v2 }
  0x88   : > { %1956 = vmatprep.mubr.msk.bf16.mxu1 %vm2091_vm3, %v2090_v1  ;;  %1974 = vmatprep.mubr.msk.bf16.mxu0 %vm2091_vm3, %v2090_v1 }
  0x8e   : > { %1975 = vmatmul.mubr.msk.bf16.gmra.mxu0 %vm295_vm5, %v1010_v11 }
  0x8f   : > { %1957 = vmatmul.mubr.msk.bf16.gmra.mxu1 %vm295_vm5, %v893_v14  ;;  %1978 = vmatprep.mubr.msk.bf16.mxu0 %vm2091_vm3, %v2090_v1 }
  0x90   : > { %1960 = vmatprep.mubr.msk.bf16.mxu1 %vm2091_vm3, %v2090_v1 }
  0x96   : > { %1979 = vmatmul.mubr.msk.bf16.gmra.mxu0 %vm295_vm5, %v1011_v17 }
  0x97   : > { %1961 = vmatmul.mubr.msk.bf16.gmra.mxu1 %vm295_vm5, %v894_v18  ;;  %1982 = vmatprep.mubr.msk.bf16.mxu0 %vm2091_vm3, %v2090_v1 }
  0x98   : > { %1964 = vmatprep.mubr.msk.bf16.mxu1 %vm2091_vm3, %v2090_v1 }
  0x9e   : > { %1983 = vmatmul.mubr.msk.bf16.gmra.mxu0 %vm295_vm5, %v1012_v21 }
  0x9f   : > { %1965 = vmatmul.mubr.msk.bf16.gmra.mxu1 %vm295_vm5, %v895_v22  ;;  %1986 = vmatprep.mubr.msk.bf16.mxu0 %vm2091_vm3, %v2090_v1 }
  0xa0   : > { %1992 = vmatprep.mubr.msk.bf16.mxu1 %vm2091_vm3, %v2090_v1 }
  0xa6   : > { %1987 = vmatmul.mubr.msk.bf16.gmra.mxu0 %vm295_vm5, %v1013_v26 }
  0xa7   : > { %1993 = vmatmul.mubr.msk.bf16.vlgmr.msra.gmra.mxu1 %vm295_vm5, %v1127_v27  ;;  %2014 = vmatprep.mubr.msk.bf16.mxu0 %vm2091_vm3, %v2090_v1 }
  0xa8   : > { %1996 = vmatprep.mubr.msk.bf16.mxu1 %vm2091_vm3, %v2090_v1 }
  0xae   : > { %2015 = vmatmul.mubr.msk.bf16.vlgmr.msra.gmra.mxu0 %vm295_vm5, %v1245_v32 }
  0xaf   : > { %1997 = vmatmul.mubr.msk.bf16.gmra.mxu1 %vm295_vm5, %v1128_v33  ;;  %2018 = vmatprep.mubr.msk.bf16.mxu0 %vm2091_vm3, %v2090_v1 }
  0xb0   : > { %2000 = vmatprep.mubr.msk.bf16.mxu1 %vm2091_vm3, %v2090_v1 }
  0xb6   : > { %2019 = vmatmul.mubr.msk.bf16.gmra.mxu0 %vm295_vm5, %v1246_v38 }
  0xb7   : > { %2001 = vmatmul.mubr.msk.bf16.gmra.mxu1 %vm295_vm5, %v1129_v39  ;;  %2022 = vmatprep.mubr.msk.bf16.mxu0 %vm2091_vm3, %v2090_v1 }
  0xb8   : > { %2004 = vmatprep.mubr.msk.bf16.mxu1 %vm2091_vm3, %v2090_v1 }
  0xbe   : > { %2023 = vmatmul.mubr.msk.bf16.gmra.mxu0 %vm295_vm5, %v1247_v45 }
  0xbf   : > { %2005 = vmatmul.mubr.msk.bf16.gmra.mxu1 %vm295_vm5, %v1130_v46  ;;  %2026 = vmatprep.mubr.msk.bf16.mxu0 %vm2091_vm3, %v2090_v1 }
  0xc0   : > { %2008 = vmatprep.mubr.msk.bf16.mxu1 %vm2091_vm3, %v2090_v1 }
  0xc6   : > { %2027 = vmatmul.mubr.msk.bf16.gmra.mxu0 %vm295_vm5, %v1248_v51 }
  0xc7   : > { %2009 = vmatmul.mubr.msk.bf16.gmra.mxu1 %vm295_vm5, %v1131_v52  ;;  %2030 = vmatprep.mubr.msk.bf16.mxu0 %vm2091_vm3, %v2090_v1 }
  0xce   : > { %2031 = vmatmul.mubr.msk.bf16.gmra.mxu0 %vm295_vm5, %v1249_v55 }
  0xde   : > { %v397_v56 = vpop.f32.mrf.mxu0 }
  0xdf   : > { %v2396_v57 = vpop.f32.mrf.mxu1 }
  0xe0   : > { %v1840_v58 = vpop.f32.mrf.mxu0 }
  0xe1   : > { %v1852_v59 = vpop.f32.mrf.mxu1 }
  0xe2   : > { %v400_v60 = vpop.f32.mrf.mxu0 }
  0xe3   : > { %v2398_v61 = vpop.f32.mrf.mxu1 }
  0xe4   : > { %v1841_v62 = vpop.f32.mrf.mxu0 }
  0xe5   : > { %v1853_v63 = vpop.f32.mrf.mxu1 }
  0xe6   : > { %v405_v0 = vpop.f32.mrf.mxu0 }
  0xe7   : > { %v2400_v2 = vpop.f32.mrf.mxu1 }
  0xe8   : > { %v1844_v1 = vpop.f32.mrf.mxu0 }
  0xe9   : > { %v1856_v3 = vpop.f32.mrf.mxu1 }
  0xea   : > { %v408_v4 = vpop.f32.mrf.mxu0 }
  0xeb   : > { %v2402_v5 = vpop.f32.mrf.mxu1 }
  0xec   : > { %v1845_v6 = vpop.f32.mrf.mxu0 }
  0xed   : > { %v1857_v7 = vpop.f32.mrf.mxu1 }
  0xee   : > { %v413_v8 = vpop.f32.mrf.mxu0 }
  0xef   : > { %v488_v9 = vpop.f32.mrf.mxu1 }
  0xf0   : > { %v489_v10 = vadd.f32 %v488_v9, %v397_v56  ;;  %v1848_v11 = vpop.f32.mrf.mxu0 }
  0xf1   : > { %v1862_v12 = vpop.f32.mrf.mxu1 }
  0xf2   : > { %v416_v13 = vpop.f32.mrf.mxu0 }
  0xf3   : > { %v491_v14 = vpop.f32.mrf.mxu1 }
  0xf4   : > { %v492_v15 = vadd.f32 %v491_v14, %v400_v60  ;;  %v1849_v16 = vpop.f32.mrf.mxu0 }
  0xf5   : > { %v1863_v17 = vpop.f32.mrf.mxu1 }
  0xf6   : > { %v596_v18 = vpop.f32.mrf.mxu0 }
  0xf7   : > { %v496_v19 = vpop.f32.mrf.mxu1  ;;  %v635_v20 = vadd.f32 %v596_v18, %v489_v10 }
  0xf8   : > { %v497_v21 = vadd.f32 %v496_v19, %v405_v0  ;;  %v1884_v22 = vpop.f32.mrf.mxu0 }
  0xf9   : > { %v1866_v23 = vpop.f32.mrf.mxu1 }
  0xfa   : > { %v599_v24 = vpop.f32.mrf.mxu0 }
  0xfb   : > { %v499_v25 = vpop.f32.mrf.mxu1  ;;  %v636_v26 = vadd.f32 %v599_v24, %v492_v15 }
  0xfc   : > { %v500_v27 = vadd.f32 %v499_v25, %v408_v4  ;;  %v1885_v28 = vpop.f32.mrf.mxu0 }
  0xfd   : > { %v1867_v29 = vpop.f32.mrf.mxu1 }
  0xfe   : > { %v604_v30 = vpop.f32.mrf.mxu0 }
  0xff   : > { %v504_v31 = vpop.f32.mrf.mxu1  ;;  %v637_v32 = vadd.f32 %v604_v30, %v497_v21 }
 0x100   : > { %v505_v40 = vadd.f32 %v504_v31, %v413_v8  ;;  %v1888_v33 = vpop.f32.mrf.mxu0 }
 0x101   : > { %v1870_v34 = vpop.f32.mrf.mxu1 }
 0x102   : > { %v607_v35 = vpop.f32.mrf.mxu0 }
 0x103   : > { %v507_v36 = vpop.f32.mrf.mxu1  ;;  %v638_v37 = vadd.f32 %v607_v35, %v500_v27 }
 0x104   : > { %v508_v38 = vadd.f32 %v507_v36, %v416_v13  ;;  %v1889_v39 = vpop.f32.mrf.mxu0 }
 0x105   : > { %v1871_v41 = vpop.f32.mrf.mxu1 }
 0x106   : > { %v612_v42 = vpop.f32.mrf.mxu0 }
 0x107   : > { %v512_v43 = vpop.f32.mrf.mxu1  ;;  %v639_v44 = vadd.f32 %v612_v42, %v505_v40 }
 0x108   : > { %v513_v45 = vadd.f32 %v512_v43, %v2396_v57  ;;  %v1892_v46 = vpop.f32.mrf.mxu0 }
 0x109   : > { %v1874_v47 = vpop.f32.mrf.mxu1 }
 0x10a   : > { %v615_v48 = vpop.f32.mrf.mxu0 }
 0x10b   : > { %v515_v49 = vpop.f32.mrf.mxu1  ;;  %v640_v50 = vadd.f32 %v615_v48, %v508_v38 }
 0x10c   : > { %v516_v51 = vadd.f32 %v515_v49, %v2398_v61  ;;  %v1893_v52 = vpop.f32.mrf.mxu0 }
 0x10d   : > { %v1875_v53 = vpop.f32.mrf.mxu1 }
 0x10e   : > { %v620_v54 = vpop.f32.mrf.mxu0 }
 0x10f   : > { %v520_v55 = vpop.f32.mrf.mxu1  ;;  %v641_v56 = vadd.f32 %v620_v54, %v513_v45 }
 0x110   : > { %v521_v58 = vadd.f32 %v520_v55, %v2400_v2  ;;  %v1896_v59 = vpop.f32.mrf.mxu0 }
 0x111   : > { %v1878_v60 = vpop.f32.mrf.mxu1 }
 0x112   : > { %v623_v62 = vpop.f32.mrf.mxu0 }
 0x113   : > { %v523_v63 = vpop.f32.mrf.mxu1  ;;  %v642_v0 = vadd.f32 %v623_v62, %v516_v51 }
 0x114   : > { %v524_v57 = vadd.f32 %v523_v63, %v2402_v5  ;;  %v1897_v1 = vpop.f32.mrf.mxu0 }
 0x115   : > { %v1879_v3 = vpop.f32.mrf.mxu1 }
 0x116   : > { %v628_v4 = vpop.f32.mrf.mxu0 }
 0x117   : > { %v643_v6 = vadd.f32 %v628_v4, %v521_v58  ;;  %v714_v7 = vpop.f32.mrf.mxu1 }
 0x118   : > { %v753_v61 = vadd.f32 %v714_v7, %v635_v20  ;;  %v1900_v8 = vpop.f32.mrf.mxu0 }
 0x119   : > { %v1906_v9 = vpop.f32.mrf.mxu1 }
 0x11a   : > { %v631_v10 = vpop.f32.mrf.mxu0 }
 0x11b   : > { %v644_v11 = vadd.f32 %v631_v10, %v524_v57  ;;  %v717_v12 = vpop.f32.mrf.mxu1 }
 0x11c   : > { %v754_v13 = vadd.f32 %v717_v12, %v636_v26  ;;  %v1901_v2 = vpop.f32.mrf.mxu0 }
 0x11d   : > { %v1907_v14 = vpop.f32.mrf.mxu1 }
 0x11e   : > { %v832_v15 = vpop.f32.mrf.mxu0 }
 0x11f   : > { %v722_v16 = vpop.f32.mrf.mxu1  ;;  %v2447_v17 = vadd.f32 %v832_v15, %v753_v61 }
 0x120   : > { %v755_v18 = vadd.f32 %v722_v16, %v637_v32  ;;  %v1928_v5 = vpop.f32.mrf.mxu0 }
 0x121   : > { %v1910_v19 = vpop.f32.mrf.mxu1 }
 0x122   : > { %v835_v21 = vpop.f32.mrf.mxu0 }
 0x123   : > { %v725_v22 = vpop.f32.mrf.mxu1  ;;  %v2449_v23 = vadd.f32 %v835_v21, %v754_v13 }
 0x124   : > { %v756_v20 = vadd.f32 %v725_v22, %v638_v37  ;;  %v1929_v24 = vpop.f32.mrf.mxu0 }
 0x125   : > { %v1911_v25 = vpop.f32.mrf.mxu1 }
 0x126   : > { %v840_v27 = vpop.f32.mrf.mxu0 }
 0x127   : > { %v730_v28 = vpop.f32.mrf.mxu1  ;;  %v2451_v29 = vadd.f32 %v840_v27, %v755_v18 }
 0x128   : > { %v757_v26 = vadd.f32 %v730_v28, %v639_v44  ;;  %v1932_v30 = vpop.f32.mrf.mxu0 }
 0x129   : > { %v1914_v31 = vpop.f32.mrf.mxu1 }
 0x12a   : > { %v843_v40 = vpop.f32.mrf.mxu0 }
 0x12b   : > { %v733_v33 = vpop.f32.mrf.mxu1  ;;  %v2453_v34 = vadd.f32 %v843_v40, %v756_v20 }
 0x12c   : > { %v758_v32 = vadd.f32 %v733_v33, %v640_v50  ;;  %v1933_v35 = vpop.f32.mrf.mxu0 }
 0x12d   : > { %v1915_v36 = vpop.f32.mrf.mxu1 }
 0x12e   : > { %v848_v38 = vpop.f32.mrf.mxu0 }
 0x12f   : > { %v738_v39 = vpop.f32.mrf.mxu1  ;;  %v2455_v41 = vadd.f32 %v848_v38, %v757_v26 }
 0x130   : > { %v759_v37 = vadd.f32 %v738_v39, %v641_v56  ;;  %v1936_v42 = vpop.f32.mrf.mxu0 }
 0x131   : > { %v1918_v43 = vpop.f32.mrf.mxu1 }
 0x132   : > { %v851_v45 = vpop.f32.mrf.mxu0 }
 0x133   : > { %v741_v46 = vpop.f32.mrf.mxu1  ;;  %v2457_v47 = vadd.f32 %v851_v45, %v758_v32 }
 0x134   : > { %v760_v44 = vadd.f32 %v741_v46, %v642_v0  ;;  %v1937_v48 = vpop.f32.mrf.mxu0 }
 0x135   : > { %v1919_v49 = vpop.f32.mrf.mxu1 }
 0x136   : > { %v856_v51 = vpop.f32.mrf.mxu0 }
 0x137   : > { %v746_v52 = vpop.f32.mrf.mxu1  ;;  %v2459_v53 = vadd.f32 %v856_v51, %v759_v37 }
 0x138   : > { %v761_v50 = vadd.f32 %v746_v52, %v643_v6  ;;  %v1940_v54 = vpop.f32.mrf.mxu0 }
 0x139   : > { %v1922_v55 = vpop.f32.mrf.mxu1 }
 0x13a   : > { %v859_v58 = vpop.f32.mrf.mxu0 }
 0x13b   : > { %v749_v59 = vpop.f32.mrf.mxu1  ;;  %v2461_v60 = vadd.f32 %v859_v58, %v760_v44  ;;  %v1415_v58 = vpop.permute.xlu0 %1414 }
 0x13c   : > { %v762_v56 = vadd.f32 %v749_v59, %v644_v11  ;;  %v1941_v62 = vpop.f32.mrf.mxu0  ;;  %vm1443_vm2 = vcmp.eq.s32.totalorder %v1415_v58, 1 }
 0x13d   : > { %v1923_v63 = vpop.f32.mrf.mxu1 }
 0x13e   : > { %v864_v57 = vpop.f32.mrf.mxu0 }
 0x13f   : > { %v2463_v1 = vadd.f32 %v864_v57, %v761_v50  ;;  %v950_v0 = vpop.f32.mrf.mxu1  ;;  %v1777_v50 = vld [vmem:[%s2497_s23 + $0x8] sm:$0xff]  }
 0x140   : > { %v1944_v3 = vpop.f32.mrf.mxu0  ;;  %v989_v49 = vadd.f32 %v950_v0, %v2447_v17  ;;  %v1754_v57 = vunpack.c.l.bf16 %v1777_v50 }
 0x141   : > { %v1950_v4 = vpop.f32.mrf.mxu1 }
 0x142   : > { %v867_v7 = vpop.f32.mrf.mxu0 }
 0x143   : > { %v2465_v61 = vadd.f32 %v867_v7, %v762_v56  ;;  %v953_v8 = vpop.f32.mrf.mxu1 }
 0x144   : > { %v1945_v6 = vpop.f32.mrf.mxu0  ;;  %v990_v56 = vadd.f32 %v953_v8, %v2449_v23  ;;  %v1778_v23 = vld [vmem:[%s2497_s23 + $0x10] sm:$0xff]  }
 0x145   : > { %v1951_v9 = vpop.f32.mrf.mxu1 }
 0x146   : > { %v1068_v10 = vpop.f32.mrf.mxu0 }
 0x147   : > { %v958_v12 = vpop.f32.mrf.mxu1  ;;  %v1107_v54 = vadd.f32 %v1068_v10, %v989_v49 }
 0x148   : > { %v1972_v13 = vpop.f32.mrf.mxu0  ;;  %v991_v17 = vadd.f32 %v958_v12, %v2451_v29 }
 0x149   : > { %v1954_v2 = vpop.f32.mrf.mxu1 }
 0x14a   : > { %v1071_v14 = vpop.f32.mrf.mxu0  ;;  %v1755_v2 = vunpack.c.h.bf16 %v1777_v50  ;;  %v1759_v50 = vunpack.c.h.bf16 %v1778_v23 }
 0x14b   : > { %v2467_v11 = vpop.f32.mrf.mxu1  ;;  %v1108_v4 = vadd.f32 %v1071_v14, %v990_v56 }
 0x14c   : > { %v1973_v15 = vpop.f32.mrf.mxu0 }
 0x14d   : > { %v1955_v16 = vpop.f32.mrf.mxu1  ;;  %v1418_v15 = vpop.permute.xlu0 %1417 }
 0x14e   : > { %v1076_v18 = vpop.f32.mrf.mxu0  ;;  %vm1444_vm3 = vcmp.eq.s32.totalorder %v1418_v15, 1 }
 0x14f   : > { %v2469_v5 = vpop.f32.mrf.mxu1  ;;  %v1109_v8 = vadd.f32 %v1076_v18, %v991_v17 }
 0x150   : > { %v1976_v19 = vpop.f32.mrf.mxu0 }
 0x151   : > { %v1958_v21 = vpop.f32.mrf.mxu1  ;;  %v1427_v17 = vpop.permute.xlu0 %1426 }
 0x152   : > { %v2471_v22 = vpop.f32.mrf.mxu0  ;;  %vm1447_vm6 = vcmp.eq.s32.totalorder %v1427_v17, 1 }
 0x153   : > { %v2473_v20 = vpop.f32.mrf.mxu1 }
 0x154   : > { %v1977_v24 = vpop.f32.mrf.mxu0 }
 0x155   : > { %v1959_v25 = vpop.f32.mrf.mxu1 }
 0x156   : > { %v2475_v27 = vpop.f32.mrf.mxu0 }
 0x157   : > { %v2477_v28 = vpop.f32.mrf.mxu1 }
 0x158   : > { %v1980_v26 = vpop.f32.mrf.mxu0 }
 0x159   : > { %v1962_v30 = vpop.f32.mrf.mxu1  ;;  %v992_v26 = vadd.f32 %v2467_v11, %v2453_v34  ;;  %v993_v34 = vadd.f32 %v2469_v5, %v2455_v41  ;;  %v994_v41 = vadd.f32 %v2473_v20, %v2457_v47  ;;  %v995_v47 = vadd.f32 %v2477_v28, %v2459_v53 }
 0x15a   : > { %v2479_v31 = vpop.f32.mrf.mxu0 }
 0x15b   : > { %v2481_v40 = vpop.f32.mrf.mxu1  ;;  %v1110_v18 = vadd.f32 %v2471_v22, %v992_v26  ;;  %v1111_v22 = vadd.f32 %v2475_v27, %v993_v34  ;;  %v1112_v27 = vadd.f32 %v2479_v31, %v994_v41 }
 0x15c   : > { %v1981_v33 = vpop.f32.mrf.mxu0  ;;  %v996_v53 = vadd.f32 %v2481_v40, %v2461_v60  ;;  %v1433_v60 = vpop.permute.xlu0 %1432 }
 0x15d   : > { %v1963_v32 = vpop.f32.mrf.mxu1  ;;  %v1421_v33 = vpop.permute.xlu1 %1420  ;;  %vm1449_vm8 = vcmp.eq.s32.totalorder %v1433_v60, 1 }
 0x15e   : > { %v2483_v35 = vpop.f32.mrf.mxu0  ;;  %v1758_v32 = vunpack.c.l.bf16 %v1778_v23  ;;  %vm1445_vm4 = vcmp.eq.s32.totalorder %v1421_v33, 1 }
 0x15f   : > { %v2485_v36 = vpop.f32.mrf.mxu1  ;;  %v1113_v31 = vadd.f32 %v2483_v35, %v995_v47 }
 0x160   : > { %v1984_v38 = vpop.f32.mrf.mxu0  ;;  %v1439_v41 = vpop.permute.xlu0 %1438 }
 0x161   : > { %v1966_v39 = vpop.f32.mrf.mxu1  ;;  %vm1451_vm10 = vcmp.eq.s32.totalorder %v1439_v41, 1 }
 0x162   : > { %v2487_v37 = vpop.f32.mrf.mxu0 }
 0x163   : > { %v2489_v42 = vpop.f32.mrf.mxu1  ;;  %v1114_v35 = vadd.f32 %v2487_v37, %v996_v53 }
 0x164   : > { %v1985_v43 = vpop.f32.mrf.mxu0 }
 0x165   : > { %v1967_v45 = vpop.f32.mrf.mxu1 }
 0x166   : > { %v2491_v46 = vpop.f32.mrf.mxu0 }
 0x167   : > { %v1186_v44 = vpop.f32.mrf.mxu1 }
 0x168   : > { %v1988_v48 = vpop.f32.mrf.mxu0  ;;  %v1225_v62 = vadd.f32 %v1186_v44, %v1107_v54 }
 0x169   : > { %v1994_v51 = vpop.f32.mrf.mxu1 }
 0x16a   : > { %v2500_v52 = vpop.f32.mrf.mxu0 }
 0x16b   : > { %v1189_v55 = vpop.f32.mrf.mxu1 }
 0x16c   : > { %v1989_v59 = vpop.f32.mrf.mxu0  ;;  %v1226_v0 = vadd.f32 %v1189_v55, %v1108_v4  ;;  %v1779_v55 = vld [vmem:[%s2497_s23 + $0x18] sm:$0xff]  }
 0x16d   : > { %v1995_v63 = vpop.f32.mrf.mxu1  ;;  %v1424_v59 = vpop.permute.xlu1 %1423  ;;  %v1763_v23 = vunpack.c.h.bf16 %v1779_v55 }
 0x16e   : > { %v1304_v3 = vpop.f32.mrf.mxu0  ;;  %vm1446_vm5 = vcmp.eq.s32.totalorder %v1424_v59, 1 }
 0x16f   : > { %v1194_v7 = vpop.f32.mrf.mxu1  ;;  %v1343_v6 = vadd.f32 %v1304_v3, %v1225_v62 }
 0x170   : > { %v2016_v9 = vpop.f32.mrf.mxu0  ;;  %v1227_v30 = vadd.f32 %v1194_v7, %v1109_v8  ;;  %v1762_v7 = vunpack.c.l.bf16 %v1779_v55 }
 0x171   : > { %v1373_v13 = vadd.f32 %v1754_v57, %v1343_v6  ;;  %v1998_v10 = vpop.f32.mrf.mxu1 }
 0x172   : > { %v1307_v16 = vpop.f32.mrf.mxu0 }
 0x173   : > { %v1453_v19 = vsel %vm1443_vm2, %v1373_v13, 0.0  ;;  %v1197_v21 = vpop.f32.mrf.mxu1  ;;  %v1344_v24 = vadd.f32 %v1307_v16, %v1226_v0 }
 0x174   : > { %v1718_v25 = vpack.c.bf16 %v1453_v19, %v1453_v19  ;;  %v2017_v14 = vpop.f32.mrf.mxu0  ;;  %v1228_v11 = vadd.f32 %v1197_v21, %v1110_v18  ;;  %v1780_v19 = vld [vmem:[%s2497_s23 + $0x20] sm:$0xff]   ;;  %v1430_v21 = vpop.permute.xlu1 %1429 }
 0x175   : > { %v1374_v29 = vadd.f32 %v1755_v2, %v1344_v24  ;;  %v1999_v12 = vpop.f32.mrf.mxu1  ;;  %vm1448_vm7 = vcmp.eq.s32.totalorder %v1430_v21, 1  ;;  %v1766_v33 = vunpack.c.l.bf16 %v1780_v19 }
 0x176   : > { %1523 = vst.msk [vmem:[%s2160_s27 + $0x8] sm:$0xf] %vm1463_vm1, %v1718_v25  ;;  %v1312_v38 = vpop.f32.mrf.mxu0 }
 0x177   : > { %v1454_v39 = vsel %vm1444_vm3, %v1374_v29, 0.0  ;;  %v1202_v43 = vpop.f32.mrf.mxu1  ;;  %v1345_v45 = vadd.f32 %v1312_v38, %v1227_v30 }
 0x178   : > { %v1719_v44 = vpack.c.bf16 %v1454_v39, %v1454_v39  ;;  %v2020_v48 = vpop.f32.mrf.mxu0  ;;  %v1229_v5 = vadd.f32 %v1202_v43, %v1111_v22 }
 0x179   : > { %v1375_v49 = vadd.f32 %v1758_v32, %v1345_v45  ;;  %v2002_v51 = vpop.f32.mrf.mxu1 }
 0x17a   : > { %1524 = vst.msk [vmem:[%s2160_s27 + $0xc] sm:$0xf] %vm1463_vm1, %v1719_v44  ;;  %v1315_v54 = vpop.f32.mrf.mxu0  ;;  %v997_v44 = vadd.f32 %v2485_v36, %v2463_v1  ;;  %v1781_v51 = vld [vmem:[%s2497_s23 + $0x28] sm:$0xff]   ;;  %v998_v1 = vadd.f32 %v2489_v42, %v2465_v61  ;;  %v1436_v36 = vpop.permute.xlu1 %1435 }
 0x17b   : > { %v1455_v58 = vsel %vm1445_vm4, %v1375_v49, 0.0  ;;  %v1205_v56 = vpop.f32.mrf.mxu1  ;;  %v1346_v62 = vadd.f32 %v1315_v54, %v1228_v11  ;;  %v1767_v11 = vunpack.c.h.bf16 %v1780_v19  ;;  %vm1450_vm9 = vcmp.eq.s32.totalorder %v1436_v36, 1 }
 0x17c   : > { %v1720_v63 = vpack.c.bf16 %v1455_v58, %v1455_v58  ;;  %v2021_v57 = vpop.f32.mrf.mxu0  ;;  %v1230_v20 = vadd.f32 %v1205_v56, %v1112_v27  ;;  %v1115_v37 = vadd.f32 %v2491_v46, %v997_v44  ;;  %v1116_v46 = vadd.f32 %v2500_v52, %v998_v1 }
 0x17d   : > { %v1376_v3 = vadd.f32 %v1759_v50, %v1346_v62  ;;  %v2003_v4 = vpop.f32.mrf.mxu1  ;;  %v1771_v42 = vunpack.c.h.bf16 %v1781_v51 }
 0x17e   : > { %1525 = vst.msk [vmem:[%s2160_s27 + $0x10] sm:$0xf] %vm1463_vm1, %v1720_v63  ;;  %v1320_v6 = vpop.f32.mrf.mxu0  ;;  %v1770_v63 = vunpack.c.l.bf16 %v1781_v51 }
 0x17f   : > { %v1456_v9 = vsel %vm1446_vm5, %v1376_v3, 0.0  ;;  %v1210_v0 = vpop.f32.mrf.mxu1  ;;  %v1347_v13 = vadd.f32 %v1320_v6, %v1229_v5 }
 0x180   : > { %v1721_v10 = vpack.c.bf16 %v1456_v9, %v1456_v9  ;;  %v2024_v2 = vpop.f32.mrf.mxu0  ;;  %v1231_v28 = vadd.f32 %v1210_v0, %v1113_v31  ;;  %v1442_v9 = vpop.permute.xlu1 %1441 }
 0x181   : > { %v1377_v15 = vadd.f32 %v1762_v7, %v1347_v13  ;;  %v2006_v16 = vpop.f32.mrf.mxu1  ;;  %vm1452_vm11 = vcmp.eq.s32.totalorder %v1442_v9, 1 }
 0x182   : > { %1526 = vst.msk [vmem:[%s2160_s27 + $0x14] sm:$0xf] %vm1463_vm1, %v1721_v10  ;;  %v1323_v8 = vpop.f32.mrf.mxu0 }
 0x183   : > { %v1457_v24 = vsel %vm1447_vm6, %v1377_v15, 0.0  ;;  %v1213_v25 = vpop.f32.mrf.mxu1  ;;  %v1348_v14 = vadd.f32 %v1323_v8, %v1230_v20 }
 0x184   : > { %v1722_v26 = vpack.c.bf16 %v1457_v24, %v1457_v24  ;;  %v2025_v30 = vpop.f32.mrf.mxu0  ;;  %v1232_v40 = vadd.f32 %v1213_v25, %v1114_v35 }
 0x185   : > { %v1378_v29 = vadd.f32 %v1763_v23, %v1348_v14  ;;  %v2007_v12 = vpop.f32.mrf.mxu1 }
 0x186   : > { %1527 = vst.msk [vmem:[%s2160_s27 + $0x18] sm:$0xf] %vm1463_vm1, %v1722_v26  ;;  %v1328_v32 = vpop.f32.mrf.mxu0 }
 0x187   : > { %v1458_v38 = vsel %vm1448_vm7, %v1378_v29, 0.0  ;;  %v1218_v18 = vpop.f32.mrf.mxu1  ;;  %v1349_v39 = vadd.f32 %v1328_v32, %v1231_v28 }
 0x188   : > { %v1723_v43 = vpack.c.bf16 %v1458_v38, %v1458_v38  ;;  %v2028_v45 = vpop.f32.mrf.mxu0  ;;  %v1233_v59 = vadd.f32 %v1218_v18, %v1115_v37 }
 0x189   : > { %v1379_v48 = vadd.f32 %v1766_v33, %v1349_v39  ;;  %v2010_v34 = vpop.f32.mrf.mxu1 }
 0x18a   : > { %1528 = vst.msk [vmem:[%s2160_s27 + $0x1c] sm:$0xf] %vm1463_vm1, %v1723_v43  ;;  %v1331_v49 = vpop.f32.mrf.mxu0 }
 0x18b   : > { %v1459_v50 = vsel %vm1449_vm8, %v1379_v48, 0.0  ;;  %v1221_v54 = vpop.f32.mrf.mxu1  ;;  %v1350_v55 = vadd.f32 %v1331_v49, %v1232_v40 }
 0x18c   : > { %v1724_v22 = vpack.c.bf16 %v1459_v50, %v1459_v50  ;;  %v2029_v58 = vpop.f32.mrf.mxu0  ;;  %v1234_v6 = vadd.f32 %v1221_v54, %v1116_v46 }
 0x18d   : > { %v1380_v56 = vadd.f32 %v1767_v11, %v1350_v55  ;;  %v2011_v62 = vpop.f32.mrf.mxu1 }
 0x18e   : > { %1529 = vst.msk [vmem:[%s2160_s27 + $0x20] sm:$0xf] %vm1463_vm1, %v1724_v22  ;;  %v1336_v57 = vpop.f32.mrf.mxu0 }
 0x18f   : > { %v1460_v5 = vsel %vm1450_vm9, %v1380_v56, 0.0  ;;  %v1351_v3 = vadd.f32 %v1336_v57, %v1233_v59 }
 0x190   : > { %v1725_v4 = vpack.c.bf16 %v1460_v5, %v1460_v5  ;;  %v2032_v7 = vpop.f32.mrf.mxu0 }
 0x191   : > { %v1381_v61 = vadd.f32 %v1770_v63, %v1351_v3 }
 0x192   : > { %1530 = vst.msk [vmem:[%s2160_s27 + $0x24] sm:$0xf] %vm1463_vm1, %v1725_v4  ;;  %v1339_v27 = vpop.f32.mrf.mxu0 }
 0x193   : > { %v1461_v17 = vsel %vm1451_vm10, %v1381_v61, 0.0  ;;  %v1352_v0 = vadd.f32 %v1339_v27, %v1234_v6 }
 0x194   : > { %v1726_v13 = vpack.c.bf16 %v1461_v17, %v1461_v17  ;;  %v2033_v10 = vpop.f32.mrf.mxu0 }
 0x195   : > { %v1382_v52 = vadd.f32 %v1771_v42, %v1352_v0 }
 0x196   : > { %1531 = vst.msk [vmem:[%s2160_s27 + $0x28] sm:$0xf] %vm1463_vm1, %v1726_v13 }
 0x197   : > { %v1462_v2 = vsel %vm1452_vm11, %v1382_v52, 0.0 }
 0x198   : > { %v1727_v47 = vpack.c.bf16 %v1462_v2, %v1462_v2 }
 0x19a   : > { %1532 = vst.msk [vmem:[%s2160_s27 + $0x2c] sm:$0xf] %vm1463_vm1, %v1727_v47 }
 0x19b PF: > { %s14_s17 = sadd.s32 1, %s2088_s17   ;;  %s2564_s15 = smov %s2084_s16 }
 0x19c   : > { %p11_p5 = scmp.ge.s32.totalorder %s14_s17, 4   ;;  %s2565_s16 = smov %s2567_s18 }
 0x19e   :  { %13 = sbr.rel (!%p11_p5) target bundleno = 2 (0x2), region = 80 }

// kernel: network_block_forward.8
= control target key start
LH: loop header
LB: loop body
LE: loop exit
PB: predicated region body
PF: predicated region fallthrough
CT: control target
= control target key end

     0   :  { %s2379_s24 = smov 0   ;;  %s2381_s25 = smov 0   ;;  %s2912_s0 = inlined_call_operand.vmem [shape: bf16[2,107,8], index: 0, kind: input, shape index: {}]   ;;  %s2913_s1 = inlined_call_operand.vmem [shape: f32[107,1], index: 1, kind: input, shape index: {}]   ;;  %s2914_s2 = inlined_call_operand.vmem [shape: f32[1,8], index: 2, kind: input, shape index: {}]   ;;  %s2915_s3 = inlined_call_operand.vmem [shape: f32[1,8], index: 3, kind: input, shape index: {}]   ;;  %s2916_s4 = inlined_call_operand.vmem [shape: bf16[9,8,8], index: 4, kind: input, shape index: {}]   ;;  %s2917_s5 = inlined_call_operand.vmem [shape: f32[1,8], index: 5, kind: input, shape index: {}]   ;;  %s2918_s6 = inlined_call_operand.vmem [shape: f32[1,8], index: 6, kind: input, shape index: {}]   ;;  %s2919_s7 = inlined_call_operand.vmem [shape: bf16[2,107,8], index: 7, kind: output, shape index: {}]  }
   0x1   :  { %s2383_s26 = smov 0  }
   0x2 LB: > { %s29_s27 = sadd.s32 1, %s2330_s25  ;;  %p1917_p0 = scmp.ge.s32.totalorder %s2334_s26, 1  ;;  %s2334_s26 = sphi %s2383_s26, %s17_s26   ;;  %s2330_s25 = sphi %s2381_s25, %s2923_s25   ;;  %s2326_s24 = sphi %s2379_s24, %s2922_s24  }
   0x3   : > { %p31_p1 = scmp.ge.s32.totalorder %s29_s27, 2  ;;  %p276_p2 = scmp.lt.s32.totalorder %s2334_s26, 3 }
   0x5   : > { %s2925_s27 = smov (%p31_p1, %s29_s27), 0  ;;  %p277_p3 = pnand %p1917_p0, %p276_p2 }
   0x6   : > { %p321_p4 = scmp.lt.s32.totalorder (!%p277_p3), %s2326_s24, 1 }
   0x7   : > { %280 = sbr.rel (%p277_p3) target bundleno = 540 (0x21c), region = 48 }
   0xc   : > { %v431_v0 = vld [vmem:[%s2913_s1 + $0x10] sm:$0xff]  ;;  %v429_v1 = vld [vmem:[%s2913_s1] sm:$0xff]  ;;  %v2336_v3 = vmov 0   ;;  %v430_v4 = vld [vmem:[%s2913_s1 + $0x8] sm:$0xff]  ;;  %vm1737_vm6 = vcmask 58368   ;;  %s2927_s24 = smov (!%p321_p4, %s2326_s24), 1 }
   0xd   : > { %v435_v2 = vld [vmem:[%s2913_s1 + $0x30] sm:$0xff]  ;;  %2311 = vset.pattern.permute.xlu1 %v2336_v3  ;;  %2310 = vset.pattern.permute.xlu0 %v2336_v3  ;;  %vm445_vm0 = vcmp.gt.f32.partialorder %v431_v0, 0.5  ;;  %vm443_vm1 = vcmp.gt.f32.partialorder %v429_v1, 0.5  ;;  %vm444_vm3 = vcmp.gt.f32.partialorder %v430_v4, 0.5  ;;  %v437_v7 = vld [vmem:[%s2913_s1 + $0x40] sm:$0xff]  ;;  %v436_v8 = vld [vmem:[%s2913_s1 + $0x38] sm:$0xff] }
   0xe   : > { %vm449_vm2 = vcmp.gt.f32.partialorder %v435_v2, 0.5  ;;  %v2414_v5 = vsel %vm445_vm0, 1, %v2336_v3  ;;  %v457_v6 = vsel %vm443_vm1, 1, %v2336_v3  ;;  %v458_v10 = vsel %vm444_vm3, 1, %v2336_v3  ;;  %v433_v11 = vld [vmem:[%s2913_s1 + $0x20] sm:$0xff]  ;;  %v432_v12 = vld [vmem:[%s2913_s1 + $0x18] sm:$0xff] }
   0xf   : > { %478 = vperm.xlu1 %2311, %v2414_v5   ;;  %472 = vperm.xlu0 %2310, %v457_v6   ;;  %v2425_v9 = vsel %vm449_vm2, 1, %v2336_v3  ;;  %vm451_vm4 = vcmp.gt.f32.partialorder %v437_v7, 0.5  ;;  %vm450_vm5 = vcmp.gt.f32.partialorder %v436_v8, 0.5  ;;  %vm1738_vm7 = vsmask.f32 1280  ;;  %v439_v15 = vld [vmem:[%s2913_s1 + $0x50] sm:$0xff] }
  0x10   : > { %v465_v13 = vsel %vm451_vm4, 1, %v2336_v3  ;;  %v464_v14 = vsel %vm450_vm5, 1, %v2336_v3  ;;  %vm447_vm8 = vcmp.gt.f32.partialorder %v433_v11, 0.5  ;;  %vm446_vm9 = vcmp.gt.f32.partialorder %v432_v12, 0.5  ;;  %v438_v16 = vld [vmem:[%s2913_s1 + $0x48] sm:$0xff]  ;;  %s2282_s29 = smul.u32 56, %s2927_s24  ;;  %vm2454_vm11 = vmand %vm1737_vm6, %vm1738_vm7 }
  0x11   : > { %v2337_v17 = vmov 0.0   ;;  %v1922_v18 = vld [vmem:[%s2916_s4 + $0x4] sm:$0xf]  ;;  %vm605_vm10 = vcmask 1043456   ;;  %v461_v21 = vsel %vm447_vm8, 1, %v2336_v3  ;;  %v460_v22 = vsel %vm446_vm9, 1, %v2336_v3 }
  0x12   : > { %2082 = vmatprep.subr.bf16.mxu0 %v2337_v17  ;;  %2280 = vmatprep.subr.bf16.mxu1 %v2337_v17  ;;  %v607_v20 = vsel %vm605_vm10, %v1922_v18, 0  ;;  %s2466_s11 = scalar_lea.vmem %s2919_s7, %s2282_s29  ;;  %vm453_vm12 = vcmp.gt.f32.partialorder %v439_v15, 0.5  ;;  %vm452_vm13 = vcmp.gt.f32.partialorder %v438_v16, 0.5  ;;  %v440_v24 = vld [vmem:[%s2913_s1 + $0x58] sm:$0xff]  ;;  %v434_v25 = vld [vmem:[%s2913_s1 + $0x28] sm:$0xff]  ;;  %vm2338_vm14 = vmmov 0   ;;  %s2503_s22 = scalar_lea.vmem %s2912_s0, %s2282_s29 }
  0x13   : > { %490 = vperm.xlu1 %2311, %v2425_v9   ;;  %475 = vperm.xlu0 %2310, %v458_v10   ;;  %v1740_v23 = vld [vmem:[%s2466_s11 + $0x34] sm:$0x3]  ;;  %v467_v27 = vsel %vm453_vm12, 1, %v2336_v3  ;;  %v466_v28 = vsel %vm452_vm13, 1, %v2336_v3  ;;  %vm454_vm15 = vcmp.gt.f32.partialorder %v440_v24, 0.5  ;;  %vm448_vm0 = vcmp.gt.f32.partialorder %v434_v25, 0.5 }
  0x14   : > { %2083 = vmatpush3.bf16.msra.mxu0 %v607_v20  ;;  %2281 = vmatpush3.bf16.msra.mxu1 %v607_v20  ;;  %v1741_v26 = vsel %vm2454_vm11, 0, %v1740_v23  ;;  %v442_v29 = vld [vmem:[%s2913_s1 + $0x68] sm:$0x7]  ;;  %v441_v30 = vld [vmem:[%s2913_s1 + $0x60] sm:$0xff]  ;;  %v468_v31 = vsel %vm454_vm15, 1, %v2336_v3  ;;  %v462_v32 = vsel %vm448_vm0, 1, %v2336_v3 }
  0x15   : > { %2126 = vmatprep.subr.bf16.mxu0 %v2337_v17  ;;  %2104 = vmatprep.subr.bf16.mxu1 %v2337_v17  ;;  %1742 = vst [vmem:[%s2466_s11 + $0x34] sm:$0x3] %v1741_v26  ;;  %vm456_vm1 = vcmp.gt.f32.partialorder %v442_v29, 0.5  ;;  %vm455_vm2 = vcmp.gt.f32.partialorder %v441_v30, 0.5  ;;  %v2023_v35 = vld [vmem:[%s2503_s22 + $0x8] sm:$0xff]   ;;  %v2000_v36 = vld [vmem:[%s2503_s22] sm:$0xff]  }
  0x16   : > { %2084 = vmatprep.mubr.msk.bf16.mxu0 %vm2338_vm14, %v2337_v17  ;;  %2096 = vmatprep.mubr.msk.bf16.mxu1 %vm2338_vm14, %v2337_v17  ;;  %v470_v33 = vsel %vm456_vm1, 1, %v2336_v3  ;;  %v469_v34 = vsel %vm455_vm2, 1, %v2336_v3  ;;  %v2005_v37 = vunpack.c.l.bf16 %v2023_v35  ;;  %v2001_v38 = vunpack.c.l.bf16 %v2000_v36  ;;  %v2510_v39 = vld [vmem:[%s2914_s2] ss:$0 sm:$0xff]  ;;  %v2025_v40 = vld [vmem:[%s2503_s22 + $0x18] sm:$0xff]   ;;  %v2024_v50 = vld [vmem:[%s2503_s22 + $0x10] sm:$0xff]  }
  0x17   : > { %496 = vperm.xlu1 %2311, %v465_v13   ;;  %493 = vperm.xlu0 %2310, %v464_v14   ;;  %v2002_v41 = vunpack.c.h.bf16 %v2000_v36  ;;  %v2026_v42 = vld [vmem:[%s2503_s22 + $0x20] sm:$0xff]   ;;  %v2013_v45 = vunpack.c.l.bf16 %v2025_v40  ;;  %v2014_v49 = vunpack.c.h.bf16 %v2025_v40  ;;  %v2009_v55 = vunpack.c.l.bf16 %v2024_v50  ;;  %v2027_v59 = vld [vmem:[%s2503_s22 + $0x28] sm:$0xff]   ;;  %v357_v26 = vld [vmem:[%s2503_s22 + $0x30] sm:$0xf] }
  0x18   : > { %v382_v43 = vmul.f32 %v2005_v37, %v2510_v39  ;;  %v380_v44 = vmul.f32 %v2001_v38, %v2510_v39  ;;  %v2519_v46 = vld [vmem:[%s2915_s3] ss:$0 sm:$0xff]  ;;  %v2017_v47 = vunpack.c.l.bf16 %v2026_v42  ;;  %v2006_v56 = vunpack.c.h.bf16 %v2023_v35 }
  0x19   : > { %v381_v48 = vmul.f32 %v2002_v41, %v2510_v39  ;;  %v386_v53 = vmul.f32 %v2013_v45, %v2510_v39  ;;  %v387_v58 = vmul.f32 %v2014_v49, %v2510_v39  ;;  %vm541_vm3 = vcmask 64512  }
  0x1a   : > { %v403_v51 = vadd.f32 %v2519_v46, %v382_v43  ;;  %v401_v52 = vadd.f32 %v2519_v46, %v380_v44  ;;  %v388_v54 = vmul.f32 %v2017_v47, %v2510_v39  ;;  %v384_v2 = vmul.f32 %v2009_v55, %v2510_v39  ;;  %v1933_v43 = vld [vmem:[%s2916_s4 + $0x8] sm:$0xf] }
  0x1b   : > { %484 = vperm.xlu1 %2311, %v461_v21   ;;  %481 = vperm.xlu0 %2310, %v460_v22   ;;  %v402_v57 = vadd.f32 %v2519_v46, %v381_v48  ;;  %v407_v62 = vadd.f32 %v2519_v46, %v386_v53  ;;  %v383_v4 = vmul.f32 %v2006_v56, %v2510_v39  ;;  %v2018_v11 = vunpack.c.h.bf16 %v2026_v42 }
  0x1c   : > { %v417_v60 = vmax.f32 %v403_v51, 0.0  ;;  %v415_v61 = vmax.f32 %v401_v52, 0.0  ;;  %v409_v1 = vadd.f32 %v2519_v46, %v388_v54  ;;  %v408_v7 = vadd.f32 %v2519_v46, %v387_v58  ;;  %v572_v58 = vld [vmem:[%s2916_s4] sm:$0xf] }
  0x1d   : > { %v416_v6 = vmax.f32 %v402_v57, 0.0  ;;  %v421_v10 = vmax.f32 %v407_v62, 0.0  ;;  %v405_v15 = vadd.f32 %v2519_v46, %v384_v2  ;;  %v404_v16 = vadd.f32 %v2519_v46, %v383_v4 }
  0x1e   : > { %v2022_v19 = vunpack.c.h.bf16 %v2027_v59  ;;  %v2010_v20 = vunpack.c.h.bf16 %v2024_v50  ;;  %v422_v24 = vmax.f32 %v408_v7, 0.0  ;;  %v389_v25 = vmul.f32 %v2018_v11, %v2510_v39 }
  0x1f   : > { %502 = vperm.xlu1 %2311, %v467_v27   ;;  %499 = vperm.xlu0 %2310, %v466_v28   ;;  %v419_v29 = vmax.f32 %v405_v15, 0.0  ;;  %v418_v30 = vmax.f32 %v404_v16, 0.0  ;;  %v371_v38 = vunpack.c.l.bf16 %v357_v26  ;;  %v806_v55 = vsel %vm605_vm10, %v1933_v43, 0  ;;  %v1939_v26 = vld [vmem:[%s2916_s4 + $0xc] sm:$0xf] }
  0x20   : > { %v410_v37 = vadd.f32 %v2519_v46, %v389_v25  ;;  %v698_v4 = vsel %vm605_vm10, %v572_v58, 0  ;;  %vm555_vm2 = vcmask 59392  }
  0x21   : > { %v392_v53 = vmul.f32 %v2510_v39, %v371_v38 }
  0x22   : > { %v424_v50 = vmax.f32 %v410_v37, 0.0 }
  0x23   : > { %505 = vperm.xlu1 %2311, %v468_v31   ;;  %487 = vperm.xlu0 %2310, %v462_v32  }
  0x27   : > { %511 = vperm.xlu1 %2311, %v470_v33   ;;  %508 = vperm.xlu0 %2310, %v469_v34   ;;  %v391_v33 = vmul.f32 %v2022_v19, %v2510_v39  ;;  %v385_v34 = vmul.f32 %v2010_v20, %v2510_v39 }
  0x29   : > { %v412_v45 = vadd.f32 %v2519_v46, %v391_v33  ;;  %v406_v47 = vadd.f32 %v2519_v46, %v385_v34 }
  0x2b   : > { %1677 = vperm.xlu1 %2311, %v460_v22   ;;  %1674 = vperm.xlu0 %2310, %v2414_v5   ;;  %v2021_v5 = vunpack.c.l.bf16 %v2027_v59  ;;  %v426_v59 = vmax.f32 %v412_v45, 0.0  ;;  %v420_v62 = vmax.f32 %v406_v47, 0.0 }
  0x2d   : > { %v390_v18 = vmul.f32 %v2021_v5, %v2510_v39 }
  0x2f   : > { %1683 = vperm.xlu1 %2311, %v462_v32   ;;  %1680 = vperm.xlu0 %2310, %v461_v21   ;;  %v358_v21 = vld [vmem:[%s2503_s22 + $0x34] sm:$0x3] }
  0x30   : > { %v372_v32 = vunpack.c.l.bf16 %v358_v21 }
  0x32   : > { %v393_v44 = vmul.f32 %v2510_v39, %v372_v32 }
  0x33   : > { %1689 = vperm.xlu1 %2311, %v464_v14   ;;  %1686 = vperm.xlu0 %2310, %v2425_v9   ;;  %v423_v14 = vmax.f32 %v409_v1, 0.0  ;;  %v413_v1 = vadd.f32 %v2519_v46, %v392_v53 }
  0x34   : > { %v414_v39 = vadd.f32 %v2519_v46, %v393_v44 }
  0x37   : > { %1695 = vperm.xlu1 %2311, %v466_v28   ;;  %1692 = vperm.xlu0 %2310, %v465_v13  }
  0x3b   : > { %1701 = vperm.xlu1 %2311, %v468_v31   ;;  %1698 = vperm.xlu0 %2310, %v467_v27   ;;  %v411_v31 = vadd.f32 %v2519_v46, %v390_v18 }
  0x3d   : > { %v425_v42 = vmax.f32 %v411_v31, 0.0  ;;  %v1945_v31 = vld [vmem:[%s2916_s4 + $0x10] sm:$0xf] }
  0x3e   : > { %v1042_v33 = vsel %vm605_vm10, %v1945_v31, 0 }
  0x8a   : > { %v479_v63 = vpop.permute.xlu1 %478  ;;  %v473_v0 = vpop.permute.xlu0 %472 }
  0x8b   : > { %vm515_vm4 = vcmp.eq.s32.totalorder %v479_v63, 1  ;;  %vm513_vm5 = vcmp.eq.s32.totalorder %v473_v0, 1 }
  0x8c   : > { %v529_v8 = vsel %vm515_vm4, %v417_v60, 0.0  ;;  %v527_v9 = vsel %vm513_vm5, %v415_v61, 0.0 }
  0x8d   : > { %544 = vst.msk [vmem:[#allocation2 + $0x10] sm:$0xff] %vm541_vm3, %v529_v8  ;;  %542 = vst.msk [vmem:[#allocation2] sm:$0xff] %vm541_vm3, %v527_v9  ;;  %v428_v8 = vmax.f32 %v414_v39, 0.0  ;;  %v427_v9 = vmax.f32 %v413_v1, 0.0  ;;  %v1951_v39 = vld [vmem:[%s2916_s4 + $0x14] sm:$0xf] }
  0x8e   : > { %v491_v12 = vpop.permute.xlu1 %490  ;;  %v476_v13 = vpop.permute.xlu0 %475 }
  0x8f   : > { %vm519_vm6 = vcmp.eq.s32.totalorder %v491_v12, 1  ;;  %vm514_vm7 = vcmp.eq.s32.totalorder %v476_v13, 1 }
  0x90   : > { %v533_v22 = vsel %vm519_vm6, %v421_v10, 0.0  ;;  %v528_v23 = vsel %vm514_vm7, %v416_v6, 0.0 }
  0x91   : > { %548 = vst.msk [vmem:[#allocation2 + $0x30] sm:$0xff] %vm541_vm3, %v533_v22  ;;  %543 = vst.msk [vmem:[#allocation2 + $0x8] sm:$0xff] %vm541_vm3, %v528_v23 }
  0x92   : > { %v497_v27 = vpop.permute.xlu1 %496  ;;  %v494_v28 = vpop.permute.xlu0 %493 }
  0x93   : > { %vm521_vm8 = vcmp.eq.s32.totalorder %v497_v27, 1  ;;  %vm520_vm9 = vcmp.eq.s32.totalorder %v494_v28, 1  ;;  %v924_v28 = vsel %vm605_vm10, %v1939_v26, 0 }
  0x94   : > { %v535_v35 = vsel %vm521_vm8, %v423_v14, 0.0  ;;  %v534_v36 = vsel %vm520_vm9, %v422_v24, 0.0 }
  0x95   : > { %550 = vst.msk [vmem:[#allocation2 + $0x40] sm:$0xff] %vm541_vm3, %v535_v35  ;;  %549 = vst.msk [vmem:[#allocation2 + $0x38] sm:$0xff] %vm541_vm3, %v534_v36 }
  0x96   : > { %v485_v40 = vpop.permute.xlu1 %484  ;;  %v482_v41 = vpop.permute.xlu0 %481 }
  0x97   : > { %vm517_vm11 = vcmp.eq.s32.totalorder %v485_v40, 1  ;;  %vm516_vm12 = vcmp.eq.s32.totalorder %v482_v41, 1 }
  0x98   : > { %v531_v48 = vsel %vm517_vm11, %v419_v29, 0.0  ;;  %v530_v49 = vsel %vm516_vm12, %v418_v30, 0.0  ;;  %v573_v51 = vld [vmem:[#allocation2 + $0x6] sm:$0xff]  ;;  %v574_v52 = vld [vmem:[#allocation2 + $0xe] sm:$0xff] }
  0x99   : > { %546 = vst.msk [vmem:[#allocation2 + $0x20] sm:$0xff] %vm541_vm3, %v531_v48  ;;  %545 = vst.msk [vmem:[#allocation2 + $0x18] sm:$0xff] %vm541_vm3, %v530_v49  ;;  %v583_v54 = vpack.c.bf16 %v574_v52, %v573_v51  ;;  %v557_v24 = vld [vmem:[#allocation2 + $0x5] sm:$0xff]  ;;  %v558_v25 = vld [vmem:[#allocation2 + $0xd] sm:$0xff] }
  0x9a   : > { %v503_v56 = vpop.permute.xlu1 %502  ;;  %v500_v57 = vpop.permute.xlu0 %499  ;;  %v567_v27 = vpack.c.bf16 %v558_v25, %v557_v24  ;;  %v773_v29 = vld [vmem:[#allocation2 + $0x7] sm:$0xff]  ;;  %v774_v30 = vld [vmem:[#allocation2 + $0xf] sm:$0xff] }
  0x9b   : > { %vm523_vm13 = vcmp.eq.s32.totalorder %v503_v56, 1  ;;  %vm522_vm15 = vcmp.eq.s32.totalorder %v500_v57, 1  ;;  %2085 = vmatmul.mubr.msk.bf16.vlgmr.msra.gmra.mxu0 %vm541_vm3, %v583_v54  ;;  %v783_v32 = vpack.c.bf16 %v774_v30, %v773_v29 }
  0x9c   : > { %v537_v60 = vsel %vm523_vm13, %v425_v42, 0.0  ;;  %v536_v61 = vsel %vm522_vm15, %v424_v50, 0.0  ;;  %2127 = vmatpush3.bf16.msra.mxu0 %v806_v55  ;;  %v579_v63 = vld [vmem:[#allocation2 + $0x36] sm:$0xff]  ;;  %v580_v0 = vld [vmem:[#allocation2 + $0x3e] sm:$0xff]  ;;  %2088 = vmatprep.mubr.msk.bf16.mxu0 %vm2338_vm14, %v2337_v17 }
  0x9d   : > { %552 = vst.msk [vmem:[#allocation2 + $0x50] sm:$0xff] %vm541_vm3, %v537_v60  ;;  %551 = vst.msk [vmem:[#allocation2 + $0x48] sm:$0xff] %vm541_vm3, %v536_v61  ;;  %v586_v2 = vpack.c.bf16 %v580_v0, %v579_v63  ;;  %2170 = vmatprep.subr.bf16.mxu0 %v2337_v17  ;;  %v563_v48 = vld [vmem:[#allocation2 + $0x35] sm:$0xff]  ;;  %v564_v49 = vld [vmem:[#allocation2 + $0x3d] sm:$0xff]  ;;  %v1160_v61 = vsel %vm605_vm10, %v1951_v39, 0 }
  0x9e   : > { %v506_v5 = vpop.permute.xlu1 %505  ;;  %v488_v6 = vpop.permute.xlu0 %487  ;;  %v570_v50 = vpack.c.bf16 %v564_v49, %v563_v48  ;;  %v779_v51 = vld [vmem:[#allocation2 + $0x37] sm:$0xff]  ;;  %v780_v52 = vld [vmem:[#allocation2 + $0x3f] sm:$0xff] }
  0x9f   : > { %vm524_vm0 = vcmp.eq.s32.totalorder %v506_v5, 1  ;;  %vm518_vm1 = vcmp.eq.s32.totalorder %v488_v6, 1  ;;  %2097 = vmatmul.mubr.msk.bf16.vlgmr.msra.gmra.mxu1 %vm541_vm3, %v586_v2  ;;  %v786_v53 = vpack.c.bf16 %v780_v52, %v779_v51  ;;  %v1957_v63 = vld [vmem:[%s2916_s4 + $0x18] sm:$0xf]  ;;  %v1009_v0 = vld [vmem:[#allocation2 + $0x10] sm:$0xff] }
  0xa0   : > { %v538_v7 = vsel %vm524_vm0, %v426_v59, 0.0  ;;  %v532_v46 = vsel %vm518_vm1, %v420_v62, 0.0  ;;  %2105 = vmatpush3.bf16.msra.mxu1 %v698_v4  ;;  %v575_v10 = vld [vmem:[#allocation2 + $0x16] sm:$0xff]  ;;  %v576_v11 = vld [vmem:[#allocation2 + $0x1e] sm:$0xff]  ;;  %2100 = vmatprep.mubr.msk.bf16.mxu1 %vm2338_vm14, %v2337_v17  ;;  %v1278_v2 = vsel %vm605_vm10, %v1957_v63, 0 }
  0xa1   : > { %553 = vst.msk [vmem:[#allocation2 + $0x58] sm:$0xff] %vm541_vm3, %v538_v7  ;;  %547 = vst.msk [vmem:[#allocation2 + $0x28] sm:$0xff] %vm541_vm3, %v532_v46  ;;  %v584_v12 = vpack.c.bf16 %v576_v11, %v575_v10  ;;  %2148 = vmatprep.subr.bf16.mxu1 %v2337_v17  ;;  %v559_v34 = vld [vmem:[#allocation2 + $0x15] sm:$0xff]  ;;  %v560_v35 = vld [vmem:[#allocation2 + $0x1d] sm:$0xff] }
  0xa2   : > { %v512_v13 = vpop.permute.xlu1 %511  ;;  %v509_v14 = vpop.permute.xlu0 %508  ;;  %v568_v36 = vpack.c.bf16 %v560_v35, %v559_v34  ;;  %v775_v37 = vld [vmem:[#allocation2 + $0x17] sm:$0xff]  ;;  %v776_v38 = vld [vmem:[#allocation2 + $0x1f] sm:$0xff] }
  0xa3   : > { %vm526_vm4 = vcmp.eq.s32.totalorder %v512_v13, 1  ;;  %vm525_vm5 = vcmp.eq.s32.totalorder %v509_v14, 1  ;;  %2089 = vmatmul.mubr.msk.bf16.gmra.mxu0 %vm541_vm3, %v584_v12  ;;  %v784_v40 = vpack.c.bf16 %v776_v38, %v775_v37  ;;  %v901_v60 = vpack.c.bf16 %v775_v37, %v774_v30  ;;  %v1010_v62 = vld [vmem:[#allocation2 + $0x18] sm:$0xff]  ;;  %v1011_v6 = vld [vmem:[#allocation2 + $0x20] sm:$0xff] }
  0xa4   : > { %v540_v15 = vsel %vm526_vm4, %v428_v8, 0.0  ;;  %v539_v16 = vsel %vm525_vm5, %v427_v9, 0.0  ;;  %v581_v18 = vld [vmem:[#allocation2 + $0x46] sm:$0xff]  ;;  %v582_v19 = vld [vmem:[#allocation2 + $0x4e] sm:$0xff]  ;;  %2092 = vmatprep.mubr.msk.bf16.mxu0 %vm2338_vm14, %v2337_v17  ;;  %v1019_v1 = vpack.c.bf16 %v1010_v62, %v1009_v0  ;;  %v1014_v8 = vld [vmem:[#allocation2 + $0x38] sm:$0xff] }
  0xa5   : > { %556 = vst.msk [vmem:[#allocation2 + $0x68] sm:$0x7] %vm555_vm2, %v540_v15  ;;  %v587_v20 = vpack.c.bf16 %v582_v19, %v581_v18  ;;  %v565_v54 = vld [vmem:[#allocation2 + $0x45] sm:$0xff]  ;;  %v566_v55 = vld [vmem:[#allocation2 + $0x4d] sm:$0xff]  ;;  %v1132_v34 = vld [vmem:[#allocation2 + $0x39] sm:$0xff] }
  0xa6   : > { %554 = vst.msk [vmem:[#allocation2 + $0x60] sm:$0xff] %vm541_vm3, %v539_v16  ;;  %v571_v56 = vpack.c.bf16 %v566_v55, %v565_v54  ;;  %v781_v57 = vld [vmem:[#allocation2 + $0x47] sm:$0xff]  ;;  %v782_v58 = vld [vmem:[#allocation2 + $0x4f] sm:$0xff]  ;;  %v1363_v49 = vld [vmem:[#allocation2 + $0x1a] sm:$0xff] }
  0xa7   : > { %2101 = vmatmul.mubr.msk.bf16.gmra.mxu1 %vm541_vm3, %v587_v20  ;;  %v787_v59 = vpack.c.bf16 %v782_v58, %v781_v57  ;;  %v1013_v9 = vld [vmem:[#allocation2 + $0x30] sm:$0xff]  ;;  %v904_v11 = vpack.c.bf16 %v781_v57, %v780_v52  ;;  %v1016_v12 = vld [vmem:[#allocation2 + $0x48] sm:$0xff]  ;;  %v1015_v13 = vld [vmem:[#allocation2 + $0x40] sm:$0xff] }
  0xa8   : > { %v577_v21 = vld [vmem:[#allocation2 + $0x26] sm:$0xff]  ;;  %v578_v22 = vld [vmem:[#allocation2 + $0x2e] sm:$0xff]  ;;  %2106 = vmatprep.mubr.msk.bf16.mxu1 %vm2338_vm14, %v2337_v17  ;;  %v1021_v10 = vpack.c.bf16 %v1014_v8, %v1013_v9  ;;  %v1022_v14 = vpack.c.bf16 %v1016_v12, %v1015_v13  ;;  %v900_v15 = vld [vmem:[#allocation2 + $0x57] sm:$0xff] }
  0xa9   : > { %v585_v23 = vpack.c.bf16 %v578_v22, %v577_v21  ;;  %v561_v41 = vld [vmem:[#allocation2 + $0x25] sm:$0xff]  ;;  %v562_v42 = vld [vmem:[#allocation2 + $0x2d] sm:$0xff]  ;;  %v905_v16 = vpack.c.bf16 %v900_v15, %v782_v58  ;;  %v1018_v18 = vld [vmem:[#allocation2 + $0x58] sm:$0xff] }
  0xaa   : > { %v569_v43 = vpack.c.bf16 %v562_v42, %v561_v41  ;;  %v777_v44 = vld [vmem:[#allocation2 + $0x27] sm:$0xff]  ;;  %v778_v45 = vld [vmem:[#allocation2 + $0x2f] sm:$0xff]  ;;  %v1128_v22 = vld [vmem:[#allocation2 + $0x19] sm:$0xff] }
  0xab   : > { %2093 = vmatmul.mubr.msk.bf16.gmra.mxu0 %vm541_vm3, %v585_v23  ;;  %v785_v47 = vpack.c.bf16 %v778_v45, %v777_v44  ;;  %v902_v4 = vpack.c.bf16 %v777_v44, %v776_v38  ;;  %v1012_v5 = vld [vmem:[#allocation2 + $0x28] sm:$0xff]  ;;  %v903_v46 = vpack.c.bf16 %v779_v51, %v778_v45  ;;  %v1017_v19 = vld [vmem:[#allocation2 + $0x50] sm:$0xff]  ;;  %v1963_v23 = vld [vmem:[%s2916_s4 + $0x1c] sm:$0xf] }
  0xac   : > { %2128 = vmatprep.mubr.msk.bf16.mxu0 %vm2338_vm14, %v2337_v17  ;;  %v1020_v7 = vpack.c.bf16 %v1012_v5, %v1011_v6  ;;  %v1023_v20 = vpack.c.bf16 %v1018_v18, %v1017_v19  ;;  %v1127_v21 = vld [vmem:[#allocation2 + $0x11] sm:$0xff]  ;;  %v1396_v25 = vsel %vm605_vm10, %v1963_v23, 0  ;;  %v1246_v26 = vld [vmem:[#allocation2 + $0x21] sm:$0xff]  ;;  %v1130_v30 = vld [vmem:[#allocation2 + $0x29] sm:$0xff] }
  0xad   : > { %v1137_v24 = vpack.c.bf16 %v1128_v22, %v1127_v21  ;;  %v1138_v31 = vpack.c.bf16 %v1130_v30, %v1246_v26  ;;  %v1134_v38 = vld [vmem:[#allocation2 + $0x49] sm:$0xff]  ;;  %v1252_v41 = vld [vmem:[#allocation2 + $0x51] sm:$0xff]  ;;  %v1254_v45 = vld [vmem:[#allocation2 + $0x61] sm:$0xff] }
  0xae   : > { %v1258_v42 = vpack.c.bf16 %v1252_v41, %v1134_v38  ;;  %v1364_v48 = vld [vmem:[#allocation2 + $0x22] sm:$0xff]  ;;  %v1365_v54 = vld [vmem:[#allocation2 + $0x2a] sm:$0xff]  ;;  %v1366_v55 = vld [vmem:[#allocation2 + $0x32] sm:$0xff] }
  0xaf   : > { %2107 = vmatmul.mubr.msk.bf16.vlgmr.msra.gmra.mxu1 %vm541_vm3, %v567_v27  ;;  %v1969_v27 = vld [vmem:[%s2916_s4 + $0x20] sm:$0xf]  ;;  %v1483_v57 = vld [vmem:[#allocation2 + $0x2b] sm:$0xff]  ;;  %v1484_v58 = vld [vmem:[#allocation2 + $0x33] sm:$0xff] }
  0xb0   : > { %2149 = vmatpush3.bf16.msra.mxu1 %v924_v28  ;;  %2110 = vmatprep.mubr.msk.bf16.mxu1 %vm2338_vm14, %v2337_v17  ;;  %v1255_v28 = vpack.c.bf16 %v1246_v26, %v1128_v22  ;;  %v1514_v29 = vsel %vm605_vm10, %v1969_v27, 0  ;;  %v1482_v51 = vld [vmem:[#allocation2 + $0x23] sm:$0xff]  ;;  %v1481_v52 = vld [vmem:[#allocation2 + $0x1b] sm:$0xff]  ;;  %v1488_v5 = vld [vmem:[#allocation2 + $0x53] sm:$0xff]  ;;  %vm1723_vm10 = vcmask 60416  }
  0xb1   : > { %2192 = vmatprep.subr.bf16.mxu1 %v2337_v17  ;;  %v1368_v39 = vld [vmem:[#allocation2 + $0x42] sm:$0xff]  ;;  %v1487_v6 = vld [vmem:[#allocation2 + $0x4b] sm:$0xff]  ;;  %1724 = vst.msk [vmem:[%s2466_s11] sm:$0xf] %vm1723_vm10, %v2336_v3  ;;  %1725 = vst.msk [vmem:[%s2466_s11 + $0x4] sm:$0xf] %vm1723_vm10, %v2336_v3 }
  0xb2   : > { %v1486_v62 = vld [vmem:[#allocation2 + $0x43] sm:$0xff]  ;;  %v1485_v63 = vld [vmem:[#allocation2 + $0x3b] sm:$0xff]  ;;  %1726 = vst.msk [vmem:[%s2466_s11 + $0x8] sm:$0xf] %vm1723_vm10, %v2336_v3  ;;  %1736 = vst.msk [vmem:[%s2466_s11 + $0x30] sm:$0xf] %vm1723_vm10, %v2336_v3 }
  0xb3   : > { %2129 = vmatmul.mubr.msk.bf16.vlgmr.msra.gmra.mxu0 %vm541_vm3, %v783_v32  ;;  %v1248_v32 = vld [vmem:[#allocation2 + $0x31] sm:$0xff]  ;;  %v1493_v0 = vpack.c.bf16 %v1486_v62, %v1485_v63  ;;  %v1372_v8 = vld [vmem:[#allocation2 + $0x62] sm:$0xff]  ;;  %1727 = vst.msk [vmem:[%s2466_s11 + $0xc] sm:$0xf] %vm1723_vm10, %v2336_v3  ;;  %1728 = vst.msk [vmem:[%s2466_s11 + $0x10] sm:$0xf] %vm1723_vm10, %v2336_v3 }
  0xb4   : > { %2171 = vmatpush3.bf16.msra.mxu0 %v1042_v33  ;;  %2132 = vmatprep.mubr.msk.bf16.mxu0 %vm2338_vm14, %v2337_v17  ;;  %v1256_v33 = vpack.c.bf16 %v1248_v32, %v1130_v30  ;;  %v1139_v35 = vpack.c.bf16 %v1132_v34, %v1248_v32  ;;  %1729 = vst.msk [vmem:[%s2466_s11 + $0x14] sm:$0xf] %vm1723_vm10, %v2336_v3  ;;  %1730 = vst.msk [vmem:[%s2466_s11 + $0x18] sm:$0xf] %vm1723_vm10, %v2336_v3 }
  0xb5   : > { %2214 = vmatprep.subr.bf16.mxu0 %v2337_v17  ;;  %1731 = vst.msk [vmem:[%s2466_s11 + $0x1c] sm:$0xf] %vm1723_vm10, %v2336_v3  ;;  %1732 = vst.msk [vmem:[%s2466_s11 + $0x20] sm:$0xf] %vm1723_vm10, %v2336_v3 }
  0xb6   : > { %1733 = vst.msk [vmem:[%s2466_s11 + $0x24] sm:$0xf] %vm1723_vm10, %v2336_v3  ;;  %1734 = vst.msk [vmem:[%s2466_s11 + $0x28] sm:$0xf] %vm1723_vm10, %v2336_v3 }
  0xb7   : > { %2111 = vmatmul.mubr.msk.bf16.gmra.mxu1 %vm541_vm3, %v568_v36  ;;  %v1250_v36 = vld [vmem:[#allocation2 + $0x41] sm:$0xff]  ;;  %1735 = vst.msk [vmem:[%s2466_s11 + $0x2c] sm:$0xf] %vm1723_vm10, %v2336_v3 }
  0xb8   : > { %2114 = vmatprep.mubr.msk.bf16.mxu1 %vm2338_vm14, %v2337_v17  ;;  %v1257_v37 = vpack.c.bf16 %v1250_v36, %v1132_v34 }
  0xbb   : > { %2133 = vmatmul.mubr.msk.bf16.gmra.mxu0 %vm541_vm3, %v784_v40  ;;  %v1140_v40 = vpack.c.bf16 %v1134_v38, %v1250_v36 }
  0xbc   : > { %2136 = vmatprep.mubr.msk.bf16.mxu0 %vm2338_vm14, %v2337_v17 }
  0xbf   : > { %2115 = vmatmul.mubr.msk.bf16.gmra.mxu1 %vm541_vm3, %v569_v43  ;;  %v1136_v43 = vld [vmem:[#allocation2 + $0x59] sm:$0xff] }
  0xc0   : > { %2118 = vmatprep.mubr.msk.bf16.mxu1 %vm2338_vm14, %v2337_v17  ;;  %v1141_v44 = vpack.c.bf16 %v1136_v43, %v1252_v41 }
  0xc3   : > { %2137 = vmatmul.mubr.msk.bf16.gmra.mxu0 %vm541_vm3, %v785_v47  ;;  %v1259_v47 = vpack.c.bf16 %v1254_v45, %v1136_v43 }
  0xc4   : > { %2140 = vmatprep.mubr.msk.bf16.mxu0 %vm2338_vm14, %v2337_v17 }
  0xc7   : > { %2119 = vmatmul.mubr.msk.bf16.gmra.mxu1 %vm541_vm3, %v570_v50  ;;  %v1373_v50 = vpack.c.bf16 %v1364_v48, %v1363_v49 }
  0xc8   : > { %2122 = vmatprep.mubr.msk.bf16.mxu1 %vm2338_vm14, %v2337_v17 }
  0xcb   : > { %2141 = vmatmul.mubr.msk.bf16.gmra.mxu0 %vm541_vm3, %v786_v53  ;;  %v1491_v53 = vpack.c.bf16 %v1482_v51, %v1481_v52 }
  0xcc   : > { %2144 = vmatprep.mubr.msk.bf16.mxu0 %vm2338_vm14, %v2337_v17 }
  0xcf   : > { %2123 = vmatmul.mubr.msk.bf16.gmra.mxu1 %vm541_vm3, %v571_v56  ;;  %v1374_v56 = vpack.c.bf16 %v1366_v55, %v1365_v54 }
  0xd0   : > { %2150 = vmatprep.mubr.msk.bf16.mxu1 %vm2338_vm14, %v2337_v17 }
  0xd3   : > { %2145 = vmatmul.mubr.msk.bf16.gmra.mxu0 %vm541_vm3, %v787_v59  ;;  %v1492_v59 = vpack.c.bf16 %v1484_v58, %v1483_v57 }
  0xd4   : > { %2172 = vmatprep.mubr.msk.bf16.mxu0 %vm2338_vm14, %v2337_v17 }
  0xd7   : > { %2151 = vmatmul.mubr.msk.bf16.vlgmr.msra.gmra.mxu1 %vm541_vm3, %v901_v60  ;;  %v1367_v60 = vld [vmem:[#allocation2 + $0x3a] sm:$0xff] }
  0xd8   : > { %2193 = vmatpush3.bf16.msra.mxu1 %v1160_v61  ;;  %2154 = vmatprep.mubr.msk.bf16.mxu1 %vm2338_vm14, %v2337_v17  ;;  %v1375_v61 = vpack.c.bf16 %v1368_v39, %v1367_v60 }
  0xd9   : > { %2236 = vmatprep.subr.bf16.mxu1 %v2337_v17 }
  0xdb   : > { %2173 = vmatmul.mubr.msk.bf16.vlgmr.msra.gmra.mxu0 %vm541_vm3, %v1019_v1  ;;  %v1370_v1 = vld [vmem:[#allocation2 + $0x52] sm:$0xff] }
  0xdc   : > { %2215 = vmatpush3.bf16.msra.mxu0 %v1278_v2  ;;  %2176 = vmatprep.mubr.msk.bf16.mxu0 %vm2338_vm14, %v2337_v17  ;;  %v1369_v2 = vld [vmem:[#allocation2 + $0x4a] sm:$0xff] }
  0xdd   : > { %2258 = vmatprep.subr.bf16.mxu0 %v2337_v17 }
  0xdf   : > { %2155 = vmatmul.mubr.msk.bf16.gmra.mxu1 %vm541_vm3, %v902_v4  ;;  %v1376_v4 = vpack.c.bf16 %v1370_v1, %v1369_v2 }
  0xe0   : > { %2158 = vmatprep.mubr.msk.bf16.mxu1 %vm2338_vm14, %v2337_v17 }
  0xe3   : > { %2177 = vmatmul.mubr.msk.bf16.gmra.mxu0 %vm541_vm3, %v1020_v7  ;;  %v1494_v7 = vpack.c.bf16 %v1488_v5, %v1487_v6 }
  0xe4   : > { %2180 = vmatprep.mubr.msk.bf16.mxu0 %vm2338_vm14, %v2337_v17 }
  0xe7   : > { %2159 = vmatmul.mubr.msk.bf16.gmra.mxu1 %vm541_vm3, %v903_v46  ;;  %v1371_v46 = vld [vmem:[#allocation2 + $0x5a] sm:$0xff] }
  0xe8   : > { %2162 = vmatprep.mubr.msk.bf16.mxu1 %vm2338_vm14, %v2337_v17  ;;  %v1377_v9 = vpack.c.bf16 %v1372_v8, %v1371_v46 }
  0xeb   : > { %2181 = vmatmul.mubr.msk.bf16.gmra.mxu0 %vm541_vm3, %v1021_v10  ;;  %v1489_v10 = vld [vmem:[#allocation2 + $0x5b] sm:$0xff] }
  0xec   : > { %2184 = vmatprep.mubr.msk.bf16.mxu0 %vm2338_vm14, %v2337_v17 }
  0xef   : > { %2163 = vmatmul.mubr.msk.bf16.gmra.mxu1 %vm541_vm3, %v904_v11  ;;  %v1490_v11 = vld [vmem:[#allocation2 + $0x63] sm:$0xff] }
  0xf0   : > { %2166 = vmatprep.mubr.msk.bf16.mxu1 %vm2338_vm14, %v2337_v17  ;;  %v1495_v12 = vpack.c.bf16 %v1490_v11, %v1489_v10 }
  0xf3   : > { %2185 = vmatmul.mubr.msk.bf16.gmra.mxu0 %vm541_vm3, %v1022_v14 }
  0xf4   : > { %2188 = vmatprep.mubr.msk.bf16.mxu0 %vm2338_vm14, %v2337_v17 }
  0xf7   : > { %2167 = vmatmul.mubr.msk.bf16.gmra.mxu1 %vm541_vm3, %v905_v16 }
  0xf8   : > { %2194 = vmatprep.mubr.msk.bf16.mxu1 %vm2338_vm14, %v2337_v17 }
  0xfb   : > { %2189 = vmatmul.mubr.msk.bf16.gmra.mxu0 %vm541_vm3, %v1023_v20 }
  0xfc   : > { %2216 = vmatprep.mubr.msk.bf16.mxu0 %vm2338_vm14, %v2337_v17 }
  0xff   : > { %2195 = vmatmul.mubr.msk.bf16.vlgmr.msra.gmra.mxu1 %vm541_vm3, %v1137_v24 }
 0x100   : > { %2237 = vmatpush3.bf16.msra.mxu1 %v1396_v25  ;;  %2198 = vmatprep.mubr.msk.bf16.mxu1 %vm2338_vm14, %v2337_v17 }
 0x103   : > { %2217 = vmatmul.mubr.msk.bf16.vlgmr.msra.gmra.mxu0 %vm541_vm3, %v1255_v28 }
 0x104   : > { %2259 = vmatpush3.bf16.msra.mxu0 %v1514_v29  ;;  %2220 = vmatprep.mubr.msk.bf16.mxu0 %vm2338_vm14, %v2337_v17 }
 0x107   : > { %2199 = vmatmul.mubr.msk.bf16.gmra.mxu1 %vm541_vm3, %v1138_v31 }
 0x108   : > { %2202 = vmatprep.mubr.msk.bf16.mxu1 %vm2338_vm14, %v2337_v17 }
 0x10b   : > { %2221 = vmatmul.mubr.msk.bf16.gmra.mxu0 %vm541_vm3, %v1256_v33 }
 0x10c   : > { %2224 = vmatprep.mubr.msk.bf16.mxu0 %vm2338_vm14, %v2337_v17 }
 0x10f   : > { %2203 = vmatmul.mubr.msk.bf16.gmra.mxu1 %vm541_vm3, %v1139_v35 }
 0x110   : > { %2206 = vmatprep.mubr.msk.bf16.mxu1 %vm2338_vm14, %v2337_v17 }
 0x113   : > { %2225 = vmatmul.mubr.msk.bf16.gmra.mxu0 %vm541_vm3, %v1257_v37 }
 0x114   : > { %2228 = vmatprep.mubr.msk.bf16.mxu0 %vm2338_vm14, %v2337_v17 }
 0x117   : > { %2207 = vmatmul.mubr.msk.bf16.gmra.mxu1 %vm541_vm3, %v1140_v40 }
 0x118   : > { %2210 = vmatprep.mubr.msk.bf16.mxu1 %vm2338_vm14, %v2337_v17 }
 0x11b   : > { %2229 = vmatmul.mubr.msk.bf16.gmra.mxu0 %vm541_vm3, %v1258_v42 }
 0x11c   : > { %2232 = vmatprep.mubr.msk.bf16.mxu0 %vm2338_vm14, %v2337_v17 }
 0x11f   : > { %2211 = vmatmul.mubr.msk.bf16.gmra.mxu1 %vm541_vm3, %v1141_v44 }
 0x120   : > { %2238 = vmatprep.mubr.msk.bf16.mxu1 %vm2338_vm14, %v2337_v17 }
 0x123   : > { %2233 = vmatmul.mubr.msk.bf16.gmra.mxu0 %vm541_vm3, %v1259_v47 }
 0x124   : > { %2260 = vmatprep.mubr.msk.bf16.mxu0 %vm2338_vm14, %v2337_v17 }
 0x127   : > { %2239 = vmatmul.mubr.msk.bf16.vlgmr.msra.gmra.mxu1 %vm541_vm3, %v1373_v50 }
 0x128   : > { %2242 = vmatprep.mubr.msk.bf16.mxu1 %vm2338_vm14, %v2337_v17 }
 0x12b   : > { %2261 = vmatmul.mubr.msk.bf16.vlgmr.msra.gmra.mxu0 %vm541_vm3, %v1491_v53 }
 0x12c   : > { %2264 = vmatprep.mubr.msk.bf16.mxu0 %vm2338_vm14, %v2337_v17 }
 0x12f   : > { %2243 = vmatmul.mubr.msk.bf16.gmra.mxu1 %vm541_vm3, %v1374_v56 }
 0x130   : > { %2246 = vmatprep.mubr.msk.bf16.mxu1 %vm2338_vm14, %v2337_v17 }
 0x133   : > { %2265 = vmatmul.mubr.msk.bf16.gmra.mxu0 %vm541_vm3, %v1492_v59 }
 0x134   : > { %2268 = vmatprep.mubr.msk.bf16.mxu0 %vm2338_vm14, %v2337_v17 }
 0x137   : > { %2247 = vmatmul.mubr.msk.bf16.gmra.mxu1 %vm541_vm3, %v1375_v61 }
 0x138   : > { %2250 = vmatprep.mubr.msk.bf16.mxu1 %vm2338_vm14, %v2337_v17 }
 0x13b   : > { %2269 = vmatmul.mubr.msk.bf16.gmra.mxu0 %vm541_vm3, %v1493_v0 }
 0x13c   : > { %2272 = vmatprep.mubr.msk.bf16.mxu0 %vm2338_vm14, %v2337_v17 }
 0x13f   : > { %2251 = vmatmul.mubr.msk.bf16.gmra.mxu1 %vm541_vm3, %v1376_v4 }
 0x140   : > { %2254 = vmatprep.mubr.msk.bf16.mxu1 %vm2338_vm14, %v2337_v17 }
 0x143   : > { %2273 = vmatmul.mubr.msk.bf16.gmra.mxu0 %vm541_vm3, %v1494_v7 }
 0x144   : > { %2276 = vmatprep.mubr.msk.bf16.mxu0 %vm2338_vm14, %v2337_v17 }
 0x147   : > { %2255 = vmatmul.mubr.msk.bf16.gmra.mxu1 %vm541_vm3, %v1377_v9 }
 0x14b   : > { %2277 = vmatmul.mubr.msk.bf16.gmra.mxu0 %vm541_vm3, %v1495_v12 }
 0x15b   : > { %v643_v13 = vpop.f32.mrf.mxu0 }
 0x15d   : > { %v2086_v14 = vpop.f32.mrf.mxu0 }
 0x15f   : > { %v646_v15 = vpop.f32.mrf.mxu0  ;;  %v2733_v16 = vpop.f32.mrf.mxu1 }
 0x161   : > { %v2087_v18 = vpop.f32.mrf.mxu0  ;;  %v2098_v19 = vpop.f32.mrf.mxu1 }
 0x163   : > { %v651_v20 = vpop.f32.mrf.mxu0  ;;  %v2735_v21 = vpop.f32.mrf.mxu1 }
 0x165   : > { %v2090_v22 = vpop.f32.mrf.mxu0  ;;  %v2099_v17 = vpop.f32.mrf.mxu1 }
 0x167   : > { %v654_v23 = vpop.f32.mrf.mxu0  ;;  %v2737_v24 = vpop.f32.mrf.mxu1 }
 0x169   : > { %v2091_v25 = vpop.f32.mrf.mxu0  ;;  %v2102_v26 = vpop.f32.mrf.mxu1 }
 0x16b   : > { %v659_v27 = vpop.f32.mrf.mxu0  ;;  %v2739_v28 = vpop.f32.mrf.mxu1 }
 0x16d   : > { %v2094_v29 = vpop.f32.mrf.mxu0  ;;  %v2103_v30 = vpop.f32.mrf.mxu1 }
 0x16f   : > { %v662_v31 = vpop.f32.mrf.mxu0  ;;  %v734_v32 = vpop.f32.mrf.mxu1 }
 0x170   : > { %v735_v33 = vadd.f32 %v734_v32, %v643_v13 }
 0x171   : > { %v2095_v34 = vpop.f32.mrf.mxu0  ;;  %v2108_v35 = vpop.f32.mrf.mxu1 }
 0x173   : > { %v737_v36 = vpop.f32.mrf.mxu1  ;;  %v842_v37 = vpop.f32.mrf.mxu0 }
 0x174   : > { %v738_v38 = vadd.f32 %v737_v36, %v646_v15  ;;  %v2741_v40 = vadd.f32 %v842_v37, %v735_v33 }
 0x175   : > { %v2109_v41 = vpop.f32.mrf.mxu1  ;;  %v2130_v42 = vpop.f32.mrf.mxu0 }
 0x177   : > { %v742_v43 = vpop.f32.mrf.mxu1  ;;  %v845_v44 = vpop.f32.mrf.mxu0 }
 0x178   : > { %v743_v45 = vadd.f32 %v742_v43, %v651_v20  ;;  %v882_v47 = vadd.f32 %v845_v44, %v738_v38 }
 0x179   : > { %v2112_v48 = vpop.f32.mrf.mxu1  ;;  %v2131_v49 = vpop.f32.mrf.mxu0 }
 0x17b   : > { %v745_v50 = vpop.f32.mrf.mxu1  ;;  %v850_v51 = vpop.f32.mrf.mxu0 }
 0x17c   : > { %v746_v52 = vadd.f32 %v745_v50, %v654_v23  ;;  %v883_v53 = vadd.f32 %v850_v51, %v743_v45 }
 0x17d   : > { %v2113_v54 = vpop.f32.mrf.mxu1  ;;  %v2134_v55 = vpop.f32.mrf.mxu0 }
 0x17f   : > { %v750_v56 = vpop.f32.mrf.mxu1  ;;  %v853_v57 = vpop.f32.mrf.mxu0 }
 0x180   : > { %v751_v58 = vadd.f32 %v750_v56, %v659_v27  ;;  %v884_v59 = vadd.f32 %v853_v57, %v746_v52 }
 0x181   : > { %v2116_v39 = vpop.f32.mrf.mxu1  ;;  %v2135_v60 = vpop.f32.mrf.mxu0 }
 0x183   : > { %v753_v61 = vpop.f32.mrf.mxu1  ;;  %v858_v3 = vpop.f32.mrf.mxu0 }
 0x184   : > { %v754_v62 = vadd.f32 %v753_v61, %v662_v31  ;;  %v885_v63 = vadd.f32 %v858_v3, %v751_v58 }
 0x185   : > { %v2117_v0 = vpop.f32.mrf.mxu1  ;;  %v2138_v1 = vpop.f32.mrf.mxu0 }
 0x187   : > { %v758_v2 = vpop.f32.mrf.mxu1  ;;  %v861_v4 = vpop.f32.mrf.mxu0 }
 0x188   : > { %v759_v5 = vadd.f32 %v758_v2, %v2733_v16  ;;  %v886_v6 = vadd.f32 %v861_v4, %v754_v62 }
 0x189   : > { %v2120_v7 = vpop.f32.mrf.mxu1  ;;  %v2139_v46 = vpop.f32.mrf.mxu0 }
 0x18b   : > { %v761_v8 = vpop.f32.mrf.mxu1  ;;  %v866_v9 = vpop.f32.mrf.mxu0 }
 0x18c   : > { %v762_v10 = vadd.f32 %v761_v8, %v2735_v21  ;;  %v887_v11 = vadd.f32 %v866_v9, %v759_v5 }
 0x18d   : > { %v2121_v12 = vpop.f32.mrf.mxu1  ;;  %v2142_v13 = vpop.f32.mrf.mxu0 }
 0x18f   : > { %v766_v14 = vpop.f32.mrf.mxu1  ;;  %v869_v15 = vpop.f32.mrf.mxu0 }
 0x190   : > { %v767_v18 = vadd.f32 %v766_v14, %v2737_v24  ;;  %v888_v19 = vadd.f32 %v869_v15, %v762_v10 }
 0x191   : > { %v2124_v20 = vpop.f32.mrf.mxu1  ;;  %v2143_v22 = vpop.f32.mrf.mxu0 }
 0x193   : > { %v769_v17 = vpop.f32.mrf.mxu1  ;;  %v874_v23 = vpop.f32.mrf.mxu0 }
 0x194   : > { %v770_v16 = vadd.f32 %v769_v17, %v2739_v28  ;;  %v889_v25 = vadd.f32 %v874_v23, %v767_v18 }
 0x195   : > { %v2125_v26 = vpop.f32.mrf.mxu1  ;;  %v2146_v27 = vpop.f32.mrf.mxu0 }
 0x197   : > { %v877_v29 = vpop.f32.mrf.mxu0  ;;  %v960_v30 = vpop.f32.mrf.mxu1 }
 0x198   : > { %v890_v21 = vadd.f32 %v877_v29, %v770_v16  ;;  %v999_v31 = vadd.f32 %v960_v30, %v2741_v40 }
 0x199   : > { %v2147_v32 = vpop.f32.mrf.mxu0  ;;  %v2152_v33 = vpop.f32.mrf.mxu1 }
 0x19b   : > { %v963_v34 = vpop.f32.mrf.mxu1  ;;  %v1078_v35 = vpop.f32.mrf.mxu0 }
 0x19c   : > { %v1000_v24 = vadd.f32 %v963_v34, %v882_v47  ;;  %v2787_v36 = vadd.f32 %v1078_v35, %v999_v31 }
 0x19d   : > { %v2153_v37 = vpop.f32.mrf.mxu1  ;;  %v2174_v38 = vpop.f32.mrf.mxu0 }
 0x19f   : > { %v968_v41 = vpop.f32.mrf.mxu1  ;;  %v1081_v42 = vpop.f32.mrf.mxu0 }
 0x1a0   : > { %v1001_v28 = vadd.f32 %v968_v41, %v883_v53  ;;  %v2789_v43 = vadd.f32 %v1081_v42, %v1000_v24 }
 0x1a1   : > { %v2156_v44 = vpop.f32.mrf.mxu1  ;;  %v2175_v45 = vpop.f32.mrf.mxu0 }
 0x1a3   : > { %v971_v48 = vpop.f32.mrf.mxu1  ;;  %v1086_v49 = vpop.f32.mrf.mxu0 }
 0x1a4   : > { %v1002_v50 = vadd.f32 %v971_v48, %v884_v59  ;;  %v2791_v40 = vadd.f32 %v1086_v49, %v1001_v28 }
 0x1a5   : > { %v2157_v51 = vpop.f32.mrf.mxu1  ;;  %v2178_v52 = vpop.f32.mrf.mxu0 }
 0x1a7   : > { %v976_v54 = vpop.f32.mrf.mxu1  ;;  %v1089_v47 = vpop.f32.mrf.mxu0 }
 0x1a8   : > { %v1003_v55 = vadd.f32 %v976_v54, %v885_v63  ;;  %v2793_v56 = vadd.f32 %v1089_v47, %v1002_v50 }
 0x1a9   : > { %v2160_v57 = vpop.f32.mrf.mxu1  ;;  %v2179_v58 = vpop.f32.mrf.mxu0 }
 0x1ab   : > { %v979_v39 = vpop.f32.mrf.mxu1  ;;  %v1094_v53 = vpop.f32.mrf.mxu0 }
 0x1ac   : > { %v1004_v60 = vadd.f32 %v979_v39, %v886_v6  ;;  %v2795_v61 = vadd.f32 %v1094_v53, %v1003_v55 }
 0x1ad   : > { %v2161_v3 = vpop.f32.mrf.mxu1  ;;  %v2182_v62 = vpop.f32.mrf.mxu0 }
 0x1af   : > { %v984_v0 = vpop.f32.mrf.mxu1  ;;  %v1097_v59 = vpop.f32.mrf.mxu0 }
 0x1b0   : > { %v1005_v1 = vadd.f32 %v984_v0, %v887_v11  ;;  %v2797_v2 = vadd.f32 %v1097_v59, %v1004_v60 }
 0x1b1   : > { %v2164_v4 = vpop.f32.mrf.mxu1  ;;  %v2183_v5 = vpop.f32.mrf.mxu0 }
 0x1b3   : > { %v987_v7 = vpop.f32.mrf.mxu1  ;;  %v1102_v63 = vpop.f32.mrf.mxu0 }
 0x1b4   : > { %v1006_v46 = vadd.f32 %v987_v7, %v888_v19  ;;  %v2799_v8 = vadd.f32 %v1102_v63, %v1005_v1 }
 0x1b5   : > { %v2165_v9 = vpop.f32.mrf.mxu1  ;;  %v2186_v10 = vpop.f32.mrf.mxu0 }
 0x1b7   : > { %v992_v12 = vpop.f32.mrf.mxu1  ;;  %v1105_v6 = vpop.f32.mrf.mxu0 }
 0x1b8   : > { %v1007_v13 = vadd.f32 %v992_v12, %v889_v25  ;;  %v2801_v14 = vadd.f32 %v1105_v6, %v1006_v46 }
 0x1b9   : > { %v2168_v15 = vpop.f32.mrf.mxu1  ;;  %v2187_v18 = vpop.f32.mrf.mxu0 }
 0x1bb   : > { %v995_v20 = vpop.f32.mrf.mxu1  ;;  %v1110_v11 = vpop.f32.mrf.mxu0 }
 0x1bc   : > { %v1008_v22 = vadd.f32 %v995_v20, %v890_v21  ;;  %v2803_v17 = vadd.f32 %v1110_v11, %v1007_v13  ;;  %v2836_v11 = vld [vmem:[%s2917_s5] ss:$0 sm:$0xff] }
 0x1bd   : > { %v2169_v23 = vpop.f32.mrf.mxu1  ;;  %v2190_v16 = vpop.f32.mrf.mxu0 }
 0x1bf   : > { %v1113_v26 = vpop.f32.mrf.mxu0  ;;  %v1196_v19 = vpop.f32.mrf.mxu1 }
 0x1c0   : > { %v2805_v27 = vadd.f32 %v1113_v26, %v1008_v22  ;;  %v1235_v63 = vadd.f32 %v1196_v19, %v2787_v36  ;;  %v2841_v36 = vld [vmem:[%s2918_s6] ss:$0 sm:$0xff] }
 0x1c1   : > { %v2191_v29 = vpop.f32.mrf.mxu0  ;;  %v2196_v30 = vpop.f32.mrf.mxu1 }
 0x1c3   : > { %v1199_v31 = vpop.f32.mrf.mxu1  ;;  %v1314_v32 = vpop.f32.mrf.mxu0 }
 0x1c4   : > { %v1353_v10 = vadd.f32 %v1314_v32, %v1235_v63  ;;  %v1236_v13 = vadd.f32 %v1199_v31, %v2789_v43  ;;  %v1675_v32 = vpop.permute.xlu0 %1674 }
 0x1c5   : > { %v2197_v25 = vpop.f32.mrf.mxu1  ;;  %v2218_v33 = vpop.f32.mrf.mxu0  ;;  %vm1703_vm14 = vcmp.eq.s32.totalorder %v1675_v32, 1 }
 0x1c7   : > { %v1204_v34 = vpop.f32.mrf.mxu1  ;;  %v1317_v35 = vpop.f32.mrf.mxu0 }
 0x1c8   : > { %v1354_v22 = vadd.f32 %v1317_v35, %v1236_v13  ;;  %v1237_v19 = vadd.f32 %v1204_v34, %v2791_v40  ;;  %v1681_v63 = vpop.permute.xlu0 %1680 }
 0x1c9   : > { %v2200_v24 = vpop.f32.mrf.mxu1  ;;  %v2219_v37 = vpop.f32.mrf.mxu0  ;;  %vm1705_vm6 = vcmp.eq.s32.totalorder %v1681_v63, 1 }
 0x1cb   : > { %v1207_v38 = vpop.f32.mrf.mxu1  ;;  %v1322_v21 = vpop.f32.mrf.mxu0 }
 0x1cc   : > { %v1355_v25 = vadd.f32 %v1322_v21, %v1237_v19 }
 0x1cd   : > { %v2201_v41 = vpop.f32.mrf.mxu1  ;;  %v2222_v42 = vpop.f32.mrf.mxu0 }
 0x1ce   : > { %v1238_v41 = vadd.f32 %v1207_v38, %v2793_v56 }
 0x1cf   : > { %v2807_v28 = vpop.f32.mrf.mxu1  ;;  %v1325_v44 = vpop.f32.mrf.mxu0 }
 0x1d0   : > { %v1239_v56 = vadd.f32 %v2807_v28, %v2795_v61 }
 0x1d1   : > { %v2204_v45 = vpop.f32.mrf.mxu1  ;;  %v2223_v48 = vpop.f32.mrf.mxu0 }
 0x1d3   : > { %v2809_v49 = vpop.f32.mrf.mxu1  ;;  %v2811_v50 = vpop.f32.mrf.mxu0 }
 0x1d4   : > { %v1240_v28 = vadd.f32 %v2809_v49, %v2797_v2 }
 0x1d5   : > { %v2205_v51 = vpop.f32.mrf.mxu1  ;;  %v2226_v52 = vpop.f32.mrf.mxu0 }
 0x1d6   : > { %v1678_v51 = vpop.permute.xlu1 %1677  ;;  %v1356_v52 = vadd.f32 %v1325_v44, %v1238_v41 }
 0x1d7   : > { %v2813_v54 = vpop.f32.mrf.mxu1  ;;  %v2815_v47 = vpop.f32.mrf.mxu0  ;;  %vm1704_vm3 = vcmp.eq.s32.totalorder %v1678_v51, 1 }
 0x1d8   : > { %v1241_v49 = vadd.f32 %v2813_v54, %v2799_v8 }
 0x1d9   : > { %v2208_v55 = vpop.f32.mrf.mxu1  ;;  %v2227_v57 = vpop.f32.mrf.mxu0 }
 0x1db   : > { %v2817_v58 = vpop.f32.mrf.mxu1  ;;  %v2819_v39 = vpop.f32.mrf.mxu0 }
 0x1dc   : > { %v1242_v54 = vadd.f32 %v2817_v58, %v2801_v14 }
 0x1dd   : > { %v2209_v53 = vpop.f32.mrf.mxu1  ;;  %v2230_v60 = vpop.f32.mrf.mxu0 }
 0x1df   : > { %v2821_v3 = vpop.f32.mrf.mxu1  ;;  %v2823_v62 = vpop.f32.mrf.mxu0 }
 0x1e0   : > { %v1243_v58 = vadd.f32 %v2821_v3, %v2803_v17 }
 0x1e1   : > { %v2212_v0 = vpop.f32.mrf.mxu1  ;;  %v2231_v59 = vpop.f32.mrf.mxu0 }
 0x1e3   : > { %v2825_v1 = vpop.f32.mrf.mxu1  ;;  %v2827_v4 = vpop.f32.mrf.mxu0 }
 0x1e4   : > { %v1244_v3 = vadd.f32 %v2825_v1, %v2805_v27 }
 0x1e5   : > { %v2213_v5 = vpop.f32.mrf.mxu1  ;;  %v2234_v7 = vpop.f32.mrf.mxu0 }
 0x1e7   : > { %v2830_v46 = vpop.f32.mrf.mxu0  ;;  %v1432_v9 = vpop.f32.mrf.mxu1 }
 0x1e8   : > { %v1471_v15 = vadd.f32 %v1432_v9, %v1353_v10  ;;  %v1357_v9 = vadd.f32 %v2811_v50, %v1239_v56 }
 0x1e9   : > { %v2235_v12 = vpop.f32.mrf.mxu0  ;;  %v2240_v6 = vpop.f32.mrf.mxu1 }
 0x1eb   : > { %v1435_v18 = vpop.f32.mrf.mxu1  ;;  %v1550_v20 = vpop.f32.mrf.mxu0 }
 0x1ec   : > { %v1589_v23 = vadd.f32 %v1550_v20, %v1471_v15  ;;  %v1472_v43 = vadd.f32 %v1435_v18, %v1354_v22 }
 0x1ed   : > { %v2241_v16 = vpop.f32.mrf.mxu1  ;;  %v2262_v26 = vpop.f32.mrf.mxu0 }
 0x1ee   : > { %v1606_v29 = vmul.f32 %v2836_v11, %v1589_v23  ;;  %v1684_v16 = vpop.permute.xlu1 %1683  ;;  %v1358_v26 = vadd.f32 %v2815_v47, %v1240_v28 }
 0x1ef   : > { %v1440_v30 = vpop.f32.mrf.mxu1  ;;  %v1553_v31 = vpop.f32.mrf.mxu0  ;;  %vm1706_vm7 = vcmp.eq.s32.totalorder %v1684_v16, 1 }
 0x1f0   : > { %v1623_v33 = vadd.f32 %v2841_v36, %v1606_v29  ;;  %v1590_v35 = vadd.f32 %v1553_v31, %v1472_v43  ;;  %v1473_v45 = vadd.f32 %v1440_v30, %v1355_v25 }
 0x1f1   : > { %v2244_v24 = vpop.f32.mrf.mxu1  ;;  %v2263_v37 = vpop.f32.mrf.mxu0 }
 0x1f2   : > { %v1633_v42 = vmax.f32 %v1623_v33, 0.0  ;;  %v1607_v48 = vmul.f32 %v2836_v11, %v1590_v35  ;;  %v1687_v24 = vpop.permute.xlu0 %1686  ;;  %v1359_v37 = vadd.f32 %v2819_v39, %v1241_v49 }
 0x1f3   : > { %v1443_v40 = vpop.f32.mrf.mxu1  ;;  %v1558_v34 = vpop.f32.mrf.mxu0  ;;  %vm1707_vm8 = vcmp.eq.s32.totalorder %v1687_v24, 1 }
 0x1f4   : > { %v1713_v55 = vsel %vm1703_vm14, %v1633_v42, 0.0  ;;  %v1624_v21 = vadd.f32 %v2841_v36, %v1607_v48  ;;  %v1591_v57 = vadd.f32 %v1558_v34, %v1473_v45  ;;  %v1474_v59 = vadd.f32 %v1443_v40, %v1356_v52 }
 0x1f5   : > { %v1989_v53 = vpack.c.bf16 %v1713_v55, %v1713_v55  ;;  %v2245_v60 = vpop.f32.mrf.mxu1  ;;  %v2266_v0 = vpop.f32.mrf.mxu0 }
 0x1f6   : > { %v1634_v38 = vmax.f32 %v1624_v21, 0.0  ;;  %v1608_v5 = vmul.f32 %v2836_v11, %v1591_v57  ;;  %v1690_v21 = vpop.permute.xlu1 %1689  ;;  %v1360_v57 = vadd.f32 %v2823_v62, %v1242_v54  ;;  %v1693_v63 = vpop.permute.xlu0 %1692 }
 0x1f7   : > { %1783 = vst.msk [vmem:[%s2466_s11 + $0x8] sm:$0xf] %vm1723_vm10, %v1989_v53  ;;  %v1448_v7 = vpop.f32.mrf.mxu1  ;;  %v1561_v44 = vpop.f32.mrf.mxu0  ;;  %vm1708_vm9 = vcmp.eq.s32.totalorder %v1690_v21, 1  ;;  %vm1709_vm11 = vcmp.eq.s32.totalorder %v1693_v63, 1 }
 0x1f8   : > { %v1714_v10 = vsel %vm1704_vm3, %v1634_v38, 0.0  ;;  %v1625_v12 = vadd.f32 %v2841_v36, %v1608_v5  ;;  %v1592_v6 = vadd.f32 %v1561_v44, %v1474_v59  ;;  %v1475_v20 = vadd.f32 %v1448_v7, %v1357_v9 }
 0x1f9   : > { %v1990_v13 = vpack.c.bf16 %v1714_v10, %v1714_v10  ;;  %v2248_v15 = vpop.f32.mrf.mxu1  ;;  %v2267_v61 = vpop.f32.mrf.mxu0  ;;  %v1361_v9 = vadd.f32 %v2827_v4, %v1243_v58 }
 0x1fa   : > { %v1635_v18 = vmax.f32 %v1625_v12, 0.0  ;;  %v1609_v22 = vmul.f32 %v2836_v11, %v1592_v6 }
 0x1fb   : > { %1784 = vst.msk [vmem:[%s2466_s11 + $0xc] sm:$0xf] %vm1723_vm10, %v1990_v13  ;;  %v1451_v23 = vpop.f32.mrf.mxu1  ;;  %v1566_v50 = vpop.f32.mrf.mxu0 }
 0x1fc   : > { %v1715_v19 = vsel %vm1705_vm6, %v1635_v18, 0.0  ;;  %v1626_v43 = vadd.f32 %v2841_v36, %v1609_v22  ;;  %v1593_v29 = vadd.f32 %v1566_v50, %v1475_v20  ;;  %v1476_v25 = vadd.f32 %v1451_v23, %v1358_v26  ;;  %v1696_v22 = vpop.permute.xlu1 %1695 }
 0x1fd   : > { %v1991_v30 = vpack.c.bf16 %v1715_v19, %v1715_v19  ;;  %v2249_v31 = vpop.f32.mrf.mxu1  ;;  %v2270_v2 = vpop.f32.mrf.mxu0  ;;  %v1362_v23 = vadd.f32 %v2830_v46, %v1244_v3  ;;  %vm1710_vm12 = vcmp.eq.s32.totalorder %v1696_v22, 1 }
 0x1fe   : > { %v1636_v32 = vmax.f32 %v1626_v43, 0.0  ;;  %v1610_v33 = vmul.f32 %v2836_v11, %v1593_v29  ;;  %v1699_v2 = vpop.permute.xlu0 %1698 }
 0x1ff   : > { %1785 = vst.msk [vmem:[%s2466_s11 + $0x10] sm:$0xf] %vm1723_vm10, %v1991_v30  ;;  %v1456_v35 = vpop.f32.mrf.mxu1  ;;  %v1569_v47 = vpop.f32.mrf.mxu0  ;;  %vm1711_vm13 = vcmp.eq.s32.totalorder %v1699_v2, 1 }
 0x200   : > { %v1716_v41 = vsel %vm1706_vm7, %v1636_v32, 0.0  ;;  %v1627_v42 = vadd.f32 %v2841_v36, %v1610_v33  ;;  %v1594_v45 = vadd.f32 %v1569_v47, %v1476_v25  ;;  %v1477_v51 = vadd.f32 %v1456_v35, %v1359_v37  ;;  %v1702_v24 = vpop.permute.xlu1 %1701 }
 0x201   : > { %v1992_v48 = vpack.c.bf16 %v1716_v41, %v1716_v41  ;;  %v2252_v40 = vpop.f32.mrf.mxu1  ;;  %v2271_v8 = vpop.f32.mrf.mxu0  ;;  %vm1712_vm15 = vcmp.eq.s32.totalorder %v1702_v24, 1 }
 0x202   : > { %v1637_v34 = vmax.f32 %v1627_v42, 0.0  ;;  %v1611_v52 = vmul.f32 %v2836_v11, %v1594_v45 }
 0x203   : > { %1786 = vst.msk [vmem:[%s2466_s11 + $0x14] sm:$0xf] %vm1723_vm10, %v1992_v48  ;;  %v1459_v55 = vpop.f32.mrf.mxu1  ;;  %v1574_v39 = vpop.f32.mrf.mxu0 }
 0x204   : > { %v1717_v53 = vsel %vm1707_vm8, %v1637_v34, 0.0  ;;  %v1628_v60 = vadd.f32 %v2841_v36, %v1611_v52  ;;  %v1595_v0 = vadd.f32 %v1574_v39, %v1477_v51  ;;  %v1478_v5 = vadd.f32 %v1459_v55, %v1360_v57 }
 0x205   : > { %v1993_v56 = vpack.c.bf16 %v1717_v53, %v1717_v53  ;;  %v2253_v38 = vpop.f32.mrf.mxu1  ;;  %v2274_v14 = vpop.f32.mrf.mxu0 }
 0x206   : > { %v1638_v59 = vmax.f32 %v1628_v60, 0.0  ;;  %v1612_v7 = vmul.f32 %v2836_v11, %v1595_v0 }
 0x207   : > { %1787 = vst.msk [vmem:[%s2466_s11 + $0x18] sm:$0xf] %vm1723_vm10, %v1993_v56  ;;  %v1464_v44 = vpop.f32.mrf.mxu1  ;;  %v1577_v62 = vpop.f32.mrf.mxu0 }
 0x208   : > { %v1718_v10 = vsel %vm1708_vm9, %v1638_v59, 0.0  ;;  %v1629_v12 = vadd.f32 %v2841_v36, %v1612_v7  ;;  %v1596_v6 = vadd.f32 %v1577_v62, %v1478_v5  ;;  %v1479_v28 = vadd.f32 %v1464_v44, %v1361_v9 }
 0x209   : > { %v1994_v13 = vpack.c.bf16 %v1718_v10, %v1718_v10  ;;  %v2256_v15 = vpop.f32.mrf.mxu1  ;;  %v2275_v17 = vpop.f32.mrf.mxu0 }
 0x20a   : > { %v1639_v61 = vmax.f32 %v1629_v12, 0.0  ;;  %v1613_v18 = vmul.f32 %v2836_v11, %v1596_v6 }
 0x20b   : > { %1788 = vst.msk [vmem:[%s2466_s11 + $0x1c] sm:$0xf] %vm1723_vm10, %v1994_v13  ;;  %v1467_v20 = vpop.f32.mrf.mxu1  ;;  %v1582_v4 = vpop.f32.mrf.mxu0 }
 0x20c   : > { %v1719_v50 = vsel %vm1709_vm11, %v1639_v61, 0.0  ;;  %v1630_v16 = vadd.f32 %v2841_v36, %v1613_v18  ;;  %v1597_v26 = vadd.f32 %v1582_v4, %v1479_v28  ;;  %v1480_v29 = vadd.f32 %v1467_v20, %v1362_v23 }
 0x20d   : > { %v1995_v19 = vpack.c.bf16 %v1719_v50, %v1719_v50  ;;  %v2257_v43 = vpop.f32.mrf.mxu1  ;;  %v2278_v27 = vpop.f32.mrf.mxu0 }
 0x20e   : > { %v1640_v1 = vmax.f32 %v1630_v16, 0.0  ;;  %v1614_v30 = vmul.f32 %v2836_v11, %v1597_v26 }
 0x20f   : > { %1789 = vst.msk [vmem:[%s2466_s11 + $0x20] sm:$0xf] %vm1723_vm10, %v1995_v19  ;;  %v1585_v31 = vpop.f32.mrf.mxu0 }
 0x210   : > { %v1720_v49 = vsel %vm1710_vm12, %v1640_v1, 0.0  ;;  %v1631_v46 = vadd.f32 %v2841_v36, %v1614_v30  ;;  %v1598_v32 = vadd.f32 %v1585_v31, %v1480_v29 }
 0x211   : > { %v1996_v25 = vpack.c.bf16 %v1720_v49, %v1720_v49  ;;  %v2279_v33 = vpop.f32.mrf.mxu0 }
 0x212   : > { %v1641_v35 = vmax.f32 %v1631_v46, 0.0  ;;  %v1615_v47 = vmul.f32 %v2836_v11, %v1598_v32 }
 0x213   : > { %1790 = vst.msk [vmem:[%s2466_s11 + $0x24] sm:$0xf] %vm1723_vm10, %v1996_v25 }
 0x214   : > { %v1721_v37 = vsel %vm1711_vm13, %v1641_v35, 0.0  ;;  %v1632_v41 = vadd.f32 %v2841_v36, %v1615_v47 }
 0x215   : > { %v1997_v42 = vpack.c.bf16 %v1721_v37, %v1721_v37 }
 0x216   : > { %v1642_v45 = vmax.f32 %v1632_v41, 0.0 }
 0x217   : > { %1791 = vst.msk [vmem:[%s2466_s11 + $0x28] sm:$0xf] %vm1723_vm10, %v1997_v42 }
 0x218   : > { %v1722_v48 = vsel %vm1712_vm15, %v1642_v45, 0.0 }
 0x219   : > { %v1998_v40 = vpack.c.bf16 %v1722_v48, %v1722_v48 }
 0x21b   : > { %1792 = vst.msk [vmem:[%s2466_s11 + $0x2c] sm:$0xf] %vm1723_vm10, %v1998_v40 }
 0x21c PF: > { %s17_s26 = sadd.s32 1, %s2334_s26   ;;  %s2922_s24 = smov %s2330_s25 }
 0x21d   : > { %p14_p5 = scmp.ge.s32.totalorder %s17_s26, 4   ;;  %s2923_s25 = smov %s2925_s27 }
 0x21f   :  { %16 = sbr.rel (!%p14_p5) target bundleno = 2 (0x2), region = 95 }

</bundles_post_ra>
